<compile_context>
chip_gen: v5e
topology: v5e:2x2
jax: 0.10.0
libtpu: 0.0.40
codegen_flags: <defaults>
</compile_context>

<pallas_src>
import numpy as np
import jax
import jax.numpy as jnp
from jax.experimental import pallas as pl
from jax.experimental.pallas import tpu as pltpu

# ----------------------------- static problem sizes ---------------------------
B = 2
H0, W0 = 3, 4                      # forward requires (H0+6)*(W0+6)*6 == 540
C_IN, C1, C2, C3 = 65, 40, 20, 6
HO1, WO1 = H0 + 2, W0 + 2          # 5, 6
HO2, WO2 = H0 + 4, W0 + 4          # 7, 8
HO3, WO3 = H0 + 6, W0 + 6          # 9, 10
LIN1_OUT, LIN2_OUT, LIN3_OUT = 150, 50, 2


def _pad128(n):
    return ((n + 127) // 128) * 128


KP0 = _pad128(W0 * C_IN)           # 384  (layer-1 input width)
WCP1 = _pad128(WO1 * C1)           # 256  (layer-1 output width / layer-2 input)
WCP2 = _pad128(WO2 * C2)           # 256
WCP3 = _pad128(WO3 * C3)           # 128
FLAT = HO3 * WCP3                  # 1152 (lane-dense flattened conv output)
LP1 = _pad128(LIN1_OUT)            # 256
LP2 = _pad128(LIN2_OUT)            # 128
LP3 = _pad128(LIN3_OUT)            # 128
NEG_BIG = -1e30                    # bias for padded logit lanes -> exp() == 0


# ------------------------------- Pallas kernel --------------------------------

def _tconv_layer(a, wbig, bias_row, h_in, wcp_out):
    """One ConvTranspose2d(3x3, stride=1, pad=0) + ReLU, fully in vregs.

    a        : [B*h_in, K]        rows (b, h), cols w*Cin + c (zero-padded lanes)
    wbig     : [K, 3*wcp_out]     host-packed bf16 weight, one 128-aligned block per kh
    bias_row : [1, wcp_out]       per-channel f32 bias tiled over w (zero-padded)
    returns  : [B*(h_in+2), wcp_out] f32
    """
    # Single MXU matmul per layer: all (wi, kw) taps folded into wbig; only the
    # kh row shift remains and is done below on values (no VMEM scratch).
    t = jnp.dot(a.astype(jnp.bfloat16), wbig, preferred_element_type=jnp.float32)
    acc = None
    for kh in range(3):                                   # static unroll
        tk = t[:, kh * wcp_out:(kh + 1) * wcp_out]        # 128-aligned lane slice
        parts = []
        for b in range(B):
            gap = kh if b == 0 else 2                     # top pad / inter-batch gap
            if gap:
                parts.append(jnp.zeros((gap, wcp_out), jnp.float32))
            parts.append(tk[b * h_in:(b + 1) * h_in, :])  # this batch's rows
        if 2 - kh:
            parts.append(jnp.zeros((2 - kh, wcp_out), jnp.float32))
        shifted = jnp.concatenate(parts, axis=0)          # [B*(h_in+2), wcp_out]
        acc = shifted if acc is None else acc + shifted
    return jnp.maximum(acc + bias_row, 0.0)


def disc_kernel(a0_ref, w1_ref, b1_ref, w2_ref, b2_ref, w3_ref, b3_ref,
                lw1_ref, lb1_ref, lw2_ref, lb2_ref, lw3_ref, lb3_ref,
                out_ref):
    a = _tconv_layer(a0_ref[...], w1_ref[...], b1_ref[...], H0, WCP1)    # [10, 256]
    a = _tconv_layer(a, w2_ref[...], b2_ref[...], WCP1 and HO1, WCP2)    # [14, 256]
    a = _tconv_layer(a, w3_ref[...], b3_ref[...], HO2, WCP3)             # [18, 128]

    # Flatten [B*HO3, WCP3] -> [B, HO3*WCP3] in one relayout (rows are already
    # b-major / h-minor; torch's (c,h,w) permutation is folded into lw1).
    flat = a.reshape(B, FLAT)                                            # [2, 1152]

    h1 = jnp.maximum(
        jnp.dot(flat.astype(jnp.bfloat16), lw1_ref[...],
                preferred_element_type=jnp.float32) + lb1_ref[...], 0.0)  # [B, 256]
    h2 = jnp.maximum(
        jnp.dot(h1.astype(jnp.bfloat16), lw2_ref[...],
                preferred_element_type=jnp.float32) + lb2_ref[...], 0.0)  # [B, 128]
    logits = jnp.dot(h2.astype(jnp.bfloat16), lw3_ref[...],
                     preferred_element_type=jnp.float32) + lb3_ref[...]   # [B, 128]

    # Padded logit lanes carry a -1e30 bias -> exp() underflows to 0, so the
    # full-lane reductions normalize over the 2 real classes only.
    m = jnp.max(logits, axis=-1, keepdims=True)
    e = jnp.exp(logits - m)
    inv = pl.reciprocal(jnp.sum(e, axis=-1, keepdims=True), approx=True)
    out_ref[...] = e * inv                                  # lane-dense [B, 128]


# ------------------------------ host-side packing ------------------------------

def init_params(key):
    def u(k, shape, fan_in):
        bound = 1.0 / np.sqrt(fan_in)
        return jax.random.uniform(k, shape, jnp.float32, -bound, bound)

    ks = jax.random.split(key, 12)
    p = {}
    # ConvTranspose2d weights, PyTorch layout [C_in, C_out, 3, 3]; fan_in = C_out*9
    p["cw1"] = u(ks[0], (C_IN, C1, 3, 3), C1 * 9); p["cb1"] = u(ks[1], (C1,), C1 * 9)
    p["cw2"] = u(ks[2], (C1, C2, 3, 3), C2 * 9);   p["cb2"] = u(ks[3], (C2,), C2 * 9)
    p["cw3"] = u(ks[4], (C2, C3, 3, 3), C3 * 9);   p["cb3"] = u(ks[5], (C3,), C3 * 9)
    # Linear weights, PyTorch layout [out, in]; fan_in = in_features
    p["lw1"] = u(ks[6], (150, 540), 540); p["lb1"] = u(ks[7], (150,), 540)
    p["lw2"] = u(ks[8], (50, 150), 150);  p["lb2"] = u(ks[9], (50,), 150)
    p["lw3"] = u(ks[10], (2, 50), 50);    p["lb3"] = u(ks[11], (2,), 50)
    return p


def pack_params(params):
    """One-time repacking of PyTorch-layout params into kernel layouts (bf16 weights)."""
    W_DT = jnp.bfloat16

    def tconv_weight(w, w_in, k_in_pad, wo_cp):
        w = np.asarray(w, np.float32)                      # [Cin, Cout, 3, 3]
        cin, cout = w.shape[0], w.shape[1]
        big = np.zeros((k_in_pad, 3 * wo_cp), np.float32)
        for wi in range(w_in):
            for kh in range(3):
                for kw in range(3):
                    r0 = wi * cin
                    c0 = kh * wo_cp + (wi + kw) * cout
                    big[r0:r0 + cin, c0:c0 + cout] = w[:, :, kh, kw]
        # NOTE: this folding replicates the raw conv weight ~(w_in)x; on v5e one
        # could fold only kw and use in-kernel sublane rolls to cut DMA bytes.
        return jnp.asarray(big, dtype=W_DT)

    def tconv_bias(b, wo, wo_cp):
        b = np.asarray(b, np.float32)
        row = np.zeros((1, wo_cp), np.float32)
        for wi in range(wo):
            row[0, wi * b.shape[0]:(wi + 1) * b.shape[0]] = b
        return jnp.asarray(row)

    def lin1_weight(lw1):
        # torch flat column order is j = c*90 + h*10 + w; kernel flat order is
        # h*128 + w*6 + c  ->  permute + pad rows accordingly, pad cols to 256.
        w = np.asarray(lw1, np.float32)                    # [150, 540]
        w4 = w.reshape(LIN1_OUT, C3, HO3, WO3)             # [o, c, h, w]
        w4 = np.transpose(w4, (2, 3, 1, 0))                # [h, w, c, o]
        w3 = w4.reshape(HO3, WO3 * C3, LIN1_OUT)
        w3 = np.pad(w3, ((0, 0), (0, WCP3 - WO3 * C3), (0, 0)))
        w2d = w3.reshape(FLAT, LIN1_OUT)                   # [1152, 150]
        w2d = np.pad(w2d, ((0, 0), (0, LP1 - LIN1_OUT)))   # [1152, 256]
        return jnp.asarray(w2d, dtype=W_DT)

    def lin_weight(lw, in_pad, out_pad):
        w = np.asarray(lw, np.float32).T                   # [in, out]
        w = np.pad(w, ((0, in_pad - w.shape[0]), (0, out_pad - w.shape[1])))
        return jnp.asarray(w, dtype=W_DT)

    def lin_bias(lb, out_pad, pad_value=0.0):
        b = np.asarray(lb, np.float32)
        row = np.full((1, out_pad), pad_value, np.float32)
        row[0, :b.shape[0]] = b
        return jnp.asarray(row)

    return {
        "w1": tconv_weight(params["cw1"], W0, KP0, WCP1),
        "b1": tconv_bias(params["cb1"], WO1, WCP1),
        "w2": tconv_weight(params["cw2"], WO1, WCP1, WCP2),
        "b2": tconv_bias(params["cb2"], WO2, WCP2),
        "w3": tconv_weight(params["cw3"], WO2, WCP2, WCP3),
        "b3": tconv_bias(params["cb3"], WO3, WCP3),
        "lw1": lin1_weight(params["lw1"]),
        "lb1": lin_bias(params["lb1"], LP1),
        "lw2": lin_weight(params["lw2"], LP1, LP2),
        "lb2": lin_bias(params["lb2"], LP2),
        "lw3": lin_weight(params["lw3"], LP2, LP3),
        "lb3": lin_bias(params["lb3"], LP3, pad_value=NEG_BIG),
    }


@jax.jit
def discriminator_forward(packed, x, songData, otherSlices):
    # TODO(synk): songData is accepted but unused — it is also unused in the PyTorch forward.
    del songData
    # glue: torch.cat((x.unsqueeze(1), otherSlices), 1) -> rows (b,h), cols w*Cin + c
    xc = jnp.concatenate([x[:, None, :, :], otherSlices], axis=1)        # [B, 65, H0, W0]
    a0 = jnp.transpose(xc, (0, 2, 3, 1)).reshape(B * H0, W0 * C_IN)
    a0 = jnp.pad(a0, ((0, 0), (0, KP0 - W0 * C_IN))).astype(jnp.bfloat16)  # [6, 384]

    # NOTE: for many repeated forwards (GAN loop), wrap this in a 1-D grid over
    # the call batch with constant index_maps for the weight inputs so they are
    # DMA'd into VMEM once and stay resident; a single call needs no grid.
    probs = pl.pallas_call(
        disc_kernel,
        out_shape=jax.ShapeDtypeStruct((B, LP3), jnp.float32),           # lane-dense
        in_specs=[pl.BlockSpec(memory_space=pltpu.MemorySpace.VMEM)] * 13,
        out_specs=pl.BlockSpec(memory_space=pltpu.MemorySpace.VMEM),
    )(a0,
      packed["w1"], packed["b1"],
      packed["w2"], packed["b2"],
      packed["w3"], packed["b3"],
      packed["lw1"], packed["lb1"],
      packed["lw2"], packed["lb2"],
      packed["lw3"], packed["lb3"])

    return probs[:, :LIN3_OUT].reshape(B, 1, LIN3_OUT)


# ------------------------- pure numpy reference (checking) ---------------------

def ref_forward_np(params, x, otherSlices):
    p = {k: np.asarray(v, np.float64) for k, v in params.items()}
    a = np.concatenate([np.asarray(x, np.float64)[:, None],
                        np.asarray(otherSlices, np.float64)], axis=1)

    def tconv(a, w, b):
        Bn, Cin, H, W = a.shape
        Cout = w.shape[1]
        out = np.zeros((Bn, Cout, H + 2, W + 2))
        for kh in range(3):
            for kw in range(3):
                t = np.einsum('bchw,co->bohw', a, w[:, :, kh, kw])
                out[:, :, kh:kh + H, kw:kw + W] += t
        return out + b[None, :, None, None]

    a = np.maximum(tconv(a, p["cw1"], p["cb1"]), 0)
    a = np.maximum(tconv(a, p["cw2"], p["cb2"]), 0)
    a = np.maximum(tconv(a, p["cw3"], p["cb3"]), 0)
    flat = a.reshape(-1, 1, 540)
    h = np.maximum(flat @ p["lw1"].T + p["lb1"], 0)
    h = np.maximum(h @ p["lw2"].T + p["lb2"], 0)
    logits = h @ p["lw3"].T + p["lb3"]
    e = np.exp(logits - logits.max(axis=2, keepdims=True))
    return e / e.sum(axis=2, keepdims=True)


# ------------------------------------ main -------------------------------------

if __name__ == "__main__":
    key = jax.random.PRNGKey(0)
    kx, ko, ks, kp = jax.random.split(key, 4)
    x = jax.random.normal(kx, (B, H0, W0), jnp.float32)                  # [2, 3, 4]
    otherSlices = jax.random.normal(ko, (B, 64, H0, W0), jnp.float32)    # [2, 64, 3, 4]
    songData = jax.random.normal(ks, (B, 8), jnp.float32)                # unused by forward
    params = init_params(kp)
    packed = pack_params(params)                                         # one-time repack

    out = discriminator_forward(packed, x, songData, otherSlices)
    out = jax.block_until_ready(out)

    assert out.shape == (B, 1, 2)
    out_np = np.asarray(out)
    assert np.all(np.isfinite(out_np))
    assert np.allclose(out_np.sum(axis=-1), 1.0, atol=5e-3)              # softmax rows sum ~1

    ref = ref_forward_np(params, x, otherSlices)
    assert np.allclose(out_np, ref, atol=2e-2), float(np.max(np.abs(out_np - ref)))

    print("KERNEL_OK")
</pallas_src>

<mosaic_0001>
module attributes {stable_mosaic.version = 11 : i64} {
  func.func @disc_kernel(%arg0: memref<6x384xbf16, #tpu.memory_space<vmem>>, %arg1: memref<384x768xbf16, #tpu.memory_space<vmem>>, %arg2: memref<1x256xf32, #tpu.memory_space<vmem>>, %arg3: memref<256x768xbf16, #tpu.memory_space<vmem>>, %arg4: memref<1x256xf32, #tpu.memory_space<vmem>>, %arg5: memref<256x384xbf16, #tpu.memory_space<vmem>>, %arg6: memref<1x128xf32, #tpu.memory_space<vmem>>, %arg7: memref<1152x256xbf16, #tpu.memory_space<vmem>>, %arg8: memref<1x256xf32, #tpu.memory_space<vmem>>, %arg9: memref<256x128xbf16, #tpu.memory_space<vmem>>, %arg10: memref<1x128xf32, #tpu.memory_space<vmem>>, %arg11: memref<128x128xbf16, #tpu.memory_space<vmem>>, %arg12: memref<1x128xf32, #tpu.memory_space<vmem>>, %arg13: memref<2x128xf32, #tpu.memory_space<vmem>>) attributes {dimension_semantics = [], scalar_prefetch = 0 : i64, scratch_operands = 0 : i64, tpu.core_type = #tpu.core_type<tc>} {
    %c0 = arith.constant 0 : index
    %c0_0 = arith.constant 0 : index
    %0 = vector.load %arg0[%c0, %c0_0] : memref<6x384xbf16, #tpu.memory_space<vmem>>, vector<6x384xbf16>
    %c0_1 = arith.constant 0 : index
    %c0_2 = arith.constant 0 : index
    %1 = vector.load %arg1[%c0_1, %c0_2] : memref<384x768xbf16, #tpu.memory_space<vmem>>, vector<384x768xbf16>
    %c0_3 = arith.constant 0 : index
    %c0_4 = arith.constant 0 : index
    %2 = vector.load %arg2[%c0_3, %c0_4] : memref<1x256xf32, #tpu.memory_space<vmem>>, vector<1x256xf32>
    %cst = arith.constant dense<0.000000e+00> : vector<6x768xf32>
    %3 = tpu.matmul %0, %1, %cst {dimension_numbers = #tpu.dot_dimension_numbers<[1], [0], [0], [1], [0, 0, 1, 1], [], []>} : vector<6x384xbf16>, vector<384x768xbf16>, vector<6x768xf32> -> vector<6x768xf32>
    %4 = vector.extract_strided_slice %3 {offsets = [0, 0], sizes = [6, 256], strides = [1, 1]} : vector<6x768xf32> to vector<6x256xf32>
    %5 = vector.extract_strided_slice %4 {offsets = [0, 0], sizes = [3, 256], strides = [1, 1]} : vector<6x256xf32> to vector<3x256xf32>
    %cst_5 = arith.constant 0.000000e+00 : f32
    %6 = vector.broadcast %cst_5 : f32 to vector<2x256xf32>
    %7 = vector.extract_strided_slice %4 {offsets = [3, 0], sizes = [3, 256], strides = [1, 1]} : vector<6x256xf32> to vector<3x256xf32>
    %cst_6 = arith.constant 0.000000e+00 : f32
    %8 = vector.broadcast %cst_6 : f32 to vector<2x256xf32>
    %9 = tpu.concatenate %5, %6, %7, %8 in 0 : vector<3x256xf32>, vector<2x256xf32>, vector<3x256xf32>, vector<2x256xf32> -> vector<10x256xf32>
    %10 = vector.extract_strided_slice %3 {offsets = [0, 256], sizes = [6, 256], strides = [1, 1]} : vector<6x768xf32> to vector<6x256xf32>
    %cst_7 = arith.constant 0.000000e+00 : f32
    %11 = vector.broadcast %cst_7 : f32 to vector<1x256xf32>
    %12 = vector.extract_strided_slice %10 {offsets = [0, 0], sizes = [3, 256], strides = [1, 1]} : vector<6x256xf32> to vector<3x256xf32>
    %cst_8 = arith.constant 0.000000e+00 : f32
    %13 = vector.broadcast %cst_8 : f32 to vector<2x256xf32>
    %14 = vector.extract_strided_slice %10 {offsets = [3, 0], sizes = [3, 256], strides = [1, 1]} : vector<6x256xf32> to vector<3x256xf32>
    %cst_9 = arith.constant 0.000000e+00 : f32
    %15 = vector.broadcast %cst_9 : f32 to vector<1x256xf32>
    %16 = tpu.concatenate %11, %12, %13, %14, %15 in 0 : vector<1x256xf32>, vector<3x256xf32>, vector<2x256xf32>, vector<3x256xf32>, vector<1x256xf32> -> vector<10x256xf32>
    %17 = arith.addf %9, %16 : vector<10x256xf32>
    %18 = vector.extract_strided_slice %3 {offsets = [0, 512], sizes = [6, 256], strides = [1, 1]} : vector<6x768xf32> to vector<6x256xf32>
    %cst_10 = arith.constant 0.000000e+00 : f32
    %19 = vector.broadcast %cst_10 : f32 to vector<2x256xf32>
    %20 = vector.extract_strided_slice %18 {offsets = [0, 0], sizes = [3, 256], strides = [1, 1]} : vector<6x256xf32> to vector<3x256xf32>
    %cst_11 = arith.constant 0.000000e+00 : f32
    %21 = vector.broadcast %cst_11 : f32 to vector<2x256xf32>
    %22 = vector.extract_strided_slice %18 {offsets = [3, 0], sizes = [3, 256], strides = [1, 1]} : vector<6x256xf32> to vector<3x256xf32>
    %23 = tpu.concatenate %19, %20, %21, %22 in 0 : vector<2x256xf32>, vector<3x256xf32>, vector<2x256xf32>, vector<3x256xf32> -> vector<10x256xf32>
    %24 = arith.addf %17, %23 : vector<10x256xf32>
    %25 = vector.broadcast %2 : vector<1x256xf32> to vector<10x256xf32>
    %26 = arith.addf %24, %25 : vector<10x256xf32>
    %cst_12 = arith.constant 0.000000e+00 : f32
    %27 = vector.broadcast %cst_12 : f32 to vector<10x256xf32>
    %28 = arith.maximumf %26, %27 : vector<10x256xf32>
    %c0_13 = arith.constant 0 : index
    %c0_14 = arith.constant 0 : index
    %29 = vector.load %arg3[%c0_13, %c0_14] : memref<256x768xbf16, #tpu.memory_space<vmem>>, vector<256x768xbf16>
    %c0_15 = arith.constant 0 : index
    %c0_16 = arith.constant 0 : index
    %30 = vector.load %arg4[%c0_15, %c0_16] : memref<1x256xf32, #tpu.memory_space<vmem>>, vector<1x256xf32>
    %31 = arith.truncf %28 : vector<10x256xf32> to vector<10x256xbf16>
    %cst_17 = arith.constant dense<0.000000e+00> : vector<10x768xf32>
    %32 = tpu.matmul %31, %29, %cst_17 {dimension_numbers = #tpu.dot_dimension_numbers<[1], [0], [0], [1], [0, 0, 1, 1], [], []>} : vector<10x256xbf16>, vector<256x768xbf16>, vector<10x768xf32> -> vector<10x768xf32>
    %33 = vector.extract_strided_slice %32 {offsets = [0, 0], sizes = [10, 256], strides = [1, 1]} : vector<10x768xf32> to vector<10x256xf32>
    %34 = vector.extract_strided_slice %33 {offsets = [0, 0], sizes = [5, 256], strides = [1, 1]} : vector<10x256xf32> to vector<5x256xf32>
    %cst_18 = arith.constant 0.000000e+00 : f32
    %35 = vector.broadcast %cst_18 : f32 to vector<2x256xf32>
    %36 = vector.extract_strided_slice %33 {offsets = [5, 0], sizes = [5, 256], strides = [1, 1]} : vector<10x256xf32> to vector<5x256xf32>
    %cst_19 = arith.constant 0.000000e+00 : f32
    %37 = vector.broadcast %cst_19 : f32 to vector<2x256xf32>
    %38 = tpu.concatenate %34, %35, %36, %37 in 0 : vector<5x256xf32>, vector<2x256xf32>, vector<5x256xf32>, vector<2x256xf32> -> vector<14x256xf32>
    %39 = vector.extract_strided_slice %32 {offsets = [0, 256], sizes = [10, 256], strides = [1, 1]} : vector<10x768xf32> to vector<10x256xf32>
    %cst_20 = arith.constant 0.000000e+00 : f32
    %40 = vector.broadcast %cst_20 : f32 to vector<1x256xf32>
    %41 = vector.extract_strided_slice %39 {offsets = [0, 0], sizes = [5, 256], strides = [1, 1]} : vector<10x256xf32> to vector<5x256xf32>
    %cst_21 = arith.constant 0.000000e+00 : f32
    %42 = vector.broadcast %cst_21 : f32 to vector<2x256xf32>
    %43 = vector.extract_strided_slice %39 {offsets = [5, 0], sizes = [5, 256], strides = [1, 1]} : vector<10x256xf32> to vector<5x256xf32>
    %cst_22 = arith.constant 0.000000e+00 : f32
    %44 = vector.broadcast %cst_22 : f32 to vector<1x256xf32>
    %45 = tpu.concatenate %40, %41, %42, %43, %44 in 0 : vector<1x256xf32>, vector<5x256xf32>, vector<2x256xf32>, vector<5x256xf32>, vector<1x256xf32> -> vector<14x256xf32>
    %46 = arith.addf %38, %45 : vector<14x256xf32>
    %47 = vector.extract_strided_slice %32 {offsets = [0, 512], sizes = [10, 256], strides = [1, 1]} : vector<10x768xf32> to vector<10x256xf32>
    %cst_23 = arith.constant 0.000000e+00 : f32
    %48 = vector.broadcast %cst_23 : f32 to vector<2x256xf32>
    %49 = vector.extract_strided_slice %47 {offsets = [0, 0], sizes = [5, 256], strides = [1, 1]} : vector<10x256xf32> to vector<5x256xf32>
    %cst_24 = arith.constant 0.000000e+00 : f32
    %50 = vector.broadcast %cst_24 : f32 to vector<2x256xf32>
    %51 = vector.extract_strided_slice %47 {offsets = [5, 0], sizes = [5, 256], strides = [1, 1]} : vector<10x256xf32> to vector<5x256xf32>
    %52 = tpu.concatenate %48, %49, %50, %51 in 0 : vector<2x256xf32>, vector<5x256xf32>, vector<2x256xf32>, vector<5x256xf32> -> vector<14x256xf32>
    %53 = arith.addf %46, %52 : vector<14x256xf32>
    %54 = vector.broadcast %30 : vector<1x256xf32> to vector<14x256xf32>
    %55 = arith.addf %53, %54 : vector<14x256xf32>
    %cst_25 = arith.constant 0.000000e+00 : f32
    %56 = vector.broadcast %cst_25 : f32 to vector<14x256xf32>
    %57 = arith.maximumf %55, %56 : vector<14x256xf32>
    %c0_26 = arith.constant 0 : index
    %c0_27 = arith.constant 0 : index
    %58 = vector.load %arg5[%c0_26, %c0_27] : memref<256x384xbf16, #tpu.memory_space<vmem>>, vector<256x384xbf16>
    %c0_28 = arith.constant 0 : index
    %c0_29 = arith.constant 0 : index
    %59 = vector.load %arg6[%c0_28, %c0_29] : memref<1x128xf32, #tpu.memory_space<vmem>>, vector<1x128xf32>
    %60 = arith.truncf %57 : vector<14x256xf32> to vector<14x256xbf16>
    %cst_30 = arith.constant dense<0.000000e+00> : vector<14x384xf32>
    %61 = tpu.matmul %60, %58, %cst_30 {dimension_numbers = #tpu.dot_dimension_numbers<[1], [0], [0], [1], [0, 0, 1, 1], [], []>} : vector<14x256xbf16>, vector<256x384xbf16>, vector<14x384xf32> -> vector<14x384xf32>
    %62 = vector.extract_strided_slice %61 {offsets = [0, 0], sizes = [14, 128], strides = [1, 1]} : vector<14x384xf32> to vector<14x128xf32>
    %63 = vector.extract_strided_slice %62 {offsets = [0, 0], sizes = [7, 128], strides = [1, 1]} : vector<14x128xf32> to vector<7x128xf32>
    %cst_31 = arith.constant 0.000000e+00 : f32
    %64 = vector.broadcast %cst_31 : f32 to vector<2x128xf32>
    %65 = vector.extract_strided_slice %62 {offsets = [7, 0], sizes = [7, 128], strides = [1, 1]} : vector<14x128xf32> to vector<7x128xf32>
    %cst_32 = arith.constant 0.000000e+00 : f32
    %66 = vector.broadcast %cst_32 : f32 to vector<2x128xf32>
    %67 = tpu.concatenate %63, %64, %65, %66 in 0 : vector<7x128xf32>, vector<2x128xf32>, vector<7x128xf32>, vector<2x128xf32> -> vector<18x128xf32>
    %68 = vector.extract_strided_slice %61 {offsets = [0, 128], sizes = [14, 128], strides = [1, 1]} : vector<14x384xf32> to vector<14x128xf32>
    %cst_33 = arith.constant 0.000000e+00 : f32
    %69 = vector.broadcast %cst_33 : f32 to vector<1x128xf32>
    %70 = vector.extract_strided_slice %68 {offsets = [0, 0], sizes = [7, 128], strides = [1, 1]} : vector<14x128xf32> to vector<7x128xf32>
    %cst_34 = arith.constant 0.000000e+00 : f32
    %71 = vector.broadcast %cst_34 : f32 to vector<2x128xf32>
    %72 = vector.extract_strided_slice %68 {offsets = [7, 0], sizes = [7, 128], strides = [1, 1]} : vector<14x128xf32> to vector<7x128xf32>
    %cst_35 = arith.constant 0.000000e+00 : f32
    %73 = vector.broadcast %cst_35 : f32 to vector<1x128xf32>
    %74 = tpu.concatenate %69, %70, %71, %72, %73 in 0 : vector<1x128xf32>, vector<7x128xf32>, vector<2x128xf32>, vector<7x128xf32>, vector<1x128xf32> -> vector<18x128xf32>
    %75 = arith.addf %67, %74 : vector<18x128xf32>
    %76 = vector.extract_strided_slice %61 {offsets = [0, 256], sizes = [14, 128], strides = [1, 1]} : vector<14x384xf32> to vector<14x128xf32>
    %cst_36 = arith.constant 0.000000e+00 : f32
    %77 = vector.broadcast %cst_36 : f32 to vector<2x128xf32>
    %78 = vector.extract_strided_slice %76 {offsets = [0, 0], sizes = [7, 128], strides = [1, 1]} : vector<14x128xf32> to vector<7x128xf32>
    %cst_37 = arith.constant 0.000000e+00 : f32
    %79 = vector.broadcast %cst_37 : f32 to vector<2x128xf32>
    %80 = vector.extract_strided_slice %76 {offsets = [7, 0], sizes = [7, 128], strides = [1, 1]} : vector<14x128xf32> to vector<7x128xf32>
    %81 = tpu.concatenate %77, %78, %79, %80 in 0 : vector<2x128xf32>, vector<7x128xf32>, vector<2x128xf32>, vector<7x128xf32> -> vector<18x128xf32>
    %82 = arith.addf %75, %81 : vector<18x128xf32>
    %83 = vector.broadcast %59 : vector<1x128xf32> to vector<18x128xf32>
    %84 = arith.addf %82, %83 : vector<18x128xf32>
    %cst_38 = arith.constant 0.000000e+00 : f32
    %85 = vector.broadcast %cst_38 : f32 to vector<18x128xf32>
    %86 = arith.maximumf %84, %85 : vector<18x128xf32>
    %87 = vector.shape_cast %86 : vector<18x128xf32> to vector<2x1152xf32>
    %88 = arith.truncf %87 : vector<2x1152xf32> to vector<2x1152xbf16>
    %c0_39 = arith.constant 0 : index
    %c0_40 = arith.constant 0 : index
    %89 = vector.load %arg7[%c0_39, %c0_40] : memref<1152x256xbf16, #tpu.memory_space<vmem>>, vector<1152x256xbf16>
    %cst_41 = arith.constant dense<0.000000e+00> : vector<2x256xf32>
    %90 = tpu.matmul %88, %89, %cst_41 {dimension_numbers = #tpu.dot_dimension_numbers<[1], [0], [0], [1], [0, 0, 1, 1], [], []>} : vector<2x1152xbf16>, vector<1152x256xbf16>, vector<2x256xf32> -> vector<2x256xf32>
    %c0_42 = arith.constant 0 : index
    %c0_43 = arith.constant 0 : index
    %91 = vector.load %arg8[%c0_42, %c0_43] : memref<1x256xf32, #tpu.memory_space<vmem>>, vector<1x256xf32>
    %92 = vector.broadcast %91 : vector<1x256xf32> to vector<2x256xf32>
    %93 = arith.addf %90, %92 : vector<2x256xf32>
    %cst_44 = arith.constant 0.000000e+00 : f32
    %94 = vector.broadcast %cst_44 : f32 to vector<2x256xf32>
    %95 = arith.maximumf %93, %94 : vector<2x256xf32>
    %96 = arith.truncf %95 : vector<2x256xf32> to vector<2x256xbf16>
    %c0_45 = arith.constant 0 : index
    %c0_46 = arith.constant 0 : index
    %97 = vector.load %arg9[%c0_45, %c0_46] : memref<256x128xbf16, #tpu.memory_space<vmem>>, vector<256x128xbf16>
    %cst_47 = arith.constant dense<0.000000e+00> : vector<2x128xf32>
    %98 = tpu.matmul %96, %97, %cst_47 {dimension_numbers = #tpu.dot_dimension_numbers<[1], [0], [0], [1], [0, 0, 1, 1], [], []>} : vector<2x256xbf16>, vector<256x128xbf16>, vector<2x128xf32> -> vector<2x128xf32>
    %c0_48 = arith.constant 0 : index
    %c0_49 = arith.constant 0 : index
    %99 = vector.load %arg10[%c0_48, %c0_49] : memref<1x128xf32, #tpu.memory_space<vmem>>, vector<1x128xf32>
    %100 = vector.broadcast %99 : vector<1x128xf32> to vector<2x128xf32>
    %101 = arith.addf %98, %100 : vector<2x128xf32>
    %cst_50 = arith.constant 0.000000e+00 : f32
    %102 = vector.broadcast %cst_50 : f32 to vector<2x128xf32>
    %103 = arith.maximumf %101, %102 : vector<2x128xf32>
    %104 = arith.truncf %103 : vector<2x128xf32> to vector<2x128xbf16>
    %c0_51 = arith.constant 0 : index
    %c0_52 = arith.constant 0 : index
    %105 = vector.load %arg11[%c0_51, %c0_52] : memref<128x128xbf16, #tpu.memory_space<vmem>>, vector<128x128xbf16>
    %cst_53 = arith.constant dense<0.000000e+00> : vector<2x128xf32>
    %106 = tpu.matmul %104, %105, %cst_53 {dimension_numbers = #tpu.dot_dimension_numbers<[1], [0], [0], [1], [0, 0, 1, 1], [], []>} : vector<2x128xbf16>, vector<128x128xbf16>, vector<2x128xf32> -> vector<2x128xf32>
    %c0_54 = arith.constant 0 : index
    %c0_55 = arith.constant 0 : index
    %107 = vector.load %arg12[%c0_54, %c0_55] : memref<1x128xf32, #tpu.memory_space<vmem>>, vector<1x128xf32>
    %108 = vector.broadcast %107 : vector<1x128xf32> to vector<2x128xf32>
    %109 = arith.addf %106, %108 : vector<2x128xf32>
    %cst_56 = arith.constant dense<0xFF800000> : vector<2xf32>
    %110 = vector.multi_reduction <maximumf>, %109, %cst_56 [1] : vector<2x128xf32> to vector<2xf32>
    %111 = vector.shape_cast %110 : vector<2xf32> to vector<2x1xf32>
    %112 = vector.broadcast %111 : vector<2x1xf32> to vector<2x128xf32>
    %113 = arith.subf %109, %112 : vector<2x128xf32>
    %114 = math.exp %113 : vector<2x128xf32>
    %cst_57 = arith.constant dense<0.000000e+00> : vector<2xf32>
    %115 = vector.multi_reduction <add>, %114, %cst_57 [1] : vector<2x128xf32> to vector<2xf32>
    %116 = vector.shape_cast %115 : vector<2xf32> to vector<2x1xf32>
    %117 = tpu.reciprocal %116 {approx = true} : vector<2x1xf32> -> vector<2x1xf32>
    %118 = vector.broadcast %117 : vector<2x1xf32> to vector<2x128xf32>
    %119 = arith.mulf %114, %118 : vector<2x128xf32>
    %c0_58 = arith.constant 0 : index
    %c0_59 = arith.constant 0 : index
    %120 = vector.load %arg13[%c0_58, %c0_59] : memref<2x128xf32, #tpu.memory_space<vmem>>, vector<2x128xf32>
    tpu.vector_store %arg13[%c0_58, %c0_59], %119 {strides = array<i32>} : memref<2x128xf32, #tpu.memory_space<vmem>>, vector<2x128xf32>,
    return
  }
}

</mosaic_0001>

<bundles_post_ra>
// kernel: discriminator_forward.1
= control target key start
LH: loop header
LB: loop body
LE: loop exit
PB: predicated region body
PF: predicated region fallthrough
CT: control target
= control target key end

     0   :  { %18 = vsyncpa [#allocation3], 0  ;;  %s7023_s0 = inlined_call_operand.vmem [shape: bf16[6,384], index: 0, kind: input, shape index: {}]   ;;  %s7024_s1 = inlined_call_operand.hbm [shape: bf16[384,768], index: 1, kind: input, shape index: {}]   ;;  %s7025_s2 = inlined_call_operand.vmem [shape: f32[1,256], index: 2, kind: input, shape index: {}]   ;;  %s7026_s3 = inlined_call_operand.hbm [shape: bf16[256,768], index: 3, kind: input, shape index: {}]   ;;  %s7027_s4 = inlined_call_operand.vmem [shape: f32[1,256], index: 4, kind: input, shape index: {}]   ;;  %s7028_s5 = inlined_call_operand.hbm [shape: bf16[256,384], index: 5, kind: input, shape index: {}]   ;;  %s7029_s6 = inlined_call_operand.vmem [shape: f32[1,128], index: 6, kind: input, shape index: {}]   ;;  %s7030_s7 = inlined_call_operand.hbm [shape: bf16[1152,256], index: 7, kind: input, shape index: {}]   ;;  %s7031_s8 = inlined_call_operand.hbm [shape: f32[1,256], index: 8, kind: input, shape index: {}]   ;;  %s7032_s9 = inlined_call_operand.vmem [shape: bf16[256,128], index: 9, kind: input, shape index: {}]   ;;  %s7033_s10 = inlined_call_operand.hbm [shape: f32[1,128], index: 10, kind: input, shape index: {}]   ;;  %s7034_s11 = inlined_call_operand.hbm [shape: bf16[128,128], index: 11, kind: input, shape index: {}]   ;;  %s7035_s12 = inlined_call_operand.hbm [shape: f32[1,128], index: 12, kind: input, shape index: {}]   ;;  %s7036_s13 = inlined_call_operand.hbm [shape: f32[2,128], index: 13, kind: output, shape index: {}]  }
   0x1   :  { %19 = vsyncpa [#allocation6], 0 }
   0x2   :  { %20 = vsyncpa [#allocation9], 0 }
   0x3   :  { %21 = vsyncpa [#allocation12], 0 }
   0x4   :  { %22 = vsyncpa [#allocation15], 0 }
   0x5   :  { %23 = vsyncpa [#allocation4], 0  ;;  %s45_s27 = sshll.u32 %s7026_s3, 4  ;;  %s6590_s28 = smov [#allocation5]   ;;  %s46_s27 = int_to_ptr.hbm [resolvable:$true] %s45_s27 }
   0x6   :  { %s47_s29 = sshll.u32 %s6590_s28, 4  ;;  %s75_s15 = sshll.u32 %s7030_s7, 4  ;;  %s48_s29 = int_to_ptr.vmem [resolvable:$true] %s47_s29  ;;  %s76_s15 = int_to_ptr.hbm [resolvable:$true] %s75_s15 }
   0x7   :  { %s6591_s16 = smov 384   ;;  %s6592_s17 = smov 24  }
   0x8   :  { %53 = dma.hbm_to_vmem [thread:$0]  %s46_s27, 12288, %s48_s29, [#allocation6], %s6591_s16, %s6591_s16, %s6592_s17  }
   0x9   :  { %s6593_s18 = smov [#allocation8]   ;;  %s6594_s20 = smov 128  }
   0xa   :  { %s77_s19 = sshll.u32 %s6593_s18, 4  ;;  %s6595_s21 = smov 8   ;;  %s78_s19 = int_to_ptr.vmem [resolvable:$true] %s77_s19 }
   0xb   :  { %83 = dma.hbm_to_vmem [thread:$0]  %s76_s15, 18432, %s78_s19, [#allocation9], %s6594_s20, %s6594_s20, %s6595_s21  }
   0xc   :  { %s102_s23 = sshll.u32 %s7033_s10, 4  ;;  %s6596_s24 = smov [#allocation11]   ;;  %s103_s23 = int_to_ptr.hbm [resolvable:$true] %s102_s23 }
   0xd   :  { %s104_s25 = sshll.u32 %s6596_s24, 4  ;;  %s30_s28 = sshll.u32 %s7024_s1, 4  ;;  %s105_s25 = int_to_ptr.vmem [resolvable:$true] %s104_s25  ;;  %s31_s28 = int_to_ptr.hbm [resolvable:$true] %s30_s28 }
   0xe   :  { %107 = dma.hbm_to_vmem [thread:$0]  %s103_s23, 16, %s105_s25, [#allocation12]  }
   0xf   :  { %s6597_s27 = smov [#allocation2]   ;;  %s60_s15 = sshll.u32 %s7028_s5, 4  ;;  %s61_s15 = int_to_ptr.hbm [resolvable:$true] %s60_s15 }
  0x10   :  { %s32_s29 = sshll.u32 %s6597_s27, 4  ;;  %s6598_s10 = smov [#allocation7]   ;;  %s33_s29 = int_to_ptr.vmem [resolvable:$true] %s32_s29 }
  0x11   :  { %38 = dma.hbm_to_vmem [thread:$0]  %s31_s28, 18432, %s33_s29, [#allocation3], %s6591_s16, %s6591_s16, %s6592_s17  }
  0x12   :  { %s62_s18 = sshll.u32 %s6598_s10, 4  ;;  %s89_s21 = sshll.u32 %s7031_s8, 4  ;;  %s63_s18 = int_to_ptr.vmem [resolvable:$true] %s62_s18  ;;  %s90_s21 = int_to_ptr.hbm [resolvable:$true] %s89_s21 }
  0x13   :  { %s6599_s22 = smov 192   ;;  %s6600_s1 = smov 12  }
  0x14   :  { %68 = dma.hbm_to_vmem [thread:$0]  %s61_s15, 6144, %s63_s18, [#allocation6], %s6599_s22, %s6599_s22, %s6600_s1  }
  0x15   :  { %s6601_s3 = smov [#allocation10]   ;;  %s112_s5 = sshll.u32 %s7034_s11, 4  ;;  %s113_s5 = int_to_ptr.hbm [resolvable:$true] %s112_s5 }
  0x16   :  { %s91_s23 = sshll.u32 %s6601_s3, 4  ;;  %s6602_s16 = smov [#allocation13]   ;;  %s92_s23 = int_to_ptr.vmem [resolvable:$true] %s91_s23 }
  0x17   :  { %94 = dma.hbm_to_vmem [thread:$0]  %s90_s21, 32, %s92_s23, [#allocation9]  }
  0x18   :  { %s114_s17 = sshll.u32 %s6602_s16, 4  ;;  %s126_s8 = sshll.u32 %s7035_s12, 4  ;;  %s115_s17 = int_to_ptr.vmem [resolvable:$true] %s114_s17  ;;  %s127_s8 = int_to_ptr.hbm [resolvable:$true] %s126_s8 }
  0x19   :  { %s6603_s28 = smov 64   ;;  %s6604_s27 = smov 4  }
  0x1a   :  { %120 = dma.hbm_to_vmem [thread:$0]  %s113_s5, 1024, %s115_s17, [#allocation12], %s6603_s28, %s6603_s28, %s6604_s27  }
  0x1b   :  { %s6605_s29 = smov [#allocation14]  }
  0x1c   :  { %s128_s30 = sshll.u32 %s6605_s29, 4  ;;  %s129_s30 = int_to_ptr.vmem [resolvable:$true] %s128_s30 }
  0x1d   :  { %131 = dma.hbm_to_vmem [thread:$0]  %s127_s8, 16, %s129_s30, [#allocation15]  }
  0x1e   :  { %6578 = dma.done.wait [#allocation3], 18432  }
  0x1f   :  { %6579 = vsyncadd [#allocation3], 4294948864 }
  0x20   :  { %6580 = dma.done.wait [#allocation6], 18432  }
  0x21   :  { %6581 = vsyncadd [#allocation6], 4294948864 }
  0x22   :  { %6582 = dma.done.wait [#allocation9], 18464  }
  0x23   :  { %6583 = vsyncadd [#allocation9], 4294948832 }
  0x24   :  { %6584 = dma.done.wait [#allocation12], 1040  }
  0x25   :  { %6585 = vsyncadd [#allocation12], 4294966256 }
  0x26   :  { %6586 = dma.done.wait [#allocation15], 16  }
  0x27   :  { %6587 = vsyncadd [#allocation15], 4294967280  ;;  %v4228_v0 = vld [vmem:[#allocation2 + $0x150] sm:$0xf]  ;;  %v5927_v1 = vld [vmem:[#allocation2 + $0x164] sm:$0xf0] }
  0x28   :  { %v4420_v2 = vld [vmem:[#allocation2 + $0x2d0] sm:$0xf]  ;;  %v4229_v3 = vor.u32 %v5927_v1, %v4228_v0  ;;  %v5975_v4 = vld [vmem:[#allocation2 + $0x2e4] sm:$0xf0]  ;;  %v5924_v9 = vld [vmem:[#allocation2 + $0x154] sm:$0xf] }
  0x29   :  { %v4612_v5 = vld [vmem:[#allocation2 + $0x450] sm:$0xf]  ;;  %v6023_v6 = vld [vmem:[#allocation2 + $0x464] sm:$0xf0]  ;;  %v4421_v7 = vor.u32 %v5975_v4, %v4420_v2  ;;  %v4230_v10 = vld [vmem:[#allocation2 + $0x168] sm:$0xf0] }
  0x2a   :  { %v4613_v8 = vor.u32 %v6023_v6, %v4612_v5  ;;  %v4204_v11 = vld [vmem:[#allocation2 + $0x120] sm:$0xf]  ;;  %1042 = vmatpush.bf16.msra.mxu0 %v4229_v3  ;;  %v4233_v12 = vor.u32 %v5924_v9, %v4230_v10  ;;  %v5921_v13 = vld [vmem:[#allocation2 + $0x134] sm:$0xf0]  ;;  %v5918_v20 = vld [vmem:[#allocation2 + $0x124] sm:$0xf] }
  0x2b   :  { %v4396_v14 = vld [vmem:[#allocation2 + $0x2a0] sm:$0xf]  ;;  %v5969_v15 = vld [vmem:[#allocation2 + $0x2b4] sm:$0xf0]  ;;  %1055 = vmatpush.bf16.msra.mxu1 %v4421_v7  ;;  %v4205_v16 = vor.u32 %v5921_v13, %v4204_v11  ;;  %v4206_v22 = vld [vmem:[#allocation2 + $0x138] sm:$0xf0] }
  0x2c   :  { %1068 = vmatpush.bf16.msra.mxu2 %v4613_v8  ;;  %v4397_v17 = vor.u32 %v5969_v15, %v4396_v14  ;;  %v4588_v18 = vld [vmem:[#allocation2 + $0x420] sm:$0xf]  ;;  %v6017_v19 = vld [vmem:[#allocation2 + $0x434] sm:$0xf0]  ;;  %1081 = vmatpush.bf16.msra.mxu3 %v4233_v12  ;;  %v4180_v23 = vld [vmem:[#allocation2 + $0xf0] sm:$0xf]  ;;  %v4209_v25 = vor.u32 %v5918_v20, %v4206_v22 }
  0x2d   :  { %v4589_v21 = vor.u32 %v6017_v19, %v4588_v18  ;;  %v5915_v24 = vld [vmem:[#allocation2 + $0x104] sm:$0xf0]  ;;  %v4372_v26 = vld [vmem:[#allocation2 + $0x270] sm:$0xf]  ;;  %v5912_v31 = vld [vmem:[#allocation2 + $0xf4] sm:$0xf] }
  0x2e   :  { %v5963_v27 = vld [vmem:[#allocation2 + $0x284] sm:$0xf0]  ;;  %v4564_v28 = vld [vmem:[#allocation2 + $0x3f0] sm:$0xf]  ;;  %1043 = vmatpush.bf16.msra.mxu0 %v4205_v16  ;;  %v4181_v29 = vor.u32 %v5915_v24, %v4180_v23  ;;  %v4182_v32 = vld [vmem:[#allocation2 + $0x108] sm:$0xf0] }
  0x2f   :  { %v6011_v30 = vld [vmem:[#allocation2 + $0x404] sm:$0xf0]  ;;  %1056 = vmatpush.bf16.msra.mxu1 %v4397_v17  ;;  %v4373_v33 = vor.u32 %v5963_v27, %v4372_v26  ;;  %v4156_v35 = vld [vmem:[#allocation2 + $0xc0] sm:$0xf]  ;;  %v5909_v36 = vld [vmem:[#allocation2 + $0xd4] sm:$0xf0]  ;;  %v4185_v38 = vor.u32 %v5912_v31, %v4182_v32 }
  0x30   :  { %1069 = vmatpush.bf16.msra.mxu2 %v4589_v21  ;;  %v4565_v34 = vor.u32 %v6011_v30, %v4564_v28  ;;  %v4348_v37 = vld [vmem:[#allocation2 + $0x240] sm:$0xf]  ;;  %1082 = vmatpush.bf16.msra.mxu3 %v4209_v25  ;;  %v5957_v39 = vld [vmem:[#allocation2 + $0x254] sm:$0xf0]  ;;  %v5906_v42 = vld [vmem:[#allocation2 + $0xc4] sm:$0xf]  ;;  %v4157_v44 = vor.u32 %v5909_v36, %v4156_v35 }
  0x31   :  { %v4540_v40 = vld [vmem:[#allocation2 + $0x3c0] sm:$0xf]  ;;  %v6005_v41 = vld [vmem:[#allocation2 + $0x3d4] sm:$0xf0]  ;;  %v4158_v43 = vld [vmem:[#allocation2 + $0xd8] sm:$0xf0]  ;;  %v4349_v45 = vor.u32 %v5957_v39, %v4348_v37 }
  0x32   :  { %1044 = vmatpush.bf16.msra.mxu0 %v4181_v29  ;;  %v4541_v46 = vor.u32 %v6005_v41, %v4540_v40  ;;  %v4132_v47 = vld [vmem:[#allocation2 + $0x90] sm:$0xf]  ;;  %v5903_v48 = vld [vmem:[#allocation2 + $0xa4] sm:$0xf0]  ;;  %v4161_v50 = vor.u32 %v5906_v42, %v4158_v43  ;;  %v5900_v54 = vld [vmem:[#allocation2 + $0x94] sm:$0xf] }
  0x33   :  { %1057 = vmatpush.bf16.msra.mxu1 %v4373_v33  ;;  %v4324_v49 = vld [vmem:[#allocation2 + $0x210] sm:$0xf]  ;;  %v5951_v51 = vld [vmem:[#allocation2 + $0x224] sm:$0xf0]  ;;  %v4134_v55 = vld [vmem:[#allocation2 + $0xa8] sm:$0xf0]  ;;  %v4133_v56 = vor.u32 %v5903_v48, %v4132_v47 }
  0x34   :  { %1070 = vmatpush.bf16.msra.mxu2 %v4565_v34  ;;  %1083 = vmatpush.bf16.msra.mxu3 %v4185_v38  ;;  %v4516_v52 = vld [vmem:[#allocation2 + $0x390] sm:$0xf]  ;;  %v5999_v53 = vld [vmem:[#allocation2 + $0x3a4] sm:$0xf0]  ;;  %v4325_v57 = vor.u32 %v5951_v51, %v4324_v49  ;;  %v4108_v59 = vld [vmem:[#allocation2 + $0x60] sm:$0xf]  ;;  %v4137_v62 = vor.u32 %v5900_v54, %v4134_v55 }
  0x35   :  { %v4517_v58 = vor.u32 %v5999_v53, %v4516_v52  ;;  %v5897_v60 = vld [vmem:[#allocation2 + $0x74] sm:$0xf0]  ;;  %v4300_v61 = vld [vmem:[#allocation2 + $0x1e0] sm:$0xf]  ;;  %v5894_v2 = vld [vmem:[#allocation2 + $0x64] sm:$0xf] }
  0x36   :  { %1045 = vmatpush.bf16.msra.mxu0 %v4157_v44  ;;  %v5945_v63 = vld [vmem:[#allocation2 + $0x1f4] sm:$0xf0]  ;;  %v4492_v0 = vld [vmem:[#allocation2 + $0x360] sm:$0xf]  ;;  %v4110_v3 = vld [vmem:[#allocation2 + $0x78] sm:$0xf0]  ;;  %v4109_v4 = vor.u32 %v5897_v60, %v4108_v59 }
  0x37   :  { %1058 = vmatpush.bf16.msra.mxu1 %v4349_v45  ;;  %v5993_v1 = vld [vmem:[#allocation2 + $0x374] sm:$0xf0]  ;;  %v4301_v5 = vor.u32 %v5945_v63, %v4300_v61  ;;  %v4084_v7 = vld [vmem:[#allocation2 + $0x30] sm:$0xf]  ;;  %v5891_v8 = vld [vmem:[#allocation2 + $0x44] sm:$0xf0]  ;;  %v4113_v10 = vor.u32 %v5894_v2, %v4110_v3 }
  0x38   :  { %1071 = vmatpush.bf16.msra.mxu2 %v4541_v46  ;;  %1084 = vmatpush.bf16.msra.mxu3 %v4161_v50  ;;  %v4493_v6 = vor.u32 %v5993_v1, %v4492_v0  ;;  %v4276_v9 = vld [vmem:[#allocation2 + $0x1b0] sm:$0xf]  ;;  %v5939_v11 = vld [vmem:[#allocation2 + $0x1c4] sm:$0xf0]  ;;  %v5888_v14 = vld [vmem:[#allocation2 + $0x34] sm:$0xf]  ;;  %v4085_v16 = vor.u32 %v5891_v8, %v4084_v7 }
  0x39   :  { %v4468_v12 = vld [vmem:[#allocation2 + $0x330] sm:$0xf]  ;;  %v5987_v13 = vld [vmem:[#allocation2 + $0x344] sm:$0xf0]  ;;  %v4086_v15 = vld [vmem:[#allocation2 + $0x48] sm:$0xf0]  ;;  %v4277_v19 = vor.u32 %v5939_v11, %v4276_v9 }
  0x3a   :  { %1046 = vmatpush.bf16.msra.mxu0 %v4133_v56  ;;  %v4060_v17 = vld [vmem:[#allocation2] sm:$0xf]  ;;  %v5885_v18 = vld [vmem:[#allocation2 + $0x14] sm:$0xf0]  ;;  %v4469_v20 = vor.u32 %v5987_v13, %v4468_v12  ;;  %v4089_v24 = vor.u32 %v5888_v14, %v4086_v15  ;;  %v5972_v26 = vld [vmem:[#allocation2 + $0x2d4] sm:$0xf] }
  0x3b   :  { %1059 = vmatpush.bf16.msra.mxu1 %v4325_v57  ;;  %v4252_v21 = vld [vmem:[#allocation2 + $0x180] sm:$0xf]  ;;  %v5933_v22 = vld [vmem:[#allocation2 + $0x194] sm:$0xf0]  ;;  %v4422_v27 = vld [vmem:[#allocation2 + $0x2e8] sm:$0xf0]  ;;  %v4061_v31 = vor.u32 %v5885_v18, %v4060_v17 }
  0x3c   :  { %1072 = vmatpush.bf16.msra.mxu2 %v4517_v58  ;;  %1085 = vmatpush.bf16.msra.mxu3 %v4137_v62  ;;  %v4444_v23 = vld [vmem:[#allocation2 + $0x300] sm:$0xf]  ;;  %v5981_v25 = vld [vmem:[#allocation2 + $0x314] sm:$0xf0]  ;;  %v6020_v28 = vld [vmem:[#allocation2 + $0x454] sm:$0xf]  ;;  %v4253_v35 = vor.u32 %v5933_v22, %v4252_v21  ;;  %v4425_v39 = vor.u32 %v5972_v26, %v4422_v27 }
  0x3d   :  { %v4614_v29 = vld [vmem:[#allocation2 + $0x468] sm:$0xf0]  ;;  %v4236_v30 = vld [vmem:[#allocation2 + $0x158] sm:$0xf]  ;;  %v5928_v32 = vld [vmem:[#allocation2 + $0x16c] sm:$0xf0]  ;;  %v4445_v36 = vor.u32 %v5981_v25, %v4444_v23 }
  0x3e   :  { %1047 = vmatpush.bf16.msra.mxu0 %v4109_v4  ;;  %v5882_v33 = vld [vmem:[#allocation2 + $0x4] sm:$0xf]  ;;  %v4062_v34 = vld [vmem:[#allocation2 + $0x18] sm:$0xf0]  ;;  %v4428_v37 = vld [vmem:[#allocation2 + $0x2d8] sm:$0xf]  ;;  %v4617_v40 = vor.u32 %v6020_v28, %v4614_v29  ;;  %v4237_v42 = vor.u32 %v5928_v32, %v4236_v30 }
  0x3f   :  { %1060 = vmatpush.bf16.msra.mxu1 %v4301_v5  ;;  %v5976_v38 = vld [vmem:[#allocation2 + $0x2ec] sm:$0xf0]  ;;  %v5966_v41 = vld [vmem:[#allocation2 + $0x2a4] sm:$0xf]  ;;  %v4065_v43 = vor.u32 %v5882_v33, %v4062_v34  ;;  %v4398_v44 = vld [vmem:[#allocation2 + $0x2b8] sm:$0xf0] }
  0x40   :  { %1073 = vmatpush.bf16.msra.mxu2 %v4493_v6  ;;  %1086 = vmatpush.bf16.msra.mxu3 %v4113_v10  ;;  %v6014_v45 = vld [vmem:[#allocation2 + $0x424] sm:$0xf]  ;;  %v4590_v46 = vld [vmem:[#allocation2 + $0x438] sm:$0xf0]  ;;  %v4429_v47 = vor.u32 %v5976_v38, %v4428_v37  ;;  %v4212_v48 = vld [vmem:[#allocation2 + $0x128] sm:$0xf]  ;;  %v4401_v52 = vor.u32 %v5966_v41, %v4398_v44 }
  0x41   :  { %v5922_v49 = vld [vmem:[#allocation2 + $0x13c] sm:$0xf0]  ;;  %v4404_v50 = vld [vmem:[#allocation2 + $0x2a8] sm:$0xf]  ;;  %v4593_v53 = vor.u32 %v6014_v45, %v4590_v46  ;;  %v5960_v54 = vld [vmem:[#allocation2 + $0x274] sm:$0xf] }
  0x42   :  { %1048 = vmatpush.bf16.msra.mxu0 %v4085_v16  ;;  %v5970_v51 = vld [vmem:[#allocation2 + $0x2bc] sm:$0xf0]  ;;  %v4213_v55 = vor.u32 %v5922_v49, %v4212_v48  ;;  %v4374_v56 = vld [vmem:[#allocation2 + $0x288] sm:$0xf0]  ;;  %v6008_v57 = vld [vmem:[#allocation2 + $0x3f4] sm:$0xf] }
  0x43   :  { %1061 = vmatpush.bf16.msra.mxu1 %v4277_v19  ;;  %v4566_v58 = vld [vmem:[#allocation2 + $0x408] sm:$0xf0]  ;;  %v4405_v59 = vor.u32 %v5970_v51, %v4404_v50  ;;  %v4188_v60 = vld [vmem:[#allocation2 + $0xf8] sm:$0xf]  ;;  %v5916_v61 = vld [vmem:[#allocation2 + $0x10c] sm:$0xf0]  ;;  %v4377_v1 = vor.u32 %v5960_v54, %v4374_v56 }
  0x44   :  { %1074 = vmatpush.bf16.msra.mxu2 %v4469_v20  ;;  %1087 = vmatpush.bf16.msra.mxu3 %v4089_v24  ;;  %v4380_v62 = vld [vmem:[#allocation2 + $0x278] sm:$0xf]  ;;  %v5964_v63 = vld [vmem:[#allocation2 + $0x28c] sm:$0xf0]  ;;  %v164_v0 = vld [vmem:[%s7023_s0] sm:$0x77]  ;;  %v4569_v2 = vor.u32 %v6008_v57, %v4566_v58  ;;  %v4189_v7 = vor.u32 %v5916_v61, %v4188_v60 }
  0x45   :  { %v5954_v3 = vld [vmem:[#allocation2 + $0x244] sm:$0xf]  ;;  %v313_v4 = vunpack.c.l.b16 %v164_v0  ;;  %v314_v5 = vunpack.c.h.b16 %v164_v0  ;;  %v165_v6 = vld [vmem:[%s7023_s0 + $0x8] sm:$0x7]  ;;  %v4350_v8 = vld [vmem:[#allocation2 + $0x258] sm:$0xf0]  ;;  %v4381_v12 = vor.u32 %v5964_v63, %v4380_v62 }
  0x46   :  { %1049 = vmatpush.bf16.msra.mxu0 %v4061_v31  ;;  %v6002_v9 = vld [vmem:[#allocation2 + $0x3c4] sm:$0xf]  ;;  %v4542_v10 = vld [vmem:[#allocation2 + $0x3d8] sm:$0xf0]  ;;  %v315_v11 = vunpack.c.l.b16 %v165_v6  ;;  %v4164_v13 = vld [vmem:[#allocation2 + $0xc8] sm:$0xf]  ;;  %v4353_v20 = vor.u32 %v5954_v3, %v4350_v8 }
  0x47   :  { %1062 = vmatpush.bf16.msra.mxu1 %v4253_v35  ;;  %v5910_v14 = vld [vmem:[#allocation2 + $0xdc] sm:$0xf0]  ;;  %v6707_v15 = vpack.c.b16 %v313_v4, %v313_v4  ;;  %v6709_v16 = vpack.c.b16 %v314_v5, %v314_v5  ;;  %v4356_v17 = vld [vmem:[#allocation2 + $0x248] sm:$0xf]  ;;  %v4545_v21 = vor.u32 %v6002_v9, %v4542_v10  ;;  %v5948_v22 = vld [vmem:[#allocation2 + $0x214] sm:$0xf] }
  0x48   :  { %1075 = vmatpush.bf16.msra.mxu2 %v4445_v36  ;;  %1088 = vmatpush.bf16.msra.mxu3 %v4065_v43  ;;  %v5958_v18 = vld [vmem:[#allocation2 + $0x25c] sm:$0xf0]  ;;  %v6711_v19 = vpack.c.b16 %v315_v11, %v315_v11  ;;  %v4165_v23 = vor.u32 %v5910_v14, %v4164_v13  ;;  %v4326_v24 = vld [vmem:[#allocation2 + $0x228] sm:$0xf0]  ;;  %v5996_v25 = vld [vmem:[#allocation2 + $0x394] sm:$0xf] }
  0x49   :  { %v4518_v26 = vld [vmem:[#allocation2 + $0x3a8] sm:$0xf0]  ;;  %1050 = vmatmul.bf16.vlgmr.msra.gmra.mxu0 %v6707_v15  ;;  %v4357_v27 = vor.u32 %v5958_v18, %v4356_v17  ;;  %v4140_v28 = vld [vmem:[#allocation2 + $0x98] sm:$0xf]  ;;  %v5904_v29 = vld [vmem:[#allocation2 + $0xac] sm:$0xf0]  ;;  %v4329_v32 = vor.u32 %v5948_v22, %v4326_v24 }
  0x4a   :  { %1094 = vmatpush.bf16.msrb.mxu0 %v4425_v39  ;;  %1063 = vmatmul.bf16.vlgmr.msra.gmra.mxu1 %v6709_v16  ;;  %v4332_v30 = vld [vmem:[#allocation2 + $0x218] sm:$0xf]  ;;  %v5952_v31 = vld [vmem:[#allocation2 + $0x22c] sm:$0xf0]  ;;  %v4521_v33 = vor.u32 %v5996_v25, %v4518_v26  ;;  %v5942_v34 = vld [vmem:[#allocation2 + $0x1e4] sm:$0xf]  ;;  %v4141_v35 = vor.u32 %v5904_v29, %v4140_v28 }
  0x4b   :  { %1107 = vmatpush.bf16.msrb.mxu1 %v4617_v40  ;;  %1076 = vmatmul.bf16.vlgmr.msra.gmra.mxu2 %v6711_v19  ;;  %v4302_v36 = vld [vmem:[#allocation2 + $0x1f8] sm:$0xf0]  ;;  %v5990_v37 = vld [vmem:[#allocation2 + $0x364] sm:$0xf]  ;;  %v4333_v39 = vor.u32 %v5952_v31, %v4332_v30  ;;  %v4116_v40 = vld [vmem:[#allocation2 + $0x68] sm:$0xf] }
  0x4c   :  { %1120 = vmatpush.bf16.msrb.mxu2 %v4237_v42  ;;  %1133 = vmatpush.bf16.msrb.mxu3 %v4429_v47  ;;  %v4494_v38 = vld [vmem:[#allocation2 + $0x378] sm:$0xf0]  ;;  %v5898_v41 = vld [vmem:[#allocation2 + $0x7c] sm:$0xf0]  ;;  %v4308_v42 = vld [vmem:[#allocation2 + $0x1e8] sm:$0xf]  ;;  %v4305_v44 = vor.u32 %v5942_v34, %v4302_v36 }
  0x4d   :  { %1089 = vmatmul.bf16.vlgmr.msra.gmra.mxu3 %v6707_v15  ;;  %v5946_v43 = vld [vmem:[#allocation2 + $0x1fc] sm:$0xf0]  ;;  %v4497_v45 = vor.u32 %v5990_v37, %v4494_v38  ;;  %v5936_v46 = vld [vmem:[#allocation2 + $0x1b4] sm:$0xf]  ;;  %v4117_v47 = vor.u32 %v5898_v41, %v4116_v40  ;;  %v4278_v48 = vld [vmem:[#allocation2 + $0x1c8] sm:$0xf0] }
  0x4e   :  { %1095 = vmatpush.bf16.msrb.mxu0 %v4401_v52  ;;  %v5984_v49 = vld [vmem:[#allocation2 + $0x334] sm:$0xf]  ;;  %v4470_v50 = vld [vmem:[#allocation2 + $0x348] sm:$0xf0]  ;;  %v4309_v51 = vor.u32 %v5946_v43, %v4308_v42  ;;  %v4092_v52 = vld [vmem:[#allocation2 + $0x38] sm:$0xf]  ;;  %v4281_v56 = vor.u32 %v5936_v46, %v4278_v48 }
  0x4f   :  { %1108 = vmatpush.bf16.msrb.mxu1 %v4593_v53  ;;  %v5892_v53 = vld [vmem:[#allocation2 + $0x4c] sm:$0xf0]  ;;  %v4284_v54 = vld [vmem:[#allocation2 + $0x1b8] sm:$0xf]  ;;  %v4473_v57 = vor.u32 %v5984_v49, %v4470_v50  ;;  %v5930_v58 = vld [vmem:[#allocation2 + $0x184] sm:$0xf] }
  0x50   :  { %1121 = vmatpush.bf16.msrb.mxu2 %v4213_v55  ;;  %1134 = vmatpush.bf16.msrb.mxu3 %v4405_v59  ;;  %v5940_v55 = vld [vmem:[#allocation2 + $0x1cc] sm:$0xf0]  ;;  %v4254_v59 = vld [vmem:[#allocation2 + $0x198] sm:$0xf0]  ;;  %v5978_v60 = vld [vmem:[#allocation2 + $0x304] sm:$0xf]  ;;  %v4093_v61 = vor.u32 %v5892_v53, %v4092_v52 }
  0x51   :  { %v4446_v62 = vld [vmem:[#allocation2 + $0x318] sm:$0xf0]  ;;  %v4068_v63 = vld [vmem:[#allocation2 + $0x8] sm:$0xf]  ;;  %v5886_v0 = vld [vmem:[#allocation2 + $0x1c] sm:$0xf0]  ;;  %v4257_v8 = vor.u32 %v5930_v58, %v4254_v59 }
  0x52   :  { %1096 = vmatpush.bf16.msrb.mxu0 %v4377_v1  ;;  %v4285_v1 = vor.u32 %v5940_v55, %v4284_v54  ;;  %v6024_v3 = vld [vmem:[#allocation2 + $0x46c] sm:$0xf0]  ;;  %v5925_v4 = vld [vmem:[#allocation2 + $0x15c] sm:$0xf]  ;;  %v4238_v5 = vld [vmem:[#allocation2 + $0x170] sm:$0xf0]  ;;  %v4449_v9 = vor.u32 %v5978_v60, %v4446_v62 }
  0x53   :  { %1109 = vmatpush.bf16.msrb.mxu1 %v4569_v2  ;;  %v4620_v2 = vld [vmem:[#allocation2 + $0x458] sm:$0xf]  ;;  %v5973_v6 = vld [vmem:[#allocation2 + $0x2dc] sm:$0xf]  ;;  %v4260_v10 = vld [vmem:[#allocation2 + $0x188] sm:$0xf]  ;;  %v4241_v18 = vor.u32 %v5925_v4, %v4238_v5 }
  0x54   :  { %1122 = vmatpush.bf16.msrb.mxu2 %v4189_v7  ;;  %1135 = vmatpush.bf16.msrb.mxu3 %v4381_v12  ;;  %v4430_v7 = vld [vmem:[#allocation2 + $0x2f0] sm:$0xf0]  ;;  %v5934_v11 = vld [vmem:[#allocation2 + $0x19c] sm:$0xf0]  ;;  %v4069_v12 = vor.u32 %v5886_v0, %v4068_v63  ;;  %v4621_v13 = vor.u32 %v6024_v3, %v4620_v2  ;;  %v6021_v14 = vld [vmem:[#allocation2 + $0x45c] sm:$0xf] }
  0x55   :  { %v4622_v17 = vld [vmem:[#allocation2 + $0x470] sm:$0xf0]  ;;  %v6018_v22 = vld [vmem:[#allocation2 + $0x43c] sm:$0xf0]  ;;  %v4261_v24 = vor.u32 %v5934_v11, %v4260_v10  ;;  %v4214_v25 = vld [vmem:[#allocation2 + $0x140] sm:$0xf0] }
  0x56   :  { %1097 = vmatpush.bf16.msrb.mxu0 %v4353_v20  ;;  %v4433_v20 = vor.u32 %v5973_v6, %v4430_v7  ;;  %v5967_v26 = vld [vmem:[#allocation2 + $0x2ac] sm:$0xf]  ;;  %v4625_v28 = vor.u32 %v6021_v14, %v4622_v17  ;;  %v4598_v31 = vld [vmem:[#allocation2 + $0x440] sm:$0xf0]  ;;  %v4572_v34 = vld [vmem:[#allocation2 + $0x3f8] sm:$0xf] }
  0x57   :  { %1110 = vmatpush.bf16.msrb.mxu1 %v4545_v21  ;;  %v4596_v21 = vld [vmem:[#allocation2 + $0x428] sm:$0xf]  ;;  %v6015_v30 = vld [vmem:[#allocation2 + $0x42c] sm:$0xf]  ;;  %v5913_v36 = vld [vmem:[#allocation2 + $0xfc] sm:$0xf] }
  0x58   :  { %1123 = vmatpush.bf16.msrb.mxu2 %v4165_v23  ;;  %1136 = vmatpush.bf16.msrb.mxu3 %v4357_v27  ;;  %v5919_v23 = vld [vmem:[#allocation2 + $0x12c] sm:$0xf]  ;;  %v4406_v27 = vld [vmem:[#allocation2 + $0x2c0] sm:$0xf0]  ;;  %v4597_v29 = vor.u32 %v6018_v22, %v4596_v21  ;;  %v4190_v37 = vld [vmem:[#allocation2 + $0x110] sm:$0xf0]  ;;  %v4601_v40 = vor.u32 %v6015_v30, %v4598_v31 }
  0x59   :  { %v5961_v38 = vld [vmem:[#allocation2 + $0x27c] sm:$0xf]  ;;  %v4574_v43 = vld [vmem:[#allocation2 + $0x410] sm:$0xf0]  ;;  %v4548_v46 = vld [vmem:[#allocation2 + $0x3c8] sm:$0xf] }
  0x5a   :  { %1098 = vmatpush.bf16.msrb.mxu0 %v4329_v32  ;;  %v4217_v32 = vor.u32 %v5919_v23, %v4214_v25  ;;  %v6009_v42 = vld [vmem:[#allocation2 + $0x3fc] sm:$0xf]  ;;  %v5907_v48 = vld [vmem:[#allocation2 + $0xcc] sm:$0xf]  ;;  %v4166_v49 = vld [vmem:[#allocation2 + $0xe0] sm:$0xf0] }
  0x5b   :  { %1111 = vmatpush.bf16.msrb.mxu1 %v4521_v33  ;;  %v4409_v33 = vor.u32 %v5967_v26, %v4406_v27  ;;  %v5955_v50 = vld [vmem:[#allocation2 + $0x24c] sm:$0xf]  ;;  %v4577_v52 = vor.u32 %v6009_v42, %v4574_v43  ;;  %v4550_v55 = vld [vmem:[#allocation2 + $0x3e0] sm:$0xf0]  ;;  %v6000_v59 = vld [vmem:[#allocation2 + $0x3ac] sm:$0xf0] }
  0x5c   :  { %1124 = vmatpush.bf16.msrb.mxu2 %v4141_v35  ;;  %1137 = vmatpush.bf16.msrb.mxu3 %v4333_v39  ;;  %v6012_v35 = vld [vmem:[#allocation2 + $0x40c] sm:$0xf0]  ;;  %v4382_v39 = vld [vmem:[#allocation2 + $0x290] sm:$0xf0]  ;;  %v6003_v54 = vld [vmem:[#allocation2 + $0x3cc] sm:$0xf] }
  0x5d   :  { %v4573_v41 = vor.u32 %v6012_v35, %v4572_v34  ;;  %v5901_v60 = vld [vmem:[#allocation2 + $0x9c] sm:$0xf]  ;;  %v4334_v63 = vld [vmem:[#allocation2 + $0x230] sm:$0xf0]  ;;  %v4553_v0 = vor.u32 %v6003_v54, %v4550_v55  ;;  %v4500_v4 = vld [vmem:[#allocation2 + $0x368] sm:$0xf] }
  0x5e   :  { %1099 = vmatpush.bf16.msrb.mxu0 %v4305_v44  ;;  %v4193_v44 = vor.u32 %v5913_v36, %v4190_v37  ;;  %v5949_v62 = vld [vmem:[#allocation2 + $0x21c] sm:$0xf]  ;;  %v4526_v3 = vld [vmem:[#allocation2 + $0x3b0] sm:$0xf0]  ;;  %v5994_v5 = vld [vmem:[#allocation2 + $0x37c] sm:$0xf0] }
  0x5f   :  { %1112 = vmatpush.bf16.msrb.mxu1 %v4497_v45  ;;  %v4385_v45 = vor.u32 %v5961_v38, %v4382_v39  ;;  %v4337_v7 = vor.u32 %v5949_v62, %v4334_v63  ;;  %v5943_v10 = vld [vmem:[#allocation2 + $0x1ec] sm:$0xf]  ;;  %v4310_v11 = vld [vmem:[#allocation2 + $0x200] sm:$0xf0]  ;;  %v4476_v21 = vld [vmem:[#allocation2 + $0x338] sm:$0xf] }
  0x60   :  { %1125 = vmatpush.bf16.msrb.mxu2 %v4117_v47  ;;  %1138 = vmatpush.bf16.msrb.mxu3 %v4309_v51  ;;  %v6006_v47 = vld [vmem:[#allocation2 + $0x3dc] sm:$0xf0]  ;;  %v4358_v51 = vld [vmem:[#allocation2 + $0x260] sm:$0xf0]  ;;  %v5991_v14 = vld [vmem:[#allocation2 + $0x36c] sm:$0xf] }
  0x61   :  { %v4549_v53 = vor.u32 %v6006_v47, %v4548_v46  ;;  %v4361_v58 = vor.u32 %v5955_v50, %v4358_v51  ;;  %v4502_v17 = vld [vmem:[#allocation2 + $0x380] sm:$0xf0]  ;;  %v5988_v22 = vld [vmem:[#allocation2 + $0x34c] sm:$0xf0]  ;;  %v5889_v23 = vld [vmem:[#allocation2 + $0x3c] sm:$0xf] }
  0x62   :  { %1100 = vmatpush.bf16.msrb.mxu0 %v4281_v56  ;;  %v4524_v56 = vld [vmem:[#allocation2 + $0x398] sm:$0xf]  ;;  %v5937_v25 = vld [vmem:[#allocation2 + $0x1bc] sm:$0xf]  ;;  %v4286_v26 = vld [vmem:[#allocation2 + $0x1d0] sm:$0xf0]  ;;  %v4505_v27 = vor.u32 %v5991_v14, %v4502_v17 }
  0x63   :  { %1113 = vmatpush.bf16.msrb.mxu1 %v4473_v57  ;;  %v4169_v57 = vor.u32 %v5907_v48, %v4166_v49  ;;  %v4525_v2 = vor.u32 %v6000_v59, %v4524_v56  ;;  %v4478_v30 = vld [vmem:[#allocation2 + $0x350] sm:$0xf0]  ;;  %v4452_v31 = vld [vmem:[#allocation2 + $0x308] sm:$0xf]  ;;  %v4289_v34 = vor.u32 %v5937_v25, %v4286_v26  ;;  %v5883_v35 = vld [vmem:[#allocation2 + $0xc] sm:$0xf] }
  0x64   :  { %1126 = vmatpush.bf16.msrb.mxu2 %v4093_v61  ;;  %1139 = vmatpush.bf16.msrb.mxu3 %v4285_v1  ;;  %v4142_v61 = vld [vmem:[#allocation2 + $0xb0] sm:$0xf0]  ;;  %v5997_v1 = vld [vmem:[#allocation2 + $0x39c] sm:$0xf]  ;;  %v4070_v36 = vld [vmem:[#allocation2 + $0x20] sm:$0xf0] }
  0x65   :  { %v4145_v6 = vor.u32 %v5901_v60, %v4142_v61  ;;  %v5931_v37 = vld [vmem:[#allocation2 + $0x18c] sm:$0xf]  ;;  %v4262_v38 = vld [vmem:[#allocation2 + $0x1a0] sm:$0xf0]  ;;  %v4244_v39 = vld [vmem:[#allocation2 + $0x160] sm:$0xf]  ;;  %v4073_v49 = vor.u32 %v5883_v35, %v4070_v36 }
  0x66   :  { %1101 = vmatpush.bf16.msrb.mxu0 %v4257_v8  ;;  %v5895_v8 = vld [vmem:[#allocation2 + $0x6c] sm:$0xf]  ;;  %v4436_v42 = vld [vmem:[#allocation2 + $0x2e0] sm:$0xf]  ;;  %v5977_v43 = vld [vmem:[#allocation2 + $0x2f4] sm:$0xf0]  ;;  %v4265_v50 = vor.u32 %v5931_v37, %v4262_v38 }
  0x67   :  { %1114 = vmatpush.bf16.msrb.mxu1 %v4449_v9  ;;  %v4118_v9 = vld [vmem:[#allocation2 + $0x80] sm:$0xf0]  ;;  %v6025_v46 = vld [vmem:[#allocation2 + $0x474] sm:$0xf0]  ;;  %v5979_v47 = vld [vmem:[#allocation2 + $0x30c] sm:$0xf] }
  0x68   :  { %1127 = vmatpush.bf16.msrb.mxu2 %v4069_v12  ;;  %1140 = vmatpush.bf16.msrb.mxu3 %v4261_v24  ;;  %v4529_v12 = vor.u32 %v5997_v1, %v4526_v3  ;;  %v4094_v24 = vld [vmem:[#allocation2 + $0x50] sm:$0xf0]  ;;  %v4454_v48 = vld [vmem:[#allocation2 + $0x320] sm:$0xf0]  ;;  %v4246_v54 = vld [vmem:[#allocation2 + $0x178] sm:$0xf0] }
  0x69   :  { %1102 = vmatmul.bf16.vlgmr.msrb.gmra.mxu0 %v6709_v16  ;;  %v4457_v56 = vor.u32 %v5979_v47, %v4454_v48  ;;  %v4412_v59 = vld [vmem:[#allocation2 + $0x2b0] sm:$0xf]  ;;  %v5971_v60 = vld [vmem:[#allocation2 + $0x2c4] sm:$0xf0]  ;;  %v5920_v1 = vld [vmem:[#allocation2 + $0x134] sm:$0xf] }
  0x6a   :  { %1146 = vmatpush.bf16.msra.mxu0 %v4621_v13  ;;  %1115 = vmatmul.bf16.vlgmr.msrb.gmra.mxu1 %v6711_v19  ;;  %v4501_v13 = vor.u32 %v5994_v5, %v4500_v4  ;;  %v4604_v61 = vld [vmem:[#allocation2 + $0x430] sm:$0xf]  ;;  %v6019_v62 = vld [vmem:[#allocation2 + $0x444] sm:$0xf0]  ;;  %v4413_v3 = vor.u32 %v5971_v60, %v4412_v59  ;;  %v4196_v5 = vld [vmem:[#allocation2 + $0x100] sm:$0xf] }
  0x6b   :  { %1159 = vmatpush.bf16.msra.mxu1 %v4241_v18  ;;  %1128 = vmatmul.bf16.vlgmr.msrb.gmra.mxu2 %v6707_v15  ;;  %v4121_v18 = vor.u32 %v5895_v8, %v4118_v9  ;;  %v4605_v4 = vor.u32 %v6019_v62, %v4604_v61  ;;  %v5965_v8 = vld [vmem:[#allocation2 + $0x294] sm:$0xf0]  ;;  %v4580_v9 = vld [vmem:[#allocation2 + $0x400] sm:$0xf]  ;;  %v4198_v14 = vld [vmem:[#allocation2 + $0x118] sm:$0xf0] }
  0x6c   :  { %1172 = vmatpush.bf16.msra.mxu2 %v4433_v20  ;;  %1185 = vmatpush.bf16.msra.mxu3 %v4625_v28  ;;  %v4313_v20 = vor.u32 %v5943_v10, %v4310_v11  ;;  %v5985_v28 = vld [vmem:[#allocation2 + $0x33c] sm:$0xf]  ;;  %v6013_v10 = vld [vmem:[#allocation2 + $0x414] sm:$0xf0]  ;;  %v6007_v25 = vld [vmem:[#allocation2 + $0x3e4] sm:$0xf0] }
  0x6d   :  { %1141 = vmatmul.bf16.vlgmr.msrb.gmra.mxu3 %v6709_v16  ;;  %v5953_v35 = vld [vmem:[#allocation2 + $0x234] sm:$0xf0]  ;;  %v4532_v36 = vld [vmem:[#allocation2 + $0x3a0] sm:$0xf]  ;;  %v5947_v47 = vld [vmem:[#allocation2 + $0x204] sm:$0xf0] }
  0x6e   :  { %1147 = vmatpush.bf16.msra.mxu0 %v4597_v29  ;;  %v4477_v29 = vor.u32 %v5988_v22, %v4476_v21  ;;  %v5911_v21 = vld [vmem:[#allocation2 + $0xe4] sm:$0xf0]  ;;  %v4364_v22 = vld [vmem:[#allocation2 + $0x250] sm:$0xf]  ;;  %v6001_v37 = vld [vmem:[#allocation2 + $0x3b4] sm:$0xf0] }
  0x6f   :  { %1160 = vmatpush.bf16.msra.mxu1 %v4217_v32  ;;  %v5982_v32 = vld [vmem:[#allocation2 + $0x31c] sm:$0xf0]  ;;  %v4508_v48 = vld [vmem:[#allocation2 + $0x370] sm:$0xf]  ;;  %v5941_v59 = vld [vmem:[#allocation2 + $0x1d4] sm:$0xf0] }
  0x70   :  { %1173 = vmatpush.bf16.msra.mxu2 %v4409_v33  ;;  %1186 = vmatpush.bf16.msra.mxu3 %v4601_v40  ;;  %v4097_v33 = vor.u32 %v5889_v23, %v4094_v24  ;;  %v5929_v40 = vld [vmem:[#allocation2 + $0x174] sm:$0xf0]  ;;  %v5959_v23 = vld [vmem:[#allocation2 + $0x264] sm:$0xf0]  ;;  %v4556_v24 = vld [vmem:[#allocation2 + $0x3d0] sm:$0xf] }
  0x71   :  { %v4245_v51 = vor.u32 %v5929_v40, %v4244_v39  ;;  %v5902_v40 = vld [vmem:[#allocation2 + $0xa4] sm:$0xf]  ;;  %v4484_v60 = vld [vmem:[#allocation2 + $0x340] sm:$0xf]  ;;  %v5989_v61 = vld [vmem:[#allocation2 + $0x354] sm:$0xf0] }
  0x72   :  { %1148 = vmatpush.bf16.msra.mxu0 %v4573_v41  ;;  %v4481_v41 = vor.u32 %v5985_v28, %v4478_v30  ;;  %v5908_v28 = vld [vmem:[#allocation2 + $0xd4] sm:$0xf]  ;;  %v4365_v30 = vor.u32 %v5959_v23, %v4364_v22  ;;  %vm1298_vm0 = vcmask 1040384   ;;  %vm1301_vm1 = vcmask 1043456   ;;  %s4044_s23 = sshll.u32 %s7036_s13, 4  ;;  %s4045_s23 = int_to_ptr.hbm [resolvable:$true] %s4044_s23 }
  0x73   :  { %1161 = vmatpush.bf16.msra.mxu1 %v4193_v44  ;;  %v4628_v44 = vld [vmem:[#allocation2 + $0x460] sm:$0xf]  ;;  %vm1282_vm2 = vcmask 1042432   ;;  %vm1285_vm3 = vcmask 1044480   ;;  %vm1304_vm4 = vcmask 1045504   ;;  %vm1323_vm5 = vcmask 1041408  }
  0x74   :  { %1174 = vmatpush.bf16.msra.mxu2 %v4385_v45  ;;  %1187 = vmatpush.bf16.msra.mxu3 %v4577_v52  ;;  %v4453_v45 = vor.u32 %v5982_v32, %v4452_v31  ;;  %v4437_v52 = vor.u32 %v5977_v43, %v4436_v42  ;;  %v4629_v55 = vor.u32 %v6025_v46, %v4628_v44  ;;  %v4148_v32 = vld [vmem:[#allocation2 + $0xa0] sm:$0xf]  ;;  %v4124_v44 = vld [vmem:[#allocation2 + $0x70] sm:$0xf]  ;;  %vm1328_vm6 = vcmask 1046528  }
  0x75   :  { %v4557_v31 = vor.u32 %v6007_v25, %v4556_v24  ;;  %v4533_v43 = vor.u32 %v6001_v37, %v4532_v36  ;;  %v4316_v46 = vld [vmem:[#allocation2 + $0x1f0] sm:$0xf]  ;;  %v5968_v25 = vld [vmem:[#allocation2 + $0x2b4] sm:$0xf]  ;;  %vm2635_vm7 = vcmask 1041409  }
  0x76   :  { %1149 = vmatpush.bf16.msra.mxu0 %v4549_v53  ;;  %v5926_v53 = vld [vmem:[#allocation2 + $0x164] sm:$0xf] }
  0x77   :  { %1162 = vmatpush.bf16.msra.mxu1 %v4169_v57  ;;  %v4220_v57 = vld [vmem:[#allocation2 + $0x130] sm:$0xf]  ;;  %v4249_v63 = vor.u32 %v5926_v53, %v4246_v54  ;;  %v4126_v53 = vld [vmem:[#allocation2 + $0x88] sm:$0xf0]  ;;  %v4317_v54 = vor.u32 %v5947_v47, %v4316_v46  ;;  %v5998_v46 = vld [vmem:[#allocation2 + $0x3a4] sm:$0xf] }
  0x78   :  { %1175 = vmatpush.bf16.msra.mxu2 %v4361_v58  ;;  %1188 = vmatpush.bf16.msra.mxu3 %v4553_v0  ;;  %v5923_v58 = vld [vmem:[#allocation2 + $0x144] sm:$0xf0]  ;;  %v4534_v47 = vld [vmem:[#allocation2 + $0x3b8] sm:$0xf0] }
  0x79   :  { %v4221_v0 = vor.u32 %v5923_v58, %v4220_v57  ;;  %v5893_v57 = vld [vmem:[#allocation2 + $0x54] sm:$0xf0]  ;;  %v4292_v58 = vld [vmem:[#allocation2 + $0x1c0] sm:$0xf] }
  0x7a   :  { %1150 = vmatpush.bf16.msra.mxu0 %v4525_v2  ;;  %v4222_v2 = vld [vmem:[#allocation2 + $0x148] sm:$0xf0] }
  0x7b   :  { %1163 = vmatpush.bf16.msra.mxu1 %v4145_v6  ;;  %v5917_v6 = vld [vmem:[#allocation2 + $0x114] sm:$0xf0]  ;;  %v4225_v11 = vor.u32 %v5920_v1, %v4222_v2  ;;  %v5890_v1 = vld [vmem:[#allocation2 + $0x44] sm:$0xf]  ;;  %v4102_v2 = vld [vmem:[#allocation2 + $0x58] sm:$0xf0] }
  0x7c   :  { %1176 = vmatpush.bf16.msra.mxu2 %v4337_v7  ;;  %1189 = vmatpush.bf16.msra.mxu3 %v4529_v12  ;;  %v4388_v7 = vld [vmem:[#allocation2 + $0x280] sm:$0xf]  ;;  %v4197_v12 = vor.u32 %v5917_v6, %v4196_v5  ;;  %v5887_v5 = vld [vmem:[#allocation2 + $0x24] sm:$0xf0]  ;;  %v4268_v6 = vld [vmem:[#allocation2 + $0x190] sm:$0xf] }
  0x7d   :  { %v4389_v17 = vor.u32 %v5965_v8, %v4388_v7  ;;  %v5935_v7 = vld [vmem:[#allocation2 + $0x1a4] sm:$0xf0]  ;;  %v4460_v8 = vld [vmem:[#allocation2 + $0x310] sm:$0xf] }
  0x7e   :  { %1151 = vmatpush.bf16.msra.mxu0 %v4501_v13  ;;  %v5914_v13 = vld [vmem:[#allocation2 + $0x104] sm:$0xf] }
  0x7f   :  { %1164 = vmatpush.bf16.msra.mxu1 %v4121_v18  ;;  %v4581_v18 = vor.u32 %v6013_v10, %v4580_v9  ;;  %v4201_v26 = vor.u32 %v5914_v13, %v4198_v14  ;;  %v5983_v9 = vld [vmem:[#allocation2 + $0x324] sm:$0xf0]  ;;  %v5974_v10 = vld [vmem:[#allocation2 + $0x2e4] sm:$0xf]  ;;  %v4630_v13 = vld [vmem:[#allocation2 + $0x478] sm:$0xf0]  ;;  %v4105_v14 = vor.u32 %v5890_v1, %v4102_v2 }
  0x80   :  { %1177 = vmatpush.bf16.msra.mxu2 %v4313_v20  ;;  %1190 = vmatpush.bf16.msra.mxu3 %v4505_v27  ;;  %v4172_v20 = vld [vmem:[#allocation2 + $0xd0] sm:$0xf]  ;;  %v4461_v22 = vor.u32 %v5983_v9, %v4460_v8 }
  0x81   :  { %v4173_v27 = vor.u32 %v5911_v21, %v4172_v20  ;;  %v4078_v20 = vld [vmem:[#allocation2 + $0x28] sm:$0xf0]  ;;  %v4269_v21 = vor.u32 %v5935_v7, %v4268_v6  ;;  %v6071_v6 = vld [vmem:[#allocation5 + $0x164] sm:$0xf0]  ;;  %v6068_v7 = vld [vmem:[#allocation5 + $0x154] sm:$0xf] }
  0x82   :  { %1152 = vmatpush.bf16.msra.mxu0 %v4477_v29  ;;  %v4174_v29 = vld [vmem:[#allocation2 + $0xe8] sm:$0xf0] }
  0x83   :  { %1165 = vmatpush.bf16.msra.mxu1 %v4097_v33  ;;  %v5905_v33 = vld [vmem:[#allocation2 + $0xb4] sm:$0xf0]  ;;  %v4177_v38 = vor.u32 %v5908_v28, %v4174_v29  ;;  %v4606_v28 = vld [vmem:[#allocation2 + $0x448] sm:$0xf0] }
  0x84   :  { %1178 = vmatpush.bf16.msra.mxu2 %v4289_v34  ;;  %1191 = vmatpush.bf16.msra.mxu3 %v4481_v41  ;;  %v4340_v34 = vld [vmem:[#allocation2 + $0x220] sm:$0xf]  ;;  %v4149_v39 = vor.u32 %v5905_v33, %v4148_v32  ;;  %v4150_v41 = vld [vmem:[#allocation2 + $0xb8] sm:$0xf0]  ;;  %v5962_v32 = vld [vmem:[#allocation2 + $0x284] sm:$0xf] }
  0x85   :  { %v4341_v42 = vor.u32 %v5953_v35, %v4340_v34  ;;  %v4390_v33 = vld [vmem:[#allocation2 + $0x298] sm:$0xf0]  ;;  %v6010_v34 = vld [vmem:[#allocation2 + $0x404] sm:$0xf] }
  0x86   :  { %1153 = vmatpush.bf16.msra.mxu0 %v4453_v45  ;;  %v5899_v45 = vld [vmem:[#allocation2 + $0x84] sm:$0xf0]  ;;  %v4582_v35 = vld [vmem:[#allocation2 + $0x418] sm:$0xf0]  ;;  %v4393_v36 = vor.u32 %v5962_v32, %v4390_v33 }
  0x87   :  { %1166 = vmatpush.bf16.msra.mxu1 %v4073_v49  ;;  %v5995_v49 = vld [vmem:[#allocation2 + $0x384] sm:$0xf0]  ;;  %v4585_v37 = vor.u32 %v6010_v34, %v4582_v35  ;;  %v4732_v35 = vld [vmem:[#allocation5 + $0xc0] sm:$0xf] }
  0x88   :  { %1179 = vmatpush.bf16.msra.mxu2 %v4265_v50  ;;  %1192 = vmatpush.bf16.msra.mxu3 %v4457_v56  ;;  %v4153_v50 = vor.u32 %v5902_v40, %v4150_v41  ;;  %v4100_v56 = vld [vmem:[#allocation2 + $0x40] sm:$0xf]  ;;  %v6004_v40 = vld [vmem:[#allocation2 + $0x3d4] sm:$0xf]  ;;  %v4558_v41 = vld [vmem:[#allocation2 + $0x3e8] sm:$0xf0] }
  0x89   :  { %1154 = vmatmul.bf16.vlgmr.msra.gmra.mxu0 %v6711_v19 }
  0x8a   :  { %1198 = vmatpush.bf16.msrb.mxu0 %v4245_v51  ;;  %1167 = vmatmul.bf16.vlgmr.msra.gmra.mxu1 %v6707_v15  ;;  %v4125_v51 = vor.u32 %v5899_v45, %v4124_v44  ;;  %v5950_v44 = vld [vmem:[#allocation2 + $0x224] sm:$0xf]  ;;  %v4342_v45 = vld [vmem:[#allocation2 + $0x238] sm:$0xf0] }
  0x8b   :  { %1211 = vmatpush.bf16.msrb.mxu1 %v4437_v52  ;;  %1180 = vmatmul.bf16.vlgmr.msra.gmra.mxu2 %v6709_v16  ;;  %v5896_v52 = vld [vmem:[#allocation2 + $0x74] sm:$0xf] }
  0x8c   :  { %1224 = vmatpush.bf16.msrb.mxu2 %v4629_v55  ;;  %1237 = vmatpush.bf16.msrb.mxu3 %v4249_v63  ;;  %v4509_v55 = vor.u32 %v5995_v49, %v4508_v48  ;;  %v4129_v62 = vor.u32 %v5896_v52, %v4126_v53  ;;  %v4101_v63 = vor.u32 %v5893_v57, %v4100_v56  ;;  %v5992_v52 = vld [vmem:[#allocation2 + $0x374] sm:$0xf]  ;;  %v4510_v53 = vld [vmem:[#allocation2 + $0x388] sm:$0xf0]  ;;  %v4294_v56 = vld [vmem:[#allocation2 + $0x1d8] sm:$0xf0] }
  0x8d   :  { %1193 = vmatmul.bf16.vlgmr.msra.gmra.mxu3 %v6711_v19  ;;  %v4345_v48 = vor.u32 %v5950_v44, %v4342_v45  ;;  %v4537_v49 = vor.u32 %v5998_v46, %v4534_v47  ;;  %v5986_v57 = vld [vmem:[#allocation2 + $0x344] sm:$0xf]  ;;  %v6044_v44 = vld [vmem:[#allocation5 + $0x94] sm:$0xf]  ;;  %v4710_v47 = vld [vmem:[#allocation5 + $0xa8] sm:$0xf0] }
  0x8e   :  { %1199 = vmatpush.bf16.msrb.mxu0 %v4221_v0  ;;  %v4076_v0 = vld [vmem:[#allocation2 + $0x10] sm:$0xf] }
  0x8f   :  { %1212 = vmatpush.bf16.msrb.mxu1 %v4413_v3  ;;  %v4293_v3 = vor.u32 %v5941_v59, %v4292_v58  ;;  %v4486_v58 = vld [vmem:[#allocation2 + $0x358] sm:$0xf0] }
  0x90   :  { %1225 = vmatpush.bf16.msrb.mxu2 %v4605_v4  ;;  %1238 = vmatpush.bf16.msrb.mxu3 %v4225_v11  ;;  %v4485_v4 = vor.u32 %v5989_v61, %v4484_v60  ;;  %v4438_v11 = vld [vmem:[#allocation2 + $0x2f8] sm:$0xf0]  ;;  %v4489_v60 = vor.u32 %v5986_v57, %v4486_v58  ;;  %v5932_v61 = vld [vmem:[#allocation2 + $0x194] sm:$0xf]  ;;  %v4660_v57 = vld [vmem:[#allocation5 + $0x30] sm:$0xf] }
  0x91   :  { %v4441_v23 = vor.u32 %v5974_v10, %v4438_v11  ;;  %v4806_v10 = vld [vmem:[#allocation5 + $0x168] sm:$0xf0]  ;;  %v6035_v58 = vld [vmem:[#allocation5 + $0x44] sm:$0xf0] }
  0x92   :  { %1200 = vmatpush.bf16.msrb.mxu0 %v4197_v12  ;;  %v6022_v12 = vld [vmem:[#allocation2 + $0x464] sm:$0xf]  ;;  %v4809_v11 = vor.u32 %v6068_v7, %v4806_v10  ;;  %v6029_v7 = vld [vmem:[#allocation5 + $0x14] sm:$0xf0] }
  0x93   :  { %1213 = vmatpush.bf16.msrb.mxu1 %v4389_v17  ;;  %v4077_v17 = vor.u32 %v5887_v5, %v4076_v0  ;;  %v4633_v24 = vor.u32 %v6022_v12, %v4630_v13  ;;  %v4462_v0 = vld [vmem:[#allocation2 + $0x328] sm:$0xf0]  ;;  %v4804_v5 = vld [vmem:[#allocation5 + $0x150] sm:$0xf]  ;;  %v4780_v12 = vld [vmem:[#allocation5 + $0x120] sm:$0xf] }
  0x94   :  { %1226 = vmatpush.bf16.msrb.mxu2 %v4581_v18  ;;  %1239 = vmatpush.bf16.msrb.mxu3 %v4201_v26  ;;  %v5884_v18 = vld [vmem:[#allocation2 + $0x14] sm:$0xf]  ;;  %v4414_v26 = vld [vmem:[#allocation2 + $0x2c8] sm:$0xf0]  ;;  %v4805_v9 = vor.u32 %v6071_v6, %v4804_v5  ;;  %v6065_v13 = vld [vmem:[#allocation5 + $0x134] sm:$0xf0] }
  0x95   :  { %v4081_v29 = vor.u32 %v5884_v18, %v4078_v20  ;;  %v4782_v18 = vld [vmem:[#allocation5 + $0x138] sm:$0xf0]  ;;  %v4636_v5 = vld [vmem:[#allocation5] sm:$0xf] }
  0x96   :  { %1201 = vmatpush.bf16.msrb.mxu0 %v4173_v27  ;;  %v6016_v27 = vld [vmem:[#allocation2 + $0x434] sm:$0xf] }
  0x97   :  { %1214 = vmatpush.bf16.msrb.mxu1 %v4365_v30  ;;  %v4417_v30 = vor.u32 %v5968_v25, %v4414_v26  ;;  %v4756_v26 = vld [vmem:[#allocation5 + $0xf0] sm:$0xf] }
  0x98   :  { %1227 = vmatpush.bf16.msrb.mxu2 %v4557_v31  ;;  %1240 = vmatpush.bf16.msrb.mxu3 %v4177_v38  ;;  %v4609_v31 = vor.u32 %v6016_v27, %v4606_v28  ;;  %v5956_v38 = vld [vmem:[#allocation2 + $0x254] sm:$0xf]  ;;  %v6059_v27 = vld [vmem:[#allocation5 + $0x104] sm:$0xf0] }
  0x99   :  { %v6056_v28 = vld [vmem:[#allocation5 + $0xf4] sm:$0xf] }
  0x9a   :  { %1202 = vmatpush.bf16.msrb.mxu0 %v4149_v39  ;;  %v4366_v39 = vld [vmem:[#allocation2 + $0x268] sm:$0xf0] }
  0x9b   :  { %1215 = vmatpush.bf16.msrb.mxu1 %v4341_v42  ;;  %v4369_v42 = vor.u32 %v5956_v38, %v4366_v39 }
  0x9c   :  { %1228 = vmatpush.bf16.msrb.mxu2 %v4533_v43  ;;  %1241 = vmatpush.bf16.msrb.mxu3 %v4153_v50  ;;  %v4561_v43 = vor.u32 %v6004_v40, %v4558_v41  ;;  %v5944_v50 = vld [vmem:[#allocation2 + $0x1f4] sm:$0xf]  ;;  %v4734_v40 = vld [vmem:[#allocation5 + $0xd8] sm:$0xf0] }
  0x9e   :  { %1203 = vmatpush.bf16.msrb.mxu0 %v4125_v51  ;;  %v4318_v51 = vld [vmem:[#allocation2 + $0x208] sm:$0xf0] }
  0x9f   :  { %1216 = vmatpush.bf16.msrb.mxu1 %v4317_v54  ;;  %v4321_v54 = vor.u32 %v5944_v50, %v4318_v51 }
  0xa0   :  { %1229 = vmatpush.bf16.msrb.mxu2 %v4509_v55  ;;  %1242 = vmatpush.bf16.msrb.mxu3 %v4129_v62  ;;  %v5938_v55 = vld [vmem:[#allocation2 + $0x1c4] sm:$0xf]  ;;  %v4270_v62 = vld [vmem:[#allocation2 + $0x1a8] sm:$0xf0] }
  0xa1   :  { %v4297_v59 = vor.u32 %v5938_v55, %v4294_v56  ;;  %v4273_v1 = vor.u32 %v5932_v61, %v4270_v62  ;;  %v4686_v55 = vld [vmem:[#allocation5 + $0x78] sm:$0xf0]  ;;  %v4661_v61 = vor.u32 %v6035_v58, %v4660_v57  ;;  %v4662_v62 = vld [vmem:[#allocation5 + $0x48] sm:$0xf0]  ;;  %v6092_v57 = vld [vmem:[#allocation5 + $0x214] sm:$0xf] }
  0xa2   :  { %1204 = vmatpush.bf16.msrb.mxu0 %v4101_v63  ;;  %v5980_v63 = vld [vmem:[#allocation2 + $0x314] sm:$0xf] }
  0xa3   :  { %1217 = vmatpush.bf16.msrb.mxu1 %v4293_v3  ;;  %v4465_v2 = vor.u32 %v5980_v63, %v4462_v0  ;;  %v4996_v63 = vld [vmem:[#allocation5 + $0x2d0] sm:$0xf]  ;;  %v6119_v0 = vld [vmem:[#allocation5 + $0x2e4] sm:$0xf0] }
  0xa4   :  { %1230 = vmatpush.bf16.msrb.mxu2 %v4485_v4  ;;  %1243 = vmatpush.bf16.msrb.mxu3 %v4105_v14  ;;  %v6062_v14 = vld [vmem:[#allocation5 + $0x124] sm:$0xf] }
  0xa5   :  { %v4785_v20 = vor.u32 %v6062_v14, %v4782_v18  ;;  %v6113_v14 = vld [vmem:[#allocation5 + $0x2b4] sm:$0xf0] }
  0xa6   :  { %1205 = vmatpush.bf16.msrb.mxu0 %v4077_v17  ;;  %v4781_v17 = vor.u32 %v6065_v13, %v4780_v12  ;;  %v4972_v13 = vld [vmem:[#allocation5 + $0x2a0] sm:$0xf] }
  0xa7   :  { %1218 = vmatpush.bf16.msrb.mxu1 %v4269_v21  ;;  %v4973_v18 = vor.u32 %v6113_v14, %v4972_v13 }
  0xa8   :  { %1231 = vmatpush.bf16.msrb.mxu2 %v4461_v22  ;;  %1244 = vmatpush.bf16.msrb.mxu3 %v4081_v29  ;;  %v4757_v29 = vor.u32 %v6059_v27, %v4756_v26  ;;  %v4948_v26 = vld [vmem:[#allocation5 + $0x270] sm:$0xf] }
  0xa9   :  { %1206 = vmatmul.bf16.vlgmr.msrb.gmra.mxu0 %v6707_v15 }
  0xaa   :  { %1250 = vmatpush.bf16.msra.mxu0 %v4441_v23  ;;  %1219 = vmatmul.bf16.vlgmr.msrb.gmra.mxu1 %v6709_v16 }
  0xab   :  { %1263 = vmatpush.bf16.msra.mxu1 %v4633_v24  ;;  %1232 = vmatmul.bf16.vlgmr.msrb.gmra.mxu2 %v6711_v19 }
  0xac   :  { %1245 = vmatmul.bf16.vlgmr.msrb.gmra.mxu3 %v6707_v15  ;;  %v4513_v15 = vor.u32 %v5992_v52, %v4510_v53  ;;  %1927 = vmatpush.bf16.msra.mxu2 %v4805_v9  ;;  %v4684_v52 = vld [vmem:[#allocation5 + $0x60] sm:$0xf]  ;;  %v6041_v53 = vld [vmem:[#allocation5 + $0x74] sm:$0xf0]  ;;  %v4638_v9 = vld [vmem:[#allocation5 + $0x18] sm:$0xf0] }
  0xae   :  { %1251 = vmatpush.bf16.msra.mxu0 %v4417_v30  ;;  %v4758_v30 = vld [vmem:[#allocation5 + $0x108] sm:$0xf0] }
  0xaf   :  { %1264 = vmatpush.bf16.msra.mxu1 %v4609_v31  ;;  %v4761_v32 = vor.u32 %v6056_v28, %v4758_v30  ;;  %v6107_v28 = vld [vmem:[#allocation5 + $0x284] sm:$0xf0]  ;;  %v4950_v30 = vld [vmem:[#allocation5 + $0x288] sm:$0xf0] }
  0xb0   :  { %1928 = vmatpush.bf16.msra.mxu2 %v4781_v17  ;;  %v6110_v17 = vld [vmem:[#allocation5 + $0x2a4] sm:$0xf] }
  0xb2   :  { %1252 = vmatpush.bf16.msra.mxu0 %v4393_v36  ;;  %v6053_v36 = vld [vmem:[#allocation5 + $0xd4] sm:$0xf0] }
  0xb3   :  { %1265 = vmatpush.bf16.msra.mxu1 %v4585_v37  ;;  %v6050_v37 = vld [vmem:[#allocation5 + $0xc4] sm:$0xf]  ;;  %v4733_v39 = vor.u32 %v6053_v36, %v4732_v35 }
  0xb4   :  { %1929 = vmatpush.bf16.msra.mxu2 %v4757_v29  ;;  %v4737_v41 = vor.u32 %v6050_v37, %v4734_v40  ;;  %v6104_v29 = vld [vmem:[#allocation5 + $0x274] sm:$0xf]  ;;  %v4790_v37 = vld [vmem:[#allocation5 + $0x140] sm:$0xf0]  ;;  %v6101_v40 = vld [vmem:[#allocation5 + $0x254] sm:$0xf0] }
  0xb5   :  { %v4953_v35 = vor.u32 %v6104_v29, %v4950_v30  ;;  %v6039_v30 = vld [vmem:[#allocation5 + $0x6c] sm:$0xf] }
  0xb6   :  { %1253 = vmatpush.bf16.msra.mxu0 %v4369_v42  ;;  %v4708_v42 = vld [vmem:[#allocation5 + $0x90] sm:$0xf] }
  0xb7   :  { %1266 = vmatpush.bf16.msra.mxu1 %v4561_v43  ;;  %v6047_v43 = vld [vmem:[#allocation5 + $0xa4] sm:$0xf0] }
  0xb8   :  { %1930 = vmatpush.bf16.msra.mxu2 %v4733_v39  ;;  %v4709_v46 = vor.u32 %v6047_v43, %v4708_v42  ;;  %v4924_v39 = vld [vmem:[#allocation5 + $0x240] sm:$0xf]  ;;  %v6098_v42 = vld [vmem:[#allocation5 + $0x244] sm:$0xf]  ;;  %v4926_v43 = vld [vmem:[#allocation5 + $0x258] sm:$0xf0] }
  0xba   :  { %1254 = vmatpush.bf16.msra.mxu0 %v4345_v48 }
  0xbb   :  { %1267 = vmatpush.bf16.msra.mxu1 %v4537_v49  ;;  %v4713_v49 = vor.u32 %v6044_v44, %v4710_v47  ;;  %v4764_v44 = vld [vmem:[#allocation5 + $0xf8] sm:$0xf]  ;;  %v6057_v47 = vld [vmem:[#allocation5 + $0xfc] sm:$0xf] }
  0xbc   :  { %1931 = vmatpush.bf16.msra.mxu2 %v4709_v46  ;;  %v6060_v46 = vld [vmem:[#allocation5 + $0x10c] sm:$0xf0] }
  0xbe   :  { %1255 = vmatpush.bf16.msra.mxu0 %v4321_v54  ;;  %v6038_v54 = vld [vmem:[#allocation5 + $0x64] sm:$0xf] }
  0xbf   :  { %1268 = vmatpush.bf16.msra.mxu1 %v4513_v15  ;;  %v4685_v15 = vor.u32 %v6041_v53, %v4684_v52  ;;  %v4689_v56 = vor.u32 %v6038_v54, %v4686_v55  ;;  %v4765_v52 = vor.u32 %v6060_v46, %v4764_v44  ;;  %v4900_v55 = vld [vmem:[#allocation5 + $0x210] sm:$0xf] }
  0xc1   :  { %1932 = vmatpush.bf16.msra.mxu2 %v4685_v15 }
  0xc2   :  { %1256 = vmatpush.bf16.msra.mxu0 %v4297_v59  ;;  %v6032_v59 = vld [vmem:[#allocation5 + $0x34] sm:$0xf] }
  0xc3   :  { %1269 = vmatpush.bf16.msra.mxu1 %v4489_v60 }
  0xc5   :  { %1933 = vmatpush.bf16.msra.mxu2 %v4661_v61  ;;  %v6054_v61 = vld [vmem:[#allocation5 + $0xdc] sm:$0xf0] }
  0xc6   :  { %1257 = vmatpush.bf16.msra.mxu0 %v4273_v1  ;;  %v1051_v3 = vpop.f32.mrf.mxu0  ;;  %v4665_v1 = vor.u32 %v6032_v59, %v4662_v62  ;;  %v4902_v59 = vld [vmem:[#allocation5 + $0x228] sm:$0xf0] }
  0xc7   :  { %1270 = vmatpush.bf16.msra.mxu1 %v4465_v2  ;;  %v1064_v4 = vpop.f32.mrf.mxu1  ;;  %v4997_v2 = vor.u32 %v6119_v0, %v4996_v63  ;;  %v4905_v62 = vor.u32 %v6092_v57, %v4902_v59  ;;  %v6051_v0 = vld [vmem:[#allocation5 + $0xcc] sm:$0xf] }
  0xc8   :  { %v1065_v8 = vadd.f32 %v1064_v4, %v1051_v3  ;;  %v6116_v3 = vld [vmem:[#allocation5 + $0x2d4] sm:$0xf]  ;;  %v4998_v4 = vld [vmem:[#allocation5 + $0x2e8] sm:$0xf0] }
  0xc9   :  { %1258 = vmatmul.bf16.vlgmr.msra.gmra.mxu0 %v6709_v16  ;;  %v5001_v6 = vor.u32 %v6116_v3, %v4998_v4  ;;  %1941 = vmatpush.bf16.msra.mxu3 %v4997_v2  ;;  %v4876_v3 = vld [vmem:[#allocation5 + $0x1e0] sm:$0xf]  ;;  %v6089_v4 = vld [vmem:[#allocation5 + $0x1f4] sm:$0xf0]  ;;  %v6027_v59 = vld [vmem:[#allocation5 + $0xc] sm:$0xf] }
  0xca   :  { %1271 = vmatmul.bf16.vlgmr.msra.gmra.mxu1 %v6711_v19  ;;  %1955 = vmatpush.bf16.msrb.mxu0 %v4809_v11  ;;  %v4637_v11 = vor.u32 %v6029_v7, %v4636_v5  ;;  %v6086_v7 = vld [vmem:[#allocation5 + $0x1e4] sm:$0xf] }
  0xcb   :  { %1969 = vmatpush.bf16.msrb.mxu1 %v5001_v6  ;;  %v4877_v6 = vor.u32 %v6089_v4, %v4876_v3  ;;  %v4982_v3 = vld [vmem:[#allocation5 + $0x2c0] sm:$0xf0] }
  0xcc   :  { %1934 = vmatpush.bf16.msra.mxu2 %v4637_v11  ;;  %v6048_v11 = vld [vmem:[#allocation5 + $0xac] sm:$0xf0] }
  0xcd   :  { %1942 = vmatpush.bf16.msra.mxu3 %v4973_v18  ;;  %v4718_v18 = vld [vmem:[#allocation5 + $0xb0] sm:$0xf0] }
  0xce   :  { %v1053_v16 = vpop.f32.mrf.mxu0  ;;  %v1077_v21 = vpop.f32.mrf.mxu2  ;;  %1956 = vmatpush.bf16.msrb.mxu0 %v4785_v20  ;;  %v4974_v20 = vld [vmem:[#allocation5 + $0x2b8] sm:$0xf0] }
  0xcf   :  { %v6731_v19 = vadd.f32 %v1077_v21, %v1065_v8  ;;  %v1066_v22 = vpop.f32.mrf.mxu1  ;;  %v6026_v8 = vld [vmem:[#allocation5 + $0x4] sm:$0xf]  ;;  %v4812_v16 = vld [vmem:[#allocation5 + $0x158] sm:$0xf]  ;;  %v6072_v21 = vld [vmem:[#allocation5 + $0x16c] sm:$0xf0] }
  0xd0   :  { %v1090_v23 = vpop.f32.mrf.mxu3  ;;  %v4641_v12 = vor.u32 %v6026_v8, %v4638_v9  ;;  %v4977_v22 = vor.u32 %v6110_v17, %v4974_v20  ;;  %v4878_v8 = vld [vmem:[#allocation5 + $0x1f8] sm:$0xf0] }
  0xd1   :  { %v4881_v9 = vor.u32 %v6086_v7, %v4878_v8  ;;  %v6045_v17 = vld [vmem:[#allocation5 + $0x9c] sm:$0xf]  ;;  %v4956_v7 = vld [vmem:[#allocation5 + $0x278] sm:$0xf]  ;;  %v6108_v8 = vld [vmem:[#allocation5 + $0x28c] sm:$0xf0] }
  0xd2   :  { %1957 = vmatpush.bf16.msrb.mxu0 %v4761_v32  ;;  %v4788_v32 = vld [vmem:[#allocation5 + $0x128] sm:$0xf]  ;;  %1970 = vmatpush.bf16.msrb.mxu1 %v4977_v22 }
  0xd3   :  { %v6083_v22 = vld [vmem:[#allocation5 + $0x1c4] sm:$0xf0] }
  0xd6   :  { %v1079_v24 = vpop.f32.mrf.mxu2  ;;  %1958 = vmatpush.bf16.msrb.mxu0 %v4737_v41  ;;  %1971 = vmatpush.bf16.msrb.mxu1 %v4953_v35 }
  0xd7   :  { %v6069_v24 = vld [vmem:[#allocation5 + $0x15c] sm:$0xf] }
  0xd8   :  { %v1092_v25 = vpop.f32.mrf.mxu3 }
  0xd9   :  { %v4814_v25 = vld [vmem:[#allocation5 + $0x170] sm:$0xf0] }
  0xda   :  { %1959 = vmatpush.bf16.msrb.mxu0 %v4713_v49  ;;  %v4817_v27 = vor.u32 %v6069_v24, %v4814_v25  ;;  %v4925_v49 = vor.u32 %v6101_v40, %v4924_v39  ;;  %v6080_v24 = vld [vmem:[#allocation5 + $0x1b4] sm:$0xf]  ;;  %v4854_v25 = vld [vmem:[#allocation5 + $0x1c8] sm:$0xf0]  ;;  %v4830_v39 = vld [vmem:[#allocation5 + $0x198] sm:$0xf0] }
  0xde   :  { %1960 = vmatpush.bf16.msrb.mxu0 %v4689_v56  ;;  %v6095_v56 = vld [vmem:[#allocation5 + $0x224] sm:$0xf0] }
  0xdf   :  { %v4901_v58 = vor.u32 %v6095_v56, %v4900_v55  ;;  %v5006_v55 = vld [vmem:[#allocation5 + $0x2f0] sm:$0xf0]  ;;  %v4644_v56 = vld [vmem:[#allocation5 + $0x8] sm:$0xf] }
  0xe2   :  { %1961 = vmatpush.bf16.msrb.mxu0 %v4665_v1  ;;  %v4742_v1 = vld [vmem:[#allocation5 + $0xe0] sm:$0xf0] }
  0xe3   :  { %v4745_v2 = vor.u32 %v6051_v0, %v4742_v1  ;;  %v6114_v0 = vld [vmem:[#allocation5 + $0x2bc] sm:$0xf0]  ;;  %v6111_v1 = vld [vmem:[#allocation5 + $0x2ac] sm:$0xf] }
  0xe6   :  { %v1103_v31 = vpop.f32.mrf.mxu0  ;;  %1962 = vmatpush.bf16.msrb.mxu0 %v4641_v12 }
  0xe7   :  { %v1104_v33 = vadd.f32 %v1103_v31, %v1090_v23  ;;  %v1116_v34 = vpop.f32.mrf.mxu1  ;;  %v4813_v23 = vor.u32 %v6072_v21, %v4812_v16  ;;  %v4949_v31 = vor.u32 %v6107_v28, %v4948_v26  ;;  %v4721_v16 = vor.u32 %v6045_v17, %v4718_v18  ;;  %v4852_v21 = vld [vmem:[#allocation5 + $0x1b0] sm:$0xf]  ;;  %v6042_v28 = vld [vmem:[#allocation5 + $0x7c] sm:$0xf0]  ;;  %v4932_v17 = vld [vmem:[#allocation5 + $0x248] sm:$0xf] }
  0xe8   :  { %v4857_v26 = vor.u32 %v6080_v24, %v4854_v25  ;;  %v6102_v18 = vld [vmem:[#allocation5 + $0x25c] sm:$0xf0]  ;;  %v4908_v24 = vld [vmem:[#allocation5 + $0x218] sm:$0xf]  ;;  %v6096_v25 = vld [vmem:[#allocation5 + $0x22c] sm:$0xf0] }
  0xe9   :  { %v6733_v38 = vadd.f32 %v1116_v34, %v1104_v33  ;;  %v6066_v33 = vld [vmem:[#allocation5 + $0x13c] sm:$0xf0]  ;;  %v6063_v34 = vld [vmem:[#allocation5 + $0x12c] sm:$0xf]  ;;  %1983 = vmatpush.bf16.msrb.mxu2 %v4813_v23  ;;  %1943 = vmatpush.bf16.msra.mxu3 %v4949_v31  ;;  %v4853_v23 = vor.u32 %v6083_v22, %v4852_v21  ;;  %v4694_v31 = vld [vmem:[#allocation5 + $0x80] sm:$0xf0] }
  0xea   :  { %v4789_v36 = vor.u32 %v6066_v33, %v4788_v32  ;;  %2011 = vmatpush.bf16.msra.mxu0 %v4817_v27  ;;  %v4793_v41 = vor.u32 %v6063_v34, %v4790_v37  ;;  %v4692_v27 = vld [vmem:[#allocation5 + $0x68] sm:$0xf]  ;;  %v4697_v32 = vor.u32 %v6039_v30, %v4694_v31  ;;  %v4828_v33 = vld [vmem:[#allocation5 + $0x180] sm:$0xf]  ;;  %v6077_v34 = vld [vmem:[#allocation5 + $0x194] sm:$0xf0] }
  0xeb   :  { %v4693_v29 = vor.u32 %v6042_v28, %v4692_v27  ;;  %v6074_v37 = vld [vmem:[#allocation5 + $0x184] sm:$0xf]  ;;  %v4909_v27 = vor.u32 %v6096_v25, %v4908_v24  ;;  %v4910_v28 = vld [vmem:[#allocation5 + $0x230] sm:$0xf0]  ;;  %v4884_v31 = vld [vmem:[#allocation5 + $0x1e8] sm:$0xf] }
  0xec   :  { %v4833_v40 = vor.u32 %v6074_v37, %v4830_v39  ;;  %v4934_v21 = vld [vmem:[#allocation5 + $0x260] sm:$0xf0] }
  0xed   :  { %1984 = vmatpush.bf16.msrb.mxu2 %v4789_v36  ;;  %1944 = vmatpush.bf16.msra.mxu3 %v4925_v49  ;;  %v4829_v36 = vor.u32 %v6077_v34, %v4828_v33  ;;  %v6120_v49 = vld [vmem:[#allocation5 + $0x2ec] sm:$0xf0] }
  0xee   :  { %v6735_v45 = vpop.f32.mrf.mxu2  ;;  %v1105_v48 = vpop.f32.mrf.mxu0  ;;  %2012 = vmatpush.bf16.msra.mxu0 %v4793_v41  ;;  %v4668_v41 = vld [vmem:[#allocation5 + $0x38] sm:$0xf] }
  0xef   :  { %v1118_v51 = vpop.f32.mrf.mxu1  ;;  %v4766_v48 = vld [vmem:[#allocation5 + $0x110] sm:$0xf0] }
  0xf0   :  { %v6737_v50 = vpop.f32.mrf.mxu3  ;;  %v4929_v51 = vor.u32 %v6098_v42, %v4926_v43  ;;  %v4769_v53 = vor.u32 %v6057_v47, %v4766_v48  ;;  %v6036_v42 = vld [vmem:[#allocation5 + $0x4c] sm:$0xf0]  ;;  %v6033_v43 = vld [vmem:[#allocation5 + $0x3c] sm:$0xf]  ;;  %v4670_v47 = vld [vmem:[#allocation5 + $0x50] sm:$0xf0] }
  0xf1   :  { %1985 = vmatpush.bf16.msrb.mxu2 %v4765_v52  ;;  %1945 = vmatpush.bf16.msra.mxu3 %v4901_v58  ;;  %v4669_v46 = vor.u32 %v6036_v42, %v4668_v41  ;;  %v5004_v48 = vld [vmem:[#allocation5 + $0x2d8] sm:$0xf]  ;;  %v6030_v58 = vld [vmem:[#allocation5 + $0x1c] sm:$0xf0]  ;;  %v1143_v4 = vadd.f32 %v6737_v50, %v6735_v45  ;;  %v1278_v41 = vrot.slane %v6731_v19, 6  ;;  %v1283_v42 = vsel %vm1282_vm2, %v6731_v19, 0.0 }
  0xf2   :  { %1972 = vmatpush.bf16.msrb.mxu1 %v4929_v51  ;;  %2013 = vmatpush.bf16.msra.mxu0 %v4769_v53  ;;  %v4673_v51 = vor.u32 %v6033_v43, %v4670_v47  ;;  %v5005_v52 = vor.u32 %v6120_v49, %v5004_v48  ;;  %v6117_v53 = vld [vmem:[#allocation5 + $0x2dc] sm:$0xf]  ;;  %v6758_v43 = vld [vmem:[%s7025_s2] sm:$0x3]  ;;  %v4860_v48 = vld [vmem:[#allocation5 + $0x1b8] sm:$0xf] }
  0xf3   :  { %v5009_v57 = vor.u32 %v6117_v53, %v5006_v55  ;;  %v6084_v49 = vld [vmem:[#allocation5 + $0x1cc] sm:$0xf0] }
  0xf4   :  { %v4861_v19 = vor.u32 %v6084_v49, %v4860_v48  ;;  %v1279_v48 = vrot.slane %v6733_v38, 6 }
  0xf5   :  { %1946 = vmatpush.bf16.msra.mxu3 %v4877_v6  ;;  %v4985_v6 = vor.u32 %v6111_v1, %v4982_v3  ;;  %v6078_v3 = vld [vmem:[#allocation5 + $0x19c] sm:$0xf0] }
  0xf6   :  { %v1131_v60 = vpop.f32.mrf.mxu2  ;;  %1973 = vmatpush.bf16.msrb.mxu1 %v4905_v62  ;;  %2014 = vmatpush.bf16.msra.mxu0 %v4745_v2 }
  0xf7   :  { %v4740_v60 = vld [vmem:[#allocation5 + $0xc8] sm:$0xf] }
  0xf8   :  { %v1144_v10 = vpop.f32.mrf.mxu3  ;;  %v4741_v63 = vor.u32 %v6054_v61, %v4740_v60  ;;  %v4646_v60 = vld [vmem:[#allocation5 + $0x20] sm:$0xf0]  ;;  %v4645_v61 = vor.u32 %v6030_v58, %v4644_v56 }
  0xf9   :  { %v4716_v10 = vld [vmem:[#allocation5 + $0x98] sm:$0xf]  ;;  %1947 = vmatpush.bf16.msra.mxu3 %v4853_v23  ;;  %v4649_v62 = vor.u32 %v6027_v59, %v4646_v60  ;;  %v1336_v59 = vperm.slane %v6758_v43, 0 }
  0xfa   :  { %1986 = vmatpush.bf16.msrb.mxu2 %v4741_v63  ;;  %v4717_v14 = vor.u32 %v6048_v11, %v4716_v10  ;;  %1974 = vmatpush.bf16.msrb.mxu1 %v4881_v9  ;;  %v4980_v63 = vld [vmem:[#allocation5 + $0x2a8] sm:$0xf]  ;;  %v6105_v9 = vld [vmem:[#allocation5 + $0x27c] sm:$0xf]  ;;  %v4958_v10 = vld [vmem:[#allocation5 + $0x290] sm:$0xf0]  ;;  %v4957_v11 = vor.u32 %v6108_v8, %v4956_v7 }
  0xfb   :  { %2015 = vmatpush.bf16.msra.mxu0 %v4721_v16  ;;  %v4981_v2 = vor.u32 %v6114_v0, %v4980_v63  ;;  %v4933_v16 = vor.u32 %v6102_v18, %v4932_v17  ;;  %v6075_v7 = vld [vmem:[#allocation5 + $0x18c] sm:$0xf]  ;;  %v4838_v8 = vld [vmem:[#allocation5 + $0x1a0] sm:$0xf0]  ;;  %v4820_v17 = vld [vmem:[#allocation5 + $0x160] sm:$0xf] }
  0xfd   :  { %1948 = vmatpush.bf16.msra.mxu3 %v4829_v36  ;;  %v4886_v36 = vld [vmem:[#allocation5 + $0x200] sm:$0xf0] }
  0xfe   :  { %1987 = vmatpush.bf16.msrb.mxu2 %v4717_v14  ;;  %1975 = vmatpush.bf16.msrb.mxu1 %v4857_v26  ;;  %v6093_v26 = vld [vmem:[#allocation5 + $0x21c] sm:$0xf] }
  0xff   :  { %2016 = vmatpush.bf16.msra.mxu0 %v4697_v32  ;;  %v6090_v32 = vld [vmem:[#allocation5 + $0x1fc] sm:$0xf0] }
 0x100   :  { %v4885_v34 = vor.u32 %v6090_v32, %v4884_v31  ;;  %v4772_v31 = vld [vmem:[#allocation5 + $0x100] sm:$0xf]  ;;  %v6061_v32 = vld [vmem:[#allocation5 + $0x114] sm:$0xf0] }
 0x101   :  { %1997 = vmatpush.bf16.msrb.mxu3 %v5005_v52 }
 0x102   :  { %1988 = vmatpush.bf16.msrb.mxu2 %v4693_v29  ;;  %1976 = vmatpush.bf16.msrb.mxu1 %v4833_v40 }
 0x103   :  { %2017 = vmatpush.bf16.msra.mxu0 %v4673_v51  ;;  %v6081_v51 = vld [vmem:[#allocation5 + $0x1bc] sm:$0xf] }
 0x105   :  { %1998 = vmatpush.bf16.msrb.mxu3 %v4981_v2  ;;  %v4836_v2 = vld [vmem:[#allocation5 + $0x188] sm:$0xf] }
 0x106   :  { %v6739_v54 = vpop.f32.mrf.mxu0  ;;  %1989 = vmatpush.bf16.msrb.mxu2 %v4669_v46  ;;  %2025 = vmatpush.bf16.msra.mxu1 %v5009_v57  ;;  %v4862_v57 = vld [vmem:[#allocation5 + $0x1d0] sm:$0xf0] }
 0x107   :  { %v6741_v15 = vpop.f32.mrf.mxu1  ;;  %2018 = vmatpush.bf16.msra.mxu0 %v4649_v62  ;;  %v1156_v14 = vadd.f32 %v6739_v54, %v1143_v4  ;;  %v4913_v54 = vor.u32 %v6093_v26, %v4910_v28  ;;  %v4865_v60 = vor.u32 %v6081_v51, %v4862_v57  ;;  %v4796_v26 = vld [vmem:[#allocation5 + $0x130] sm:$0xf]  ;;  %v6067_v28 = vld [vmem:[#allocation5 + $0x144] sm:$0xf0]  ;;  %v6046_v57 = vld [vmem:[#allocation5 + $0xa4] sm:$0xf] }
 0x109   :  { %1999 = vmatpush.bf16.msrb.mxu3 %v4957_v11  ;;  %v1290_v50 = vrot.slane %v1156_v14, 7  ;;  %v1294_v33 = vrot.slane %v1156_v14, 5 }
 0x10a   :  { %1990 = vmatpush.bf16.msrb.mxu2 %v4645_v61  ;;  %2026 = vmatpush.bf16.msra.mxu1 %v4985_v6  ;;  %v1286_v61 = vsel %vm1285_vm3, %v1283_v42, %v1278_v41  ;;  %v4837_v6 = vor.u32 %v6078_v3, %v4836_v2  ;;  %v4750_v41 = vld [vmem:[#allocation5 + $0xe8] sm:$0xf0]  ;;  %v4700_v2 = vld [vmem:[#allocation5 + $0x70] sm:$0xf]  ;;  %v6043_v3 = vld [vmem:[#allocation5 + $0x84] sm:$0xf0] }
 0x10b   :  { %v1299_v29 = vsel %vm1298_vm0, 0.0, %v1290_v50  ;;  %v1307_v58 = vsel %vm1298_vm0, %v1294_v33, 0.0 }
 0x10c   :  { %v1302_v37 = vsel %vm1301_vm1, %v1299_v29, 0.0  ;;  %v4797_v29 = vor.u32 %v6067_v28, %v4796_v26  ;;  %v5014_v26 = vld [vmem:[#allocation5 + $0x2f8] sm:$0xf0] }
 0x10d   :  { %2000 = vmatpush.bf16.msrb.mxu3 %v4933_v16  ;;  %v1305_v52 = vsel %vm1304_vm4, %v1302_v37, %v1294_v33  ;;  %v6070_v16 = vld [vmem:[#allocation5 + $0x164] sm:$0xf]  ;;  %v4774_v33 = vld [vmem:[#allocation5 + $0x118] sm:$0xf0]  ;;  %v4748_v37 = vld [vmem:[#allocation5 + $0xd0] sm:$0xf] }
 0x10e   :  { %v6743_v5 = vpop.f32.mrf.mxu2  ;;  %v1157_v13 = vpop.f32.mrf.mxu0  ;;  %v1309_v0 = vadd.f32 %v1305_v52, %v1286_v61 }
 0x10f   :  { %v1170_v20 = vpop.f32.mrf.mxu1  ;;  %v4961_v13 = vor.u32 %v6105_v9, %v4958_v10  ;;  %v1182_v14 = vadd.f32 %v6743_v5, %v6741_v15  ;;  %v4798_v15 = vld [vmem:[#allocation5 + $0x148] sm:$0xf0] }
 0x110   :  { %v6745_v12 = vpop.f32.mrf.mxu3  ;;  %v6099_v20 = vld [vmem:[#allocation5 + $0x24c] sm:$0xf] }
 0x111   :  { %2027 = vmatpush.bf16.msra.mxu1 %v4961_v13  ;;  %v4937_v45 = vor.u32 %v6099_v20, %v4934_v21  ;;  %2001 = vmatpush.bf16.msrb.mxu3 %v4909_v27  ;;  %v4841_v13 = vor.u32 %v6075_v7, %v4838_v8  ;;  %v6073_v20 = vld [vmem:[#allocation5 + $0x174] sm:$0xf0]  ;;  %v4822_v21 = vld [vmem:[#allocation5 + $0x178] sm:$0xf0]  ;;  %v4702_v8 = vld [vmem:[#allocation5 + $0x88] sm:$0xf0] }
 0x112   :  { %v4821_v24 = vor.u32 %v6073_v20, %v4820_v17  ;;  %v4825_v25 = vor.u32 %v6070_v16, %v4822_v21  ;;  %v4676_v16 = vld [vmem:[#allocation5 + $0x40] sm:$0xf]  ;;  %v6037_v21 = vld [vmem:[#allocation5 + $0x54] sm:$0xf0] }
 0x115   :  { %2028 = vmatpush.bf16.msra.mxu1 %v4937_v45  ;;  %2002 = vmatpush.bf16.msrb.mxu3 %v4885_v34 }
 0x116   :  { %v1183_v35 = vpop.f32.mrf.mxu2 }
 0x117   :  { %v6087_v35 = vld [vmem:[#allocation5 + $0x1ec] sm:$0xf] }
 0x118   :  { %v1196_v44 = vpop.f32.mrf.mxu3  ;;  %v4889_v40 = vor.u32 %v6087_v35, %v4886_v36  ;;  %v4773_v35 = vor.u32 %v6061_v32, %v4772_v31 }
 0x119   :  { %2029 = vmatpush.bf16.msra.mxu1 %v4913_v54  ;;  %2003 = vmatpush.bf16.msrb.mxu3 %v4861_v19  ;;  %v6064_v54 = vld [vmem:[#allocation5 + $0x134] sm:$0xf]  ;;  %v6049_v19 = vld [vmem:[#allocation5 + $0xb4] sm:$0xf0] }
 0x11d   :  { %2030 = vmatpush.bf16.msra.mxu1 %v4889_v40  ;;  %2004 = vmatpush.bf16.msrb.mxu3 %v4837_v6  ;;  %v6052_v40 = vld [vmem:[#allocation5 + $0xd4] sm:$0xf] }
 0x11e   :  { %v4753_v52 = vor.u32 %v6052_v40, %v4750_v41 }
 0x121   :  { %2031 = vmatpush.bf16.msra.mxu1 %v4865_v60 }
 0x125   :  { %2032 = vmatpush.bf16.msra.mxu1 %v4841_v13 }
 0x126   :  { %v1207_v22 = vpop.f32.mrf.mxu0 }
 0x127   :  { %v1220_v23 = vpop.f32.mrf.mxu1 }
 0x128   :  { %v1221_v30 = vadd.f32 %v1220_v23, %v1207_v22  ;;  %v1195_v23 = vadd.f32 %v6745_v12, %v1182_v14  ;;  %v6058_v12 = vld [vmem:[#allocation5 + $0x104] sm:$0xf]  ;;  %v4701_v14 = vor.u32 %v6043_v3, %v4700_v2  ;;  %v6091_v2 = vld [vmem:[#allocation5 + $0x204] sm:$0xf0]  ;;  %v6088_v3 = vld [vmem:[#allocation5 + $0x1f4] sm:$0xf] }
 0x129   :  { %v4777_v36 = vor.u32 %v6058_v12, %v4774_v33  ;;  %v6028_v33 = vld [vmem:[#allocation5 + $0x14] sm:$0xf] }
 0x12a   :  { %v1291_v5 = vrot.slane %v1195_v23, 7 }
 0x12c   :  { %v1300_v34 = vsel %vm1298_vm0, 0.0, %v1291_v5 }
 0x12d   :  { %v1303_v49 = vsel %vm1301_vm1, %v1300_v34, 0.0  ;;  %v4654_v34 = vld [vmem:[#allocation5 + $0x28] sm:$0xf0] }
 0x12e   :  { %v1233_v39 = vpop.f32.mrf.mxu2  ;;  %v1209_v46 = vpop.f32.mrf.mxu0  ;;  %v4657_v41 = vor.u32 %v6028_v33, %v4654_v34  ;;  %v6167_v33 = vld [vmem:[#allocation7 + $0x16c] sm:$0xf]  ;;  %v5202_v34 = vld [vmem:[#allocation7 + $0x174] sm:$0xf0] }
 0x12f   :  { %v1234_v44 = vadd.f32 %v1233_v39, %v1221_v30  ;;  %v1222_v47 = vpop.f32.mrf.mxu1  ;;  %v6761_v56 = vpop.f32.mrf.mxu3  ;;  %v4801_v30 = vor.u32 %v6064_v54, %v4798_v15  ;;  %v6055_v39 = vld [vmem:[#allocation5 + $0xe4] sm:$0xf0]  ;;  %v1295_v46 = vrot.slane %v1195_v23, 5  ;;  %v5012_v23 = vld [vmem:[#allocation5 + $0x2e0] sm:$0xf]  ;;  %v4677_v15 = vor.u32 %v6037_v21, %v4676_v16 }
 0x130   :  { %v4749_v51 = vor.u32 %v6055_v39, %v4748_v37  ;;  %v6112_v37 = vld [vmem:[#allocation5 + $0x2b4] sm:$0xf]  ;;  %v4990_v39 = vld [vmem:[#allocation5 + $0x2c8] sm:$0xf0]  ;;  %v5200_v16 = vld [vmem:[#allocation7 + $0x168] sm:$0xf] }
 0x131   :  { %v1315_v53 = vrot.slane %v1234_v44, 6  ;;  %v1319_v55 = vrot.slane %v1234_v44, 4  ;;  %v1306_v60 = vsel %vm1304_vm4, %v1303_v49, %v1295_v46  ;;  %v4966_v49 = vld [vmem:[#allocation5 + $0x298] sm:$0xf0]  ;;  %v6168_v21 = vld [vmem:[#allocation7 + $0x170] sm:$0xf0] }
 0x133   :  { %v1324_v62 = vsel %vm1323_vm5, 0.0, %v1315_v53  ;;  %v1333_v63 = vadd.f32 %v1319_v55, %v1307_v58  ;;  %v4724_v53 = vld [vmem:[#allocation5 + $0xa0] sm:$0xf]  ;;  %v4726_v58 = vld [vmem:[#allocation5 + $0xb8] sm:$0xf0] }
 0x134   :  { %v1326_v1 = vsel %vm1285_vm3, %v1324_v62, 0.0  ;;  %v1308_v62 = vsel %vm1298_vm0, %v1295_v46, 0.0  ;;  %v4964_v46 = vld [vmem:[#allocation5 + $0x280] sm:$0xf] }
 0x135   :  { %v1329_v4 = vsel %vm1328_vm6, %v1326_v1, %v1319_v55  ;;  %v1342_v10 = vadd.f32 %v1336_v59, %v1333_v63  ;;  %v1337_v63 = vperm.slane %v6758_v43, 1  ;;  %v4729_v1 = vor.u32 %v6046_v57, %v4726_v58  ;;  %v4942_v57 = vld [vmem:[#allocation5 + $0x268] sm:$0xf0] }
 0x136   :  { %v1331_v9 = vadd.f32 %v1329_v4, %v1309_v0  ;;  %v1235_v11 = vpop.f32.mrf.mxu2  ;;  %v4725_v0 = vor.u32 %v6049_v19, %v4724_v53  ;;  %v4940_v53 = vld [vmem:[#allocation5 + $0x250] sm:$0xf]  ;;  %v6100_v19 = vld [vmem:[#allocation5 + $0x254] sm:$0xf] }
 0x137   :  { %v1248_v45 = vpop.f32.mrf.mxu3  ;;  %v1346_v22 = vmax.f32 %v1342_v10, 0.0 }
 0x138   :  { %v1340_v18 = vadd.f32 %v1336_v59, %v1331_v9  ;;  %v1284_v59 = vsel %vm1282_vm2, %v6733_v38, 0.0  ;;  %v6040_v38 = vld [vmem:[#allocation5 + $0x74] sm:$0xf] }
 0x139   :  { %v1287_v4 = vsel %vm1285_vm3, %v1284_v59, %v1279_v48  ;;  %v4705_v20 = vor.u32 %v6040_v38, %v4702_v8  ;;  %v6106_v48 = vld [vmem:[#allocation5 + $0x284] sm:$0xf]  ;;  %v4945_v59 = vor.u32 %v6100_v19, %v4942_v57  ;;  %v6085_v38 = vld [vmem:[#allocation5 + $0x1d4] sm:$0xf0] }
 0x13a   :  { %v1344_v50 = vmax.f32 %v1340_v18, 0.0  ;;  %v1310_v9 = vadd.f32 %v1306_v60, %v1287_v4  ;;  %v4916_v60 = vld [vmem:[#allocation5 + $0x220] sm:$0xf]  ;;  %v4894_v4 = vld [vmem:[#allocation5 + $0x208] sm:$0xf0] }
 0x13b   :  { %v6082_v8 = vld [vmem:[#allocation5 + $0x1c4] sm:$0xf] }
 0x13c   :  { %v6772_v27 = vpack.c.bf16 %v1346_v22, %v1344_v50  ;;  %v6034_v50 = vld [vmem:[#allocation5 + $0x44] sm:$0xf]  ;;  %v4678_v22 = vld [vmem:[#allocation5 + $0x58] sm:$0xf0] }
 0x13d   :  { %v4681_v5 = vor.u32 %v6034_v50, %v4678_v22  ;;  %v5188_v50 = vld [vmem:[#allocation7 + $0x150] sm:$0xf]  ;;  %v6165_v22 = vld [vmem:[#allocation7 + $0x158] sm:$0xf0] }
 0x13e   :  { %1935 = vmatmul.bf16.vlgmr.msra.gmra.mxu2 %v6772_v27  ;;  %1963 = vmatmul.bf16.vlgmr.msrb.gmra.mxu0 %v6772_v27 }
 0x13f   :  { %2039 = vmatpush.bf16.msra.mxu2 %v4821_v24  ;;  %2067 = vmatpush.bf16.msrb.mxu0 %v4825_v25  ;;  %v6121_v24 = vld [vmem:[#allocation5 + $0x2f4] sm:$0xf0]  ;;  %v6118_v25 = vld [vmem:[#allocation5 + $0x2e4] sm:$0xf] }
 0x140   :  { %v5013_v32 = vor.u32 %v6121_v24, %v5012_v23  ;;  %v5017_v12 = vor.u32 %v6118_v25, %v5014_v26  ;;  %v5189_v23 = vor.u32 %v6165_v22, %v5188_v50  ;;  %v5104_v24 = vld [vmem:[#allocation7 + $0xa8] sm:$0xf]  ;;  %v6144_v25 = vld [vmem:[#allocation7 + $0xb0] sm:$0xf0]  ;;  %v6155_v22 = vld [vmem:[#allocation7 + $0x10c] sm:$0xf] }
 0x141   :  { %v5105_v26 = vor.u32 %v6144_v25, %v5104_v24  ;;  %v5208_v24 = vld [vmem:[#allocation7 + $0x170] sm:$0xf] }
 0x143   :  { %2040 = vmatpush.bf16.msra.mxu2 %v4797_v29  ;;  %2068 = vmatpush.bf16.msrb.mxu0 %v4801_v30  ;;  %v4652_v29 = vld [vmem:[#allocation5 + $0x10] sm:$0xf]  ;;  %v6031_v30 = vld [vmem:[#allocation5 + $0x24] sm:$0xf0] }
 0x144   :  { %v4653_v40 = vor.u32 %v6031_v30, %v4652_v29  ;;  %v6141_v29 = vld [vmem:[#allocation7 + $0x98] sm:$0xf0] }
 0x146   :  { %v1259_v42 = vpop.f32.mrf.mxu0 }
 0x147   :  { %v1272_v44 = vpop.f32.mrf.mxu1  ;;  %v1260_v47 = vadd.f32 %v1259_v42, %v6761_v56  ;;  %2041 = vmatpush.bf16.msra.mxu2 %v4773_v35  ;;  %2069 = vmatpush.bf16.msrb.mxu0 %v4777_v36  ;;  %v4988_v35 = vld [vmem:[#allocation5 + $0x2b0] sm:$0xf]  ;;  %v6115_v36 = vld [vmem:[#allocation5 + $0x2c4] sm:$0xf0] }
 0x148   :  { %v4989_v42 = vor.u32 %v6115_v36, %v4988_v35  ;;  %v5205_v36 = vor.u32 %v6167_v33, %v5202_v34  ;;  %v6152_v33 = vld [vmem:[#allocation7 + $0xf4] sm:$0xf]  ;;  %v5142_v34 = vld [vmem:[#allocation7 + $0xfc] sm:$0xf0] }
 0x149   :  { %v1273_v55 = vadd.f32 %v1272_v44, %v1260_v47  ;;  %v4993_v44 = vor.u32 %v6112_v37, %v4990_v39  ;;  %v6109_v47 = vld [vmem:[#allocation5 + $0x294] sm:$0xf0]  ;;  %v6138_v39 = vld [vmem:[#allocation7 + $0x80] sm:$0xf0] }
 0x14a   :  { %v5080_v37 = vld [vmem:[#allocation7 + $0x78] sm:$0xf] }
 0x14b   :  { %v1316_v61 = vrot.slane %v1273_v55, 6  ;;  %v1320_v56 = vrot.slane %v1273_v55, 4  ;;  %2042 = vmatpush.bf16.msra.mxu2 %v4749_v51  ;;  %2070 = vmatpush.bf16.msrb.mxu0 %v4753_v52  ;;  %v4965_v51 = vor.u32 %v6109_v47, %v4964_v46  ;;  %v4969_v52 = vor.u32 %v6106_v48, %v4966_v49  ;;  %v6103_v55 = vld [vmem:[#allocation5 + $0x264] sm:$0xf0]  ;;  %v6164_v46 = vld [vmem:[#allocation7 + $0x154] sm:$0xf] }
 0x14c   :  { %v4941_v58 = vor.u32 %v6103_v55, %v4940_v53  ;;  %v5190_v47 = vld [vmem:[#allocation7 + $0x15c] sm:$0xf0]  ;;  %v6143_v53 = vld [vmem:[#allocation7 + $0xac] sm:$0xf]  ;;  %v5106_v55 = vld [vmem:[#allocation7 + $0xb4] sm:$0xf0] }
 0x14d   :  { %v1325_v6 = vsel %vm1323_vm5, 0.0, %v1316_v61  ;;  %v1334_v7 = vadd.f32 %v1320_v56, %v1308_v62  ;;  %v6097_v61 = vld [vmem:[#allocation5 + $0x234] sm:$0xf0]  ;;  %v4918_v62 = vld [vmem:[#allocation5 + $0x238] sm:$0xf0]  ;;  %v5193_v48 = vor.u32 %v6164_v46, %v5190_v47  ;;  %v5109_v57 = vor.u32 %v6143_v53, %v5106_v55 }
 0x14e   :  { %v1327_v10 = vsel %vm1285_vm3, %v1325_v6, 0.0  ;;  %v1261_v11 = vpop.f32.mrf.mxu0  ;;  %1991 = vmatmul.bf16.vlgmr.msrb.gmra.mxu2 %v6772_v27  ;;  %2019 = vmatmul.bf16.vlgmr.msra.gmra.mxu0 %v6772_v27  ;;  %v4897_v6 = vor.u32 %v6088_v3, %v4894_v4  ;;  %v5068_v49 = vld [vmem:[#allocation7 + $0x60] sm:$0xf]  ;;  %v6140_v3 = vld [vmem:[#allocation7 + $0x94] sm:$0xf] }
 0x14f   :  { %v1274_v13 = vpop.f32.mrf.mxu1  ;;  %v1330_v43 = vsel %vm1328_vm6, %v1327_v10, %v1320_v56  ;;  %v1343_v18 = vadd.f32 %v1337_v63, %v1334_v7  ;;  %2043 = vmatpush.bf16.msra.mxu2 %v4725_v0  ;;  %2071 = vmatpush.bf16.msrb.mxu0 %v4729_v1  ;;  %v6094_v56 = vld [vmem:[#allocation5 + $0x224] sm:$0xf]  ;;  %v4892_v1 = vld [vmem:[#allocation5 + $0x1f0] sm:$0xf]  ;;  %v4868_v7 = vld [vmem:[#allocation5 + $0x1c0] sm:$0xf] }
 0x150   :  { %v1332_v17 = vadd.f32 %v1330_v43, %v1310_v9  ;;  %v4921_v0 = vor.u32 %v6094_v56, %v4918_v62  ;;  %v4870_v9 = vld [vmem:[#allocation5 + $0x1d8] sm:$0xf0]  ;;  %v4869_v10 = vor.u32 %v6085_v38, %v4868_v7  ;;  %v4844_v13 = vld [vmem:[#allocation5 + $0x190] sm:$0xf]  ;;  %v6079_v43 = vld [vmem:[#allocation5 + $0x1a4] sm:$0xf0] }
 0x151   :  { %v1347_v54 = vmax.f32 %v1343_v18, 0.0  ;;  %v4873_v11 = vor.u32 %v6082_v8, %v4870_v9  ;;  %v4845_v18 = vor.u32 %v6079_v43, %v4844_v13  ;;  %v5178_v56 = vld [vmem:[#allocation7 + $0x144] sm:$0xf0]  ;;  %v5094_v4 = vld [vmem:[#allocation7 + $0x9c] sm:$0xf0] }
 0x152   :  { %v1341_v45 = vadd.f32 %v1337_v63, %v1332_v17  ;;  %v4917_v63 = vor.u32 %v6097_v61, %v4916_v60  ;;  %v4846_v17 = vld [vmem:[#allocation5 + $0x1a8] sm:$0xf0]  ;;  %v6161_v61 = vld [vmem:[#allocation7 + $0x13c] sm:$0xf]  ;;  %v5128_v7 = vld [vmem:[#allocation7 + $0xd8] sm:$0xf] }
 0x153   :  { %2044 = vmatpush.bf16.msra.mxu2 %v4701_v14  ;;  %2072 = vmatpush.bf16.msrb.mxu0 %v4705_v20  ;;  %v6076_v14 = vld [vmem:[#allocation5 + $0x194] sm:$0xf]  ;;  %v5181_v62 = vor.u32 %v6161_v61, %v5178_v56  ;;  %v6150_v38 = vld [vmem:[#allocation7 + $0xe0] sm:$0xf0]  ;;  %v5044_v13 = vld [vmem:[#allocation7 + $0x30] sm:$0xf] }
 0x154   :  { %v1345_v28 = vmax.f32 %v1341_v45, 0.0  ;;  %v4849_v20 = vor.u32 %v6076_v14, %v4846_v17  ;;  %v5201_v45 = vor.u32 %v6168_v21, %v5200_v16  ;;  %v5129_v8 = vor.u32 %v6150_v38, %v5128_v7  ;;  %v6158_v9 = vld [vmem:[#allocation7 + $0x124] sm:$0xf]  ;;  %v6129_v43 = vld [vmem:[#allocation7 + $0x38] sm:$0xf0] }
 0x155   :  { %v5045_v14 = vor.u32 %v6129_v43, %v5044_v13  ;;  %v6137_v17 = vld [vmem:[#allocation7 + $0x7c] sm:$0xf]  ;;  %v5116_v16 = vld [vmem:[#allocation7 + $0xc0] sm:$0xf]  ;;  %v6147_v21 = vld [vmem:[#allocation7 + $0xc8] sm:$0xf0] }
 0x156   :  { %v6791_v31 = vpack.c.bf16 %v1347_v54, %v1345_v28  ;;  %v5176_v28 = vld [vmem:[#allocation7 + $0x138] sm:$0xf]  ;;  %v6162_v54 = vld [vmem:[#allocation7 + $0x140] sm:$0xf0]  ;;  %v5117_v50 = vor.u32 %v6147_v21, %v5116_v16  ;;  %v6131_v46 = vld [vmem:[#allocation7 + $0x4c] sm:$0xf] }
 0x157   :  { %2045 = vmatpush.bf16.msra.mxu2 %v4677_v15  ;;  %2073 = vmatpush.bf16.msrb.mxu0 %v4681_v5  ;;  %v5177_v15 = vor.u32 %v6162_v54, %v5176_v28  ;;  %v5092_v5 = vld [vmem:[#allocation7 + $0x90] sm:$0xf]  ;;  %v6169_v28 = vld [vmem:[#allocation7 + $0x178] sm:$0xf0]  ;;  %v5032_v54 = vld [vmem:[#allocation7 + $0x18] sm:$0xf] }
 0x158   :  { %1949 = vmatmul.bf16.vlgmr.msra.gmra.mxu3 %v6791_v31  ;;  %1977 = vmatmul.bf16.vlgmr.msrb.gmra.mxu1 %v6791_v31  ;;  %v5093_v30 = vor.u32 %v6141_v29, %v5092_v5  ;;  %v5209_v29 = vor.u32 %v6169_v28, %v5208_v24  ;;  %v5058_v47 = vld [vmem:[#allocation7 + $0x54] sm:$0xf0]  ;;  %v6163_v61 = vld [vmem:[#allocation7 + $0x148] sm:$0xf0]  ;;  %v6146_v38 = vld [vmem:[#allocation7 + $0xc4] sm:$0xf] }
 0x159   :  { %2053 = vmatpush.bf16.msra.mxu3 %v5013_v32  ;;  %2081 = vmatpush.bf16.msrb.mxu1 %v5017_v12  ;;  %v6159_v32 = vld [vmem:[#allocation7 + $0x128] sm:$0xf0]  ;;  %v6125_v43 = vld [vmem:[#allocation7 + $0x1c] sm:$0xf]  ;;  %v6122_v28 = vld [vmem:[#allocation7 + $0x4] sm:$0xf] }
 0x15a   :  { %v6139_v16 = vld [vmem:[#allocation7 + $0x88] sm:$0xf0] }
 0x15b   :  { %2046 = vmatpush.bf16.msra.mxu2 %v4653_v40  ;;  %2074 = vmatpush.bf16.msrb.mxu0 %v4657_v41  ;;  %v5081_v40 = vor.u32 %v6138_v39, %v5080_v37  ;;  %v5152_v41 = vld [vmem:[#allocation7 + $0x108] sm:$0xf]  ;;  %v5145_v39 = vor.u32 %v6152_v33, %v5142_v34  ;;  %v6154_v33 = vld [vmem:[#allocation7 + $0x100] sm:$0xf0] }
 0x15d   :  { %2054 = vmatpush.bf16.msra.mxu3 %v4989_v42  ;;  %2082 = vmatpush.bf16.msrb.mxu1 %v4993_v44  ;;  %v6156_v42 = vld [vmem:[#allocation7 + $0x110] sm:$0xf0] }
 0x15e   :  { %2047 = vmatmul.bf16.vlgmr.msra.gmra.mxu2 %v6772_v27  ;;  %2075 = vmatmul.bf16.vlgmr.msrb.gmra.mxu0 %v6772_v27  ;;  %v4893_v27 = vor.u32 %v6091_v2, %v4892_v1  ;;  %v5153_v44 = vor.u32 %v6156_v42, %v5152_v41  ;;  %v5020_v41 = vld [vmem:[#allocation7] sm:$0xf] }
 0x15f   :  { %2503 = vmatpush.bf16.msrb.mxu2 %v5105_v26  ;;  %2531 = vmatpush.bf16.msra.mxu0 %v5109_v57  ;;  %v6149_v57 = vld [vmem:[#allocation7 + $0xdc] sm:$0xf] }
 0x161   :  { %2055 = vmatpush.bf16.msra.mxu3 %v4965_v51  ;;  %2083 = vmatpush.bf16.msrb.mxu1 %v4969_v52  ;;  %v6135_v51 = vld [vmem:[#allocation7 + $0x68] sm:$0xf0] }
 0x162   :  { %v5069_v52 = vor.u32 %v6135_v51, %v5068_v49  ;;  %v5061_v49 = vor.u32 %v6131_v46, %v5058_v47  ;;  %v5112_v51 = vld [vmem:[#allocation7 + $0xb0] sm:$0xf]  ;;  %v5136_v46 = vld [vmem:[#allocation7 + $0xe0] sm:$0xf]  ;;  %v6151_v47 = vld [vmem:[#allocation7 + $0xe8] sm:$0xf0] }
 0x163   :  { %2504 = vmatpush.bf16.msrb.mxu2 %v5093_v30 }
 0x165   :  { %2056 = vmatpush.bf16.msra.mxu3 %v4941_v58  ;;  %2084 = vmatpush.bf16.msrb.mxu1 %v4945_v59  ;;  %v5140_v58 = vld [vmem:[#allocation7 + $0xf0] sm:$0xf]  ;;  %v6153_v59 = vld [vmem:[#allocation7 + $0xf8] sm:$0xf0] }
 0x166   :  { %v5141_v60 = vor.u32 %v6153_v59, %v5140_v58  ;;  %v5130_v58 = vld [vmem:[#allocation7 + $0xe4] sm:$0xf0] }
 0x167   :  { %2505 = vmatpush.bf16.msrb.mxu2 %v5081_v40  ;;  %v6166_v40 = vld [vmem:[#allocation7 + $0x160] sm:$0xf0]  ;;  %v5133_v59 = vor.u32 %v6149_v57, %v5130_v58 }
 0x168   :  { %2005 = vmatmul.bf16.vlgmr.msrb.gmra.mxu3 %v6791_v31  ;;  %2033 = vmatmul.bf16.vlgmr.msra.gmra.mxu1 %v6791_v31 }
 0x169   :  { %2057 = vmatpush.bf16.msra.mxu3 %v4917_v63  ;;  %2085 = vmatpush.bf16.msrb.mxu1 %v4921_v0  ;;  %v5056_v63 = vld [vmem:[#allocation7 + $0x48] sm:$0xf]  ;;  %v6132_v0 = vld [vmem:[#allocation7 + $0x50] sm:$0xf0] }
 0x16a   :  { %v5057_v2 = vor.u32 %v6132_v0, %v5056_v63  ;;  %v6128_v63 = vld [vmem:[#allocation7 + $0x34] sm:$0xf]  ;;  %v5046_v0 = vld [vmem:[#allocation7 + $0x3c] sm:$0xf0] }
 0x16b   :  { %2506 = vmatpush.bf16.msrb.mxu2 %v5069_v52  ;;  %v6145_v52 = vld [vmem:[#allocation7 + $0xb8] sm:$0xf0] }
 0x16c   :  { %v5113_v55 = vor.u32 %v6145_v52, %v5112_v51  ;;  %v5052_v51 = vld [vmem:[#allocation7 + $0x38] sm:$0xf]  ;;  %v6130_v52 = vld [vmem:[#allocation7 + $0x40] sm:$0xf0] }
 0x16d   :  { %2058 = vmatpush.bf16.msra.mxu3 %v4893_v27  ;;  %2086 = vmatpush.bf16.msrb.mxu1 %v4897_v6  ;;  %v5097_v6 = vor.u32 %v6140_v3, %v5094_v4  ;;  %v5049_v4 = vor.u32 %v6128_v63, %v5046_v0  ;;  %v6127_v63 = vld [vmem:[#allocation7 + $0x28] sm:$0xf0] }
 0x16f   :  { %2507 = vmatpush.bf16.msrb.mxu2 %v5057_v2  ;;  %2532 = vmatpush.bf16.msra.mxu0 %v5097_v6  ;;  %v5100_v2 = vld [vmem:[#allocation7 + $0x98] sm:$0xf]  ;;  %v6142_v6 = vld [vmem:[#allocation7 + $0xa0] sm:$0xf0] }
 0x170   :  { %v5101_v7 = vor.u32 %v6142_v6, %v5100_v2 }
 0x171   :  { %2059 = vmatpush.bf16.msra.mxu3 %v4869_v10  ;;  %2087 = vmatpush.bf16.msrb.mxu1 %v4873_v11  ;;  %v5166_v10 = vld [vmem:[#allocation7 + $0x12c] sm:$0xf0] }
 0x172   :  { %v5169_v11 = vor.u32 %v6158_v9, %v5166_v10  ;;  %v5172_v9 = vld [vmem:[#allocation7 + $0x128] sm:$0xf] }
 0x173   :  { %2508 = vmatpush.bf16.msrb.mxu2 %v5045_v14  ;;  %v5034_v14 = vld [vmem:[#allocation7 + $0x24] sm:$0xf0] }
 0x175   :  { %2060 = vmatpush.bf16.msra.mxu3 %v4845_v18  ;;  %2088 = vmatpush.bf16.msrb.mxu1 %v4849_v20  ;;  %v5082_v18 = vld [vmem:[#allocation7 + $0x84] sm:$0xf0] }
 0x176   :  { %v5085_v20 = vor.u32 %v6137_v17, %v5082_v18  ;;  %v5037_v18 = vor.u32 %v6125_v43, %v5034_v14  ;;  %v6839_v14 = vld [vmem:[%s7027_s4] sm:$0x3] }
 0x178   :  { %2061 = vmatmul.bf16.vlgmr.msra.gmra.mxu3 %v6791_v31  ;;  %2089 = vmatmul.bf16.vlgmr.msrb.gmra.mxu1 %v6791_v31  ;;  %v5164_v31 = vld [vmem:[#allocation7 + $0x120] sm:$0xf] }
 0x179   :  { %2517 = vmatpush.bf16.msrb.mxu3 %v5201_v45  ;;  %v5165_v12 = vor.u32 %v6159_v32, %v5164_v31  ;;  %2545 = vmatpush.bf16.msra.mxu1 %v5205_v36  ;;  %v6134_v31 = vld [vmem:[#allocation7 + $0x64] sm:$0xf]  ;;  %v5070_v32 = vld [vmem:[#allocation7 + $0x6c] sm:$0xf0]  ;;  %v5196_v36 = vld [vmem:[#allocation7 + $0x158] sm:$0xf] }
 0x17a   :  { %2533 = vmatpush.bf16.msra.mxu0 %v5085_v20  ;;  %v5197_v42 = vor.u32 %v6166_v40, %v5196_v36  ;;  %v5088_v20 = vld [vmem:[#allocation7 + $0x80] sm:$0xf]  ;;  %v6133_v40 = vld [vmem:[#allocation7 + $0x58] sm:$0xf0] }
 0x17d   :  { %2518 = vmatpush.bf16.msrb.mxu3 %v5189_v23  ;;  %2546 = vmatpush.bf16.msra.mxu1 %v5193_v48  ;;  %v5154_v23 = vld [vmem:[#allocation7 + $0x114] sm:$0xf0] }
 0x17e   :  { %v5157_v26 = vor.u32 %v6155_v22, %v5154_v23  ;;  %v5160_v22 = vld [vmem:[#allocation7 + $0x110] sm:$0xf]  ;;  %v6157_v23 = vld [vmem:[#allocation7 + $0x118] sm:$0xf0] }
 0x17f   :  { %v5161_v24 = vor.u32 %v6157_v23, %v5160_v22 }
 0x181   :  { %2519 = vmatpush.bf16.msrb.mxu3 %v5177_v15  ;;  %2547 = vmatpush.bf16.msra.mxu1 %v5181_v62  ;;  %v6126_v15 = vld [vmem:[#allocation7 + $0x20] sm:$0xf0] }
 0x182   :  { %v5033_v30 = vor.u32 %v6126_v15, %v5032_v54  ;;  %v5022_v54 = vld [vmem:[#allocation7 + $0xc] sm:$0xf0]  ;;  %v5076_v15 = vld [vmem:[#allocation7 + $0x68] sm:$0xf] }
 0x184   :  { %2509 = vmatpush.bf16.msrb.mxu2 %v5033_v30  ;;  %v6136_v30 = vld [vmem:[#allocation7 + $0x70] sm:$0xf0] }
 0x185   :  { %2520 = vmatpush.bf16.msrb.mxu3 %v5165_v12  ;;  %2548 = vmatpush.bf16.msra.mxu1 %v5169_v11  ;;  %v5073_v12 = vor.u32 %v6134_v31, %v5070_v32  ;;  %v6160_v11 = vld [vmem:[#allocation7 + $0x130] sm:$0xf0]  ;;  %v5148_v31 = vld [vmem:[#allocation7 + $0xf8] sm:$0xf] }
 0x186   :  { %v5173_v13 = vor.u32 %v6160_v11, %v5172_v9  ;;  %v5149_v36 = vor.u32 %v6154_v33, %v5148_v31  ;;  %v2169_v33 = vperm.slane %v6839_v14, 1 }
 0x187   :  { %2534 = vmatpush.bf16.msra.mxu0 %v5073_v12  ;;  %v5077_v12 = vor.u32 %v6136_v30, %v5076_v15 }
 0x189   :  { %2521 = vmatpush.bf16.msrb.mxu3 %v5153_v44  ;;  %2549 = vmatpush.bf16.msra.mxu1 %v5157_v26  ;;  %v6123_v44 = vld [vmem:[#allocation7 + $0x8] sm:$0xf0] }
 0x18a   :  { %v5021_v48 = vor.u32 %v6123_v44, %v5020_v41 }
 0x18b   :  { %2535 = vmatpush.bf16.msra.mxu0 %v5061_v49 }
 0x18c   :  { %2510 = vmatpush.bf16.msrb.mxu2 %v5021_v48 }
 0x18d   :  { %2522 = vmatpush.bf16.msrb.mxu3 %v5141_v60  ;;  %2550 = vmatpush.bf16.msra.mxu1 %v5145_v39  ;;  %v5184_v60 = vld [vmem:[#allocation7 + $0x140] sm:$0xf]  ;;  %v5064_v39 = vld [vmem:[#allocation7 + $0x50] sm:$0xf] }
 0x18e   :  { %v5185_v62 = vor.u32 %v6163_v61, %v5184_v60  ;;  %v5065_v41 = vor.u32 %v6133_v40, %v5064_v39  ;;  %v6148_v60 = vld [vmem:[#allocation7 + $0xd0] sm:$0xf0] }
 0x18f   :  { %2536 = vmatpush.bf16.msra.mxu0 %v5049_v4 }
 0x190   :  { %2559 = vmatpush.bf16.msra.mxu2 %v5113_v55  ;;  %v5124_v55 = vld [vmem:[#allocation7 + $0xc8] sm:$0xf] }
 0x191   :  { %2523 = vmatpush.bf16.msrb.mxu3 %v5129_v8  ;;  %2551 = vmatpush.bf16.msra.mxu1 %v5133_v59  ;;  %v5118_v8 = vld [vmem:[#allocation7 + $0xcc] sm:$0xf0]  ;;  %v5053_v59 = vor.u32 %v6130_v52, %v5052_v51  ;;  %v6185_v51 = vld [vmem:[#allocation8 + $0x74] sm:$0xf0] }
 0x192   :  { %v5121_v10 = vor.u32 %v6146_v38, %v5118_v8  ;;  %v5332_v52 = vld [vmem:[#allocation8 + $0xf0] sm:$0xf] }
 0x193   :  { %2537 = vmatpush.bf16.msra.mxu0 %v5037_v18 }
 0x194   :  { %2560 = vmatpush.bf16.msra.mxu2 %v5101_v7 }
 0x195   :  { %2524 = vmatpush.bf16.msrb.mxu3 %v5117_v50  ;;  %2552 = vmatpush.bf16.msra.mxu1 %v5121_v10  ;;  %v5089_v50 = vor.u32 %v6139_v16, %v5088_v20  ;;  %v5028_v16 = vld [vmem:[#allocation7 + $0x8] sm:$0xf] }
 0x198   :  { %2561 = vmatpush.bf16.msra.mxu2 %v5089_v50 }
 0x199   :  { %2573 = vmatpush.bf16.msra.mxu3 %v5209_v29  ;;  %v5025_v29 = vor.u32 %v6122_v28, %v5022_v54 }
 0x19b   :  { %2538 = vmatpush.bf16.msra.mxu0 %v5025_v29 }
 0x19c   :  { %2562 = vmatpush.bf16.msra.mxu2 %v5077_v12 }
 0x19d   :  { %2574 = vmatpush.bf16.msra.mxu3 %v5197_v42 }
 0x1a0   :  { %2563 = vmatpush.bf16.msra.mxu2 %v5065_v41 }
 0x1a1   :  { %2575 = vmatpush.bf16.msra.mxu3 %v5185_v62  ;;  %v5040_v62 = vld [vmem:[#allocation7 + $0x20] sm:$0xf] }
 0x1a4   :  { %2564 = vmatpush.bf16.msra.mxu2 %v5053_v59 }
 0x1a5   :  { %2576 = vmatpush.bf16.msra.mxu3 %v5173_v13 }
 0x1a9   :  { %2577 = vmatpush.bf16.msra.mxu3 %v5161_v24 }
 0x1ad   :  { %2578 = vmatpush.bf16.msra.mxu3 %v5149_v36 }
 0x1bb   :  { %v6801_v35 = vpop.f32.mrf.mxu0 }
 0x1c1   :  { %v6803_v19 = vpop.f32.mrf.mxu2 }
 0x1c3   :  { %v6807_v27 = vpop.f32.mrf.mxu0 }
 0x1c9   :  { %v6811_v25 = vpop.f32.mrf.mxu2 }
 0x1cb   :  { %v6815_v37 = vpop.f32.mrf.mxu0 }
 0x1d1   :  { %v1992_v3 = vpop.f32.mrf.mxu2 }
 0x1d3   :  { %v2022_v17 = vpop.f32.mrf.mxu0 }
 0x1d5   :  { %v6805_v1 = vpop.f32.mrf.mxu1 }
 0x1d6   :  { %v1979_v48 = vadd.f32 %v6805_v1, %v6801_v35  ;;  %v5125_v35 = vor.u32 %v6148_v60, %v5124_v55 }
 0x1d8   :  { %v2100_v1 = vrot.slane %v1979_v48, 6  ;;  %v2110_v2 = vsel %vm1285_vm3, %v1979_v48, 0.0 }
 0x1d9   :  { %v1994_v34 = vpop.f32.mrf.mxu2 }
 0x1db   :  { %v6809_v45 = vpop.f32.mrf.mxu3  ;;  %v2076_v49 = vpop.f32.mrf.mxu0 }
 0x1dd   :  { %v6813_v5 = vpop.f32.mrf.mxu1 }
 0x1de   :  { %v1981_v61 = vadd.f32 %v6813_v5, %v6807_v27  ;;  %v5041_v27 = vor.u32 %v6127_v63, %v5040_v62 }
 0x1e0   :  { %v2103_v5 = vrot.slane %v1981_v61, 6  ;;  %2565 = vmatpush.bf16.msra.mxu2 %v5041_v27  ;;  %v5460_v27 = vld [vmem:[#allocation8 + $0x1f0] sm:$0xf] }
 0x1e1   :  { %v2048_v8 = vpop.f32.mrf.mxu2 }
 0x1e2   :  { %v2104_v50 = vsel %vm1323_vm5, %v2100_v1, %v2103_v5  ;;  %v6233_v5 = vld [vmem:[#allocation8 + $0x1f4] sm:$0xf0] }
 0x1e3   :  { %v6817_v53 = vpop.f32.mrf.mxu3  ;;  %v2078_v23 = vpop.f32.mrf.mxu0 }
 0x1e4   :  { %v1953_v9 = vadd.f32 %v6817_v53, %v6811_v25 }
 0x1e5   :  { %v2034_v56 = vpop.f32.mrf.mxu1 }
 0x1e6   :  { %v2035_v32 = vadd.f32 %v2034_v56, %v6815_v37  ;;  %v5137_v37 = vor.u32 %v6151_v47, %v5136_v46  ;;  %v2101_v22 = vrot.slane %v1953_v9, 6 }
 0x1e8   :  { %v2118_v42 = vrot.slane %v2035_v32, 7  ;;  %2579 = vmatpush.bf16.msra.mxu3 %v5137_v37  ;;  %v2126_v10 = vrot.slane %v2035_v32, 5  ;;  %v5268_v37 = vld [vmem:[#allocation8 + $0x70] sm:$0xf] }
 0x1e9   :  { %v2050_v55 = vpop.f32.mrf.mxu2  ;;  %v5269_v61 = vor.u32 %v6185_v51, %v5268_v37  ;;  %v5308_v51 = vld [vmem:[#allocation8 + $0xc0] sm:$0xf] }
 0x1ea   :  { %v2132_v4 = vsel %vm1298_vm0, 0.0, %v2118_v42  ;;  %v2114_v42 = vsel %vm1301_vm1, %v2104_v50, 0.0 }
 0x1eb   :  { %v2006_v21 = vpop.f32.mrf.mxu3  ;;  %v2134_v43 = vsel %vm1304_vm4, %v2132_v4, 0.0  ;;  %3546 = vmatpush.bf16.msrb.mxu0 %v5269_v61  ;;  %v6183_v4 = vld [vmem:[#allocation8 + $0x64] sm:$0xf0] }
 0x1ec   :  { %v6822_v57 = vadd.f32 %v2006_v21, %v1992_v3  ;;  %v1951_v3 = vadd.f32 %v6809_v45, %v6803_v19  ;;  %2580 = vmatpush.bf16.msra.mxu3 %v5125_v35  ;;  %v2112_v19 = vsel %vm1328_vm6, %v2110_v2, %v2100_v1  ;;  %v6124_v21 = vld [vmem:[#allocation7 + $0x10] sm:$0xf0] }
 0x1ed   :  { %v2036_v26 = vpop.f32.mrf.mxu1  ;;  %v5029_v28 = vor.u32 %v6124_v21, %v5028_v16  ;;  %v2138_v54 = vadd.f32 %v2134_v43, %v2112_v19  ;;  %v5461_v43 = vor.u32 %v6233_v5, %v5460_v27  ;;  %v5228_v5 = vld [vmem:[#allocation8 + $0x20] sm:$0xf] }
 0x1ee   :  { %v2037_v58 = vadd.f32 %v2036_v26, %v2022_v17  ;;  %v2117_v6 = vrot.slane %v6822_v57, 7  ;;  %v2099_v45 = vrot.slane %v1951_v3, 6  ;;  %v2109_v18 = vsel %vm1285_vm3, %v1951_v3, 0.0  ;;  %v5260_v3 = vld [vmem:[#allocation8 + $0x60] sm:$0xf] }
 0x1ef   :  { %v2123_v31 = vrot.slane %v6822_v57, 5  ;;  %2566 = vmatpush.bf16.msra.mxu2 %v5029_v28 }
 0x1f0   :  { %v2127_v7 = vrot.slane %v2037_v58, 5  ;;  %v2131_v25 = vsel %vm1298_vm0, 0.0, %v2117_v6  ;;  %v2111_v41 = vsel %vm1328_vm6, %v2109_v18, %v2099_v45  ;;  %v2102_v46 = vsel %vm1323_vm5, %v2099_v45, %v2101_v22 }
 0x1f1   :  { %v2133_v32 = vsel %vm1304_vm4, %v2131_v25, 0.0  ;;  %v2113_v9 = vsel %vm1301_vm1, %v2102_v46, 0.0 }
 0x1f2   :  { %v2128_v53 = vsel %vm1282_vm2, %v2126_v10, %v2127_v7  ;;  %v2137_v57 = vadd.f32 %v2133_v32, %v2111_v41  ;;  %v5252_v32 = vld [vmem:[#allocation8 + $0x50] sm:$0xf]  ;;  %v6213_v41 = vld [vmem:[#allocation8 + $0x154] sm:$0xf0] }
 0x1f3   :  { %v2008_v44 = vpop.f32.mrf.mxu3  ;;  %v2136_v12 = vsel %vm1285_vm3, %v2128_v53, 0.0  ;;  %v5396_v53 = vld [vmem:[#allocation8 + $0x170] sm:$0xf] }
 0x1f4   :  { %v2009_v11 = vadd.f32 %v2008_v44, %v1994_v34  ;;  %v2168_v44 = vperm.slane %v6839_v14, 0  ;;  %v2140_v47 = vadd.f32 %v2136_v12, %v2114_v42  ;;  %v6181_v12 = vld [vmem:[#allocation8 + $0x54] sm:$0xf0]  ;;  %v5444_v42 = vld [vmem:[#allocation8 + $0x1d0] sm:$0xf] }
 0x1f5   :  { %v2090_v56 = vpop.f32.mrf.mxu1 }
 0x1f6   :  { %v2091_v0 = vadd.f32 %v2090_v56, %v2076_v49  ;;  %v2124_v15 = vrot.slane %v2009_v11, 5  ;;  %v6201_v56 = vld [vmem:[#allocation8 + $0xf4] sm:$0xf0] }
 0x1f7   :  { %v5333_v35 = vor.u32 %v6201_v56, %v5332_v52  ;;  %v6195_v52 = vld [vmem:[#allocation8 + $0xc4] sm:$0xf0] }
 0x1f8   :  { %v2144_v38 = vrot.slane %v2091_v0, 6  ;;  %v2152_v34 = vrot.slane %v2091_v0, 4  ;;  %v2125_v48 = vsel %vm1282_vm2, %v2123_v31, %v2124_v15  ;;  %v5452_v15 = vld [vmem:[#allocation8 + $0x1e0] sm:$0xf] }
 0x1f9   :  { %v2135_v1 = vsel %vm1285_vm3, %v2125_v48, 0.0  ;;  %3559 = vmatpush.bf16.msrb.mxu1 %v5333_v35  ;;  %v5244_v48 = vld [vmem:[#allocation8 + $0x40] sm:$0xf]  ;;  %v5300_v35 = vld [vmem:[#allocation8 + $0xb0] sm:$0xf] }
 0x1fa   :  { %v2158_v13 = vsel %vm1323_vm5, 0.0, %v2144_v38  ;;  %v2139_v10 = vadd.f32 %v2135_v1, %v2113_v9  ;;  %v6193_v1 = vld [vmem:[#allocation8 + $0xb4] sm:$0xf0] }
 0x1fb   :  { %v2062_v17 = vpop.f32.mrf.mxu3  ;;  %v2160_v24 = vsel %vm1328_vm6, %v2158_v13, 0.0 }
 0x1fc   :  { %v2063_v20 = vadd.f32 %v2062_v17, %v2048_v8  ;;  %v2164_v36 = vadd.f32 %v2160_v24, %v2138_v54  ;;  %v5261_v8 = vor.u32 %v6183_v4, %v5260_v3  ;;  %v6199_v24 = vld [vmem:[#allocation8 + $0xe4] sm:$0xf0]  ;;  %v5301_v3 = vor.u32 %v6193_v1, %v5300_v35  ;;  %v6209_v4 = vld [vmem:[#allocation8 + $0x134] sm:$0xf0]  ;;  %v5708_v1 = vld [vmem:[#allocation8 + $0x3e0] sm:$0xf] }
 0x1fd   :  { %v2092_v26 = vpop.f32.mrf.mxu1  ;;  %v6215_v54 = vld [vmem:[#allocation8 + $0x164] sm:$0xf0] }
 0x1fe   :  { %v2143_v29 = vrot.slane %v2063_v20, 6  ;;  %v2093_v30 = vadd.f32 %v2092_v26, %v2078_v23  ;;  %v2173_v62 = vadd.f32 %v2169_v33, %v2164_v36  ;;  %v2149_v2 = vrot.slane %v2063_v20, 4  ;;  %3547 = vmatpush.bf16.msrb.mxu0 %v5261_v8  ;;  %v6217_v20 = vld [vmem:[#allocation8 + $0x174] sm:$0xf0]  ;;  %v5324_v23 = vld [vmem:[#allocation8 + $0xe0] sm:$0xf] }
 0x1ff   :  { %v5397_v50 = vor.u32 %v6217_v20, %v5396_v53  ;;  %v5388_v26 = vld [vmem:[#allocation8 + $0x160] sm:$0xf]  ;;  %v5325_v28 = vor.u32 %v6199_v24, %v5324_v23  ;;  %v6197_v36 = vld [vmem:[#allocation8 + $0xd4] sm:$0xf0]  ;;  %v6175_v8 = vld [vmem:[#allocation8 + $0x24] sm:$0xf0] }
 0x200   :  { %v2157_v39 = vsel %vm1323_vm5, 0.0, %v2143_v29  ;;  %v2153_v40 = vrot.slane %v2093_v30, 4  ;;  %v2177_v11 = vmax.f32 %v2173_v62, 0.0  ;;  %v6231_v29 = vld [vmem:[#allocation8 + $0x1e4] sm:$0xf0]  ;;  %v5389_v30 = vor.u32 %v6215_v54, %v5388_v26 }
 0x201   :  { %v2159_v58 = vsel %vm1328_vm6, %v2157_v39, 0.0  ;;  %v5453_v31 = vor.u32 %v6231_v29, %v5452_v15  ;;  %3560 = vmatpush.bf16.msrb.mxu1 %v5325_v28  ;;  %v5380_v39 = vld [vmem:[#allocation8 + $0x150] sm:$0xf]  ;;  %v5229_v9 = vor.u32 %v6175_v8, %v5228_v5  ;;  %v6173_v53 = vld [vmem:[#allocation8 + $0x14] sm:$0xf0] }
 0x202   :  { %v2154_v49 = vsel %vm1301_vm1, %v2152_v34, %v2153_v40  ;;  %v2163_v6 = vadd.f32 %v2159_v58, %v2137_v57  ;;  %v5316_v34 = vld [vmem:[#allocation8 + $0xd0] sm:$0xf]  ;;  %v5381_v46 = vor.u32 %v6213_v41, %v5380_v39  ;;  %v5309_v57 = vor.u32 %v6195_v52, %v5308_v51  ;;  %v6211_v58 = vld [vmem:[#allocation8 + $0x144] sm:$0xf0]  ;;  %v6205_v23 = vld [vmem:[#allocation8 + $0x114] sm:$0xf0] }
 0x203   :  { %v2162_v59 = vsel %vm1298_vm0, 0.0, %v2154_v49  ;;  %v2064_v60 = vpop.f32.mrf.mxu3  ;;  %v5317_v40 = vor.u32 %v6197_v36, %v5316_v34  ;;  %v6179_v49 = vld [vmem:[#allocation8 + $0x44] sm:$0xf0]  ;;  %v5236_v62 = vld [vmem:[#allocation8 + $0x30] sm:$0xf] }
 0x204   :  { %v2166_v63 = vadd.f32 %v2162_v59, %v2140_v47  ;;  %v2065_v0 = vadd.f32 %v2064_v60, %v2050_v55  ;;  %v2172_v14 = vadd.f32 %v2168_v44, %v2163_v6  ;;  %v5245_v37 = vor.u32 %v6179_v49, %v5244_v48  ;;  %v5372_v55 = vld [vmem:[#allocation8 + $0x140] sm:$0xf]  ;;  %v6227_v60 = vld [vmem:[#allocation8 + $0x1c4] sm:$0xf0]  ;;  %v5428_v6 = vld [vmem:[#allocation8 + $0x1b0] sm:$0xf] }
 0x205   :  { %3561 = vmatpush.bf16.msrb.mxu1 %v5317_v40  ;;  %v5436_v59 = vld [vmem:[#allocation8 + $0x1c0] sm:$0xf]  ;;  %v5373_v61 = vor.u32 %v6211_v58, %v5372_v55  ;;  %v5412_v24 = vld [vmem:[#allocation8 + $0x190] sm:$0xf]  ;;  %v6221_v26 = vld [vmem:[#allocation8 + $0x194] sm:$0xf0] }
 0x206   :  { %v2175_v7 = vadd.f32 %v2169_v33, %v2166_v63  ;;  %v2150_v38 = vrot.slane %v2065_v0, 4  ;;  %v2176_v16 = vmax.f32 %v2172_v14, 0.0  ;;  %v5253_v33 = vor.u32 %v6181_v12, %v5252_v32  ;;  %v6177_v63 = vld [vmem:[#allocation8 + $0x34] sm:$0xf0]  ;;  %v6223_v14 = vld [vmem:[#allocation8 + $0x1a4] sm:$0xf0] }
 0x207   :  { %v5437_v56 = vor.u32 %v6227_v60, %v5436_v59  ;;  %v5237_v0 = vor.u32 %v6177_v63, %v5236_v62  ;;  %v5413_v54 = vor.u32 %v6221_v26, %v5412_v24  ;;  %v5212_v15 = vld [vmem:[#allocation8] sm:$0xf]  ;;  %v6171_v29 = vld [vmem:[#allocation8 + $0x4] sm:$0xf0]  ;;  %v6249_v32 = vld [vmem:[#allocation8 + $0x274] sm:$0xf0] }
 0x208   :  { %v2151_v13 = vsel %vm1301_vm1, %v2149_v2, %v2150_v38  ;;  %v2179_v19 = vmax.f32 %v2175_v7, 0.0  ;;  %3548 = vmatpush.bf16.msrb.mxu0 %v5253_v33  ;;  %v5364_v2 = vld [vmem:[#allocation8 + $0x130] sm:$0xf]  ;;  %v6225_v7 = vld [vmem:[#allocation8 + $0x1b4] sm:$0xf0] }
 0x209   :  { %v2161_v45 = vsel %vm1298_vm0, 0.0, %v2151_v13  ;;  %3562 = vmatpush.bf16.msrb.mxu1 %v5309_v57  ;;  %v5365_v38 = vor.u32 %v6209_v4, %v5364_v2  ;;  %v5429_v27 = vor.u32 %v6225_v7, %v5428_v6  ;;  %v5356_v13 = vld [vmem:[#allocation8 + $0x120] sm:$0xf]  ;;  %v6187_v34 = vld [vmem:[#allocation8 + $0x84] sm:$0xf0] }
 0x20a   :  { %v2165_v17 = vadd.f32 %v2161_v45, %v2139_v10  ;;  %v2246_v18 = vpack.c.bf16 %v2179_v19, %v2177_v11  ;;  %v5292_v10 = vld [vmem:[#allocation8 + $0xa0] sm:$0xf]  ;;  %v6191_v11 = vld [vmem:[#allocation8 + $0xa4] sm:$0xf0]  ;;  %v6265_v48 = vld [vmem:[#allocation8 + $0x2f4] sm:$0xf0] }
 0x20b   :  { %v5293_v19 = vor.u32 %v6191_v11, %v5292_v10  ;;  %v6207_v45 = vld [vmem:[#allocation8 + $0x124] sm:$0xf0]  ;;  %v5276_v33 = vld [vmem:[#allocation8 + $0x80] sm:$0xf]  ;;  %v5652_v49 = vld [vmem:[#allocation8 + $0x370] sm:$0xf] }
 0x20c   :  { %v2174_v25 = vadd.f32 %v2168_v44, %v2165_v17  ;;  %2525 = vmatmul.bf16.vlgmr.msrb.gmra.mxu3 %v2246_v18  ;;  %2553 = vmatmul.bf16.vlgmr.msra.gmra.mxu1 %v2246_v18  ;;  %v6229_v44 = vld [vmem:[#allocation8 + $0x1d4] sm:$0xf0]  ;;  %v5357_v17 = vor.u32 %v6207_v45, %v5356_v13  ;;  %v5340_v36 = vld [vmem:[#allocation8 + $0x100] sm:$0xf]  ;;  %v5277_v39 = vor.u32 %v6187_v34, %v5276_v33  ;;  %v6203_v40 = vld [vmem:[#allocation8 + $0x104] sm:$0xf0] }
 0x20d   :  { %3585 = vmatpush.bf16.msrb.mxu3 %v5461_v43  ;;  %v5445_v47 = vor.u32 %v6229_v44, %v5444_v42  ;;  %3549 = vmatpush.bf16.msrb.mxu0 %v5245_v37  ;;  %v5420_v43 = vld [vmem:[#allocation8 + $0x1a0] sm:$0xf]  ;;  %v6219_v42 = vld [vmem:[#allocation8 + $0x184] sm:$0xf0]  ;;  %v5341_v44 = vor.u32 %v6203_v40, %v5340_v36  ;;  %v6281_v51 = vld [vmem:[#allocation8 + $0x374] sm:$0xf0] }
 0x20e   :  { %v2178_v21 = vmax.f32 %v2174_v25, 0.0  ;;  %3563 = vmatpush.bf16.msrb.mxu1 %v5301_v3  ;;  %v5220_v25 = vld [vmem:[#allocation8 + $0x10] sm:$0xf]  ;;  %v5404_v41 = vld [vmem:[#allocation8 + $0x180] sm:$0xf]  ;;  %v5653_v57 = vor.u32 %v6281_v51, %v5652_v49 }
 0x20f   :  { %v5221_v20 = vor.u32 %v6173_v53, %v5220_v25  ;;  %v5716_v52 = vld [vmem:[#allocation8 + $0x3f0] sm:$0xf]  ;;  %v6297_v55 = vld [vmem:[#allocation8 + $0x3f4] sm:$0xf0]  ;;  %v5516_v59 = vld [vmem:[#allocation8 + $0x260] sm:$0xf] }
 0x210   :  { %v2245_v22 = vpack.c.bf16 %v2178_v21, %v2176_v16  ;;  %v5284_v16 = vld [vmem:[#allocation8 + $0x90] sm:$0xf]  ;;  %v6189_v21 = vld [vmem:[#allocation8 + $0x94] sm:$0xf0]  ;;  %v5717_v58 = vor.u32 %v6297_v55, %v5716_v52  ;;  %v6247_v60 = vld [vmem:[#allocation8 + $0x264] sm:$0xf0] }
 0x211   :  { %3586 = vmatpush.bf16.msrb.mxu3 %v5453_v31  ;;  %3550 = vmatpush.bf16.msrb.mxu0 %v5237_v0  ;;  %v5524_v31 = vld [vmem:[#allocation8 + $0x270] sm:$0xf]  ;;  %v6263_v62 = vld [vmem:[#allocation8 + $0x2e4] sm:$0xf0]  ;;  %v5644_v63 = vld [vmem:[#allocation8 + $0x360] sm:$0xf] }
 0x212   :  { %2511 = vmatmul.bf16.vlgmr.msrb.gmra.mxu2 %v2245_v22  ;;  %2539 = vmatmul.bf16.vlgmr.msra.gmra.mxu0 %v2245_v22  ;;  %v5525_v12 = vor.u32 %v6249_v32, %v5524_v31  ;;  %v6279_v35 = vld [vmem:[#allocation8 + $0x364] sm:$0xf0]  ;;  %v5508_v6 = vld [vmem:[#allocation8 + $0x250] sm:$0xf]  ;;  %v6245_v7 = vld [vmem:[#allocation8 + $0x254] sm:$0xf0] }
 0x213   :  { %3572 = vmatpush.bf16.msrb.mxu2 %v5397_v50  ;;  %3564 = vmatpush.bf16.msrb.mxu1 %v5293_v19  ;;  %v5348_v50 = vld [vmem:[#allocation8 + $0x110] sm:$0xf]  ;;  %v6295_v2 = vld [vmem:[#allocation8 + $0x3e4] sm:$0xf0]  ;;  %v5645_v3 = vor.u32 %v6279_v35, %v5644_v63  ;;  %v6261_v5 = vld [vmem:[#allocation8 + $0x2d4] sm:$0xf0] }
 0x214   :  { %v5349_v28 = vor.u32 %v6205_v23, %v5348_v50  ;;  %v5709_v4 = vor.u32 %v6295_v2, %v5708_v1  ;;  %v5636_v8 = vld [vmem:[#allocation8 + $0x350] sm:$0xf]  ;;  %v6277_v10 = vld [vmem:[#allocation8 + $0x354] sm:$0xf0]  ;;  %v6259_v25 = vld [vmem:[#allocation8 + $0x2c4] sm:$0xf0] }
 0x215   :  { %3587 = vmatpush.bf16.msrb.mxu3 %v5445_v47  ;;  %3551 = vmatpush.bf16.msrb.mxu0 %v5229_v9  ;;  %v5588_v47 = vld [vmem:[#allocation8 + $0x2f0] sm:$0xf]  ;;  %v6293_v13 = vld [vmem:[#allocation8 + $0x3d4] sm:$0xf0]  ;;  %v5637_v19 = vor.u32 %v6277_v10, %v5636_v8  ;;  %v6239_v40 = vld [vmem:[#allocation8 + $0x224] sm:$0xf0] }
 0x216   :  { %v5589_v37 = vor.u32 %v6265_v48, %v5588_v47  ;;  %v5700_v11 = vld [vmem:[#allocation8 + $0x3d0] sm:$0xf]  ;;  %v6241_v24 = vld [vmem:[#allocation8 + $0x234] sm:$0xf0]  ;;  %v6271_v48 = vld [vmem:[#allocation8 + $0x324] sm:$0xf0] }
 0x217   :  { %3573 = vmatpush.bf16.msrb.mxu2 %v5389_v30  ;;  %v5213_v30 = vor.u32 %v6171_v29, %v5212_v15  ;;  %v5701_v45 = vor.u32 %v6293_v13, %v5700_v11  ;;  %v5492_v23 = vld [vmem:[#allocation8 + $0x230] sm:$0xf]  ;;  %v6257_v29 = vld [vmem:[#allocation8 + $0x2b4] sm:$0xf0]  ;;  %v5676_v49 = vld [vmem:[#allocation8 + $0x3a0] sm:$0xf] }
 0x218   :  { %v5556_v15 = vld [vmem:[#allocation8 + $0x2b0] sm:$0xf]  ;;  %v6273_v32 = vld [vmem:[#allocation8 + $0x334] sm:$0xf0]  ;;  %v6287_v52 = vld [vmem:[#allocation8 + $0x3a4] sm:$0xf0] }
 0x219   :  { %3588 = vmatpush.bf16.msrb.mxu3 %v5437_v56  ;;  %3552 = vmatpush.bf16.msrb.mxu0 %v5221_v20  ;;  %v5580_v56 = vld [vmem:[#allocation8 + $0x2e0] sm:$0xf]  ;;  %v5557_v31 = vor.u32 %v6257_v29, %v5556_v15  ;;  %v6289_v33 = vld [vmem:[#allocation8 + $0x3b4] sm:$0xf0]  ;;  %v5476_v55 = vld [vmem:[#allocation8 + $0x210] sm:$0xf] }
 0x21a   :  { %v5581_v0 = vor.u32 %v6263_v62, %v5580_v56  ;;  %v5628_v20 = vld [vmem:[#allocation8 + $0x340] sm:$0xf]  ;;  %v5604_v56 = vld [vmem:[#allocation8 + $0x310] sm:$0xf]  ;;  %v6269_v63 = vld [vmem:[#allocation8 + $0x314] sm:$0xf0] }
 0x21b   :  { %3574 = vmatpush.bf16.msrb.mxu2 %v5381_v46  ;;  %v5405_v46 = vor.u32 %v6219_v42, %v5404_v41  ;;  %v5548_v42 = vld [vmem:[#allocation8 + $0x2a0] sm:$0xf]  ;;  %v5605_v2 = vor.u32 %v6269_v63, %v5604_v56  ;;  %v6251_v8 = vld [vmem:[#allocation8 + $0x284] sm:$0xf0]  ;;  %v5270_v56 = vld [vmem:[#allocation8 + $0x78] sm:$0xf0] }
 0x21c   :  { %2581 = vmatmul.bf16.vlgmr.msra.gmra.mxu3 %v2246_v18  ;;  %v5421_v18 = vor.u32 %v6223_v14, %v5420_v43  ;;  %v5500_v43 = vld [vmem:[#allocation8 + $0x240] sm:$0xf]  ;;  %v6243_v14 = vld [vmem:[#allocation8 + $0x244] sm:$0xf0] }
 0x21d   :  { %3589 = vmatpush.bf16.msrb.mxu3 %v5429_v27  ;;  %3553 = vmatpush.bf16.msrb.mxu0 %v5213_v30  ;;  %v5572_v27 = vld [vmem:[#allocation8 + $0x2d0] sm:$0xf]  ;;  %v5596_v11 = vld [vmem:[#allocation8 + $0x300] sm:$0xf]  ;;  %v6267_v13 = vld [vmem:[#allocation8 + $0x304] sm:$0xf0] }
 0x21e   :  { %v5573_v9 = vor.u32 %v6261_v5, %v5572_v27  ;;  %v5620_v30 = vld [vmem:[#allocation8 + $0x330] sm:$0xf]  ;;  %v5532_v5 = vld [vmem:[#allocation8 + $0x280] sm:$0xf] }
 0x21f   :  { %3575 = vmatpush.bf16.msrb.mxu2 %v5373_v61  ;;  %v5517_v61 = vor.u32 %v6247_v60, %v5516_v59  ;;  %v5621_v34 = vor.u32 %v6273_v32, %v5620_v30  ;;  %v5540_v60 = vld [vmem:[#allocation8 + $0x290] sm:$0xf]  ;;  %v5533_v10 = vor.u32 %v6251_v8, %v5532_v5  ;;  %v5398_v5 = vld [vmem:[#allocation8 + $0x178] sm:$0xf0] }
 0x221   :  { %3590 = vmatpush.bf16.msrb.mxu3 %v5421_v18  ;;  %3598 = vmatpush.bf16.msra.mxu0 %v5525_v12  ;;  %v5564_v18 = vld [vmem:[#allocation8 + $0x2c0] sm:$0xf]  ;;  %v5684_v12 = vld [vmem:[#allocation8 + $0x3b0] sm:$0xf] }
 0x222   :  { %2567 = vmatmul.bf16.vlgmr.msra.gmra.mxu2 %v2245_v22  ;;  %v5285_v22 = vor.u32 %v6189_v21, %v5284_v16  ;;  %v5565_v53 = vor.u32 %v6259_v25, %v5564_v18  ;;  %v6275_v16 = vld [vmem:[#allocation8 + $0x344] sm:$0xf0]  ;;  %v5692_v21 = vld [vmem:[#allocation8 + $0x3c0] sm:$0xf]  ;;  %v5685_v36 = vor.u32 %v6289_v33, %v5684_v12 }
 0x223   :  { %3576 = vmatpush.bf16.msrb.mxu2 %v5365_v38  ;;  %v5509_v38 = vor.u32 %v6245_v7, %v5508_v6  ;;  %v5629_v50 = vor.u32 %v6275_v16, %v5628_v20  ;;  %v6235_v6 = vld [vmem:[#allocation8 + $0x204] sm:$0xf0]  ;;  %v6872_v12 = vld [vmem:[%s7029_s6] ss:$0 sm:$0xff] }
 0x224   :  { %3565 = vmatpush.bf16.msrb.mxu1 %v5285_v22  ;;  %v6291_v22 = vld [vmem:[#allocation8 + $0x3c4] sm:$0xf0] }
 0x225   :  { %3591 = vmatpush.bf16.msrb.mxu3 %v5413_v54  ;;  %3599 = vmatpush.bf16.msra.mxu0 %v5517_v61  ;;  %v5693_v26 = vor.u32 %v6291_v22, %v5692_v21  ;;  %v6253_v61 = vld [vmem:[#allocation8 + $0x294] sm:$0xf0] }
 0x226   :  { %v5541_v62 = vor.u32 %v6253_v61, %v5540_v60  ;;  %v6313_v60 = vld [vmem:[#allocation8 + $0x474] sm:$0xf0]  ;;  %v6184_v61 = vld [vmem:[#allocation8 + $0x74] sm:$0xf] }
 0x227   :  { %3577 = vmatpush.bf16.msrb.mxu2 %v5357_v17  ;;  %v5501_v17 = vor.u32 %v6243_v14, %v5500_v43  ;;  %v6283_v43 = vld [vmem:[#allocation8 + $0x384] sm:$0xf0] }
 0x228   :  { %3566 = vmatpush.bf16.msrb.mxu1 %v5277_v39  ;;  %v5484_v39 = vld [vmem:[#allocation8 + $0x220] sm:$0xf] }
 0x229   :  { %3592 = vmatpush.bf16.msrb.mxu3 %v5405_v46  ;;  %3600 = vmatpush.bf16.msra.mxu0 %v5509_v38  ;;  %v5485_v41 = vor.u32 %v6239_v40, %v5484_v39  ;;  %v5612_v46 = vld [vmem:[#allocation8 + $0x320] sm:$0xf] }
 0x22a   :  { %v5613_v51 = vor.u32 %v6271_v48, %v5612_v46 }
 0x22b   :  { %3578 = vmatpush.bf16.msrb.mxu2 %v5349_v28  ;;  %v5493_v28 = vor.u32 %v6241_v24, %v5492_v23 }
 0x22c   :  { %3611 = vmatpush.bf16.msra.mxu1 %v5589_v37 }
 0x22d   :  { %3637 = vmatpush.bf16.msra.mxu3 %v5717_v58  ;;  %3601 = vmatpush.bf16.msra.mxu0 %v5501_v17  ;;  %v5677_v58 = vor.u32 %v6287_v52, %v5676_v49 }
 0x22f   :  { %3579 = vmatpush.bf16.msrb.mxu2 %v5341_v44  ;;  %v6255_v44 = vld [vmem:[#allocation8 + $0x2a4] sm:$0xf0] }
 0x230   :  { %3612 = vmatpush.bf16.msra.mxu1 %v5581_v0  ;;  %v5549_v47 = vor.u32 %v6255_v44, %v5548_v42  ;;  %v5668_v0 = vld [vmem:[#allocation8 + $0x390] sm:$0xf] }
 0x231   :  { %3638 = vmatpush.bf16.msra.mxu3 %v5709_v4  ;;  %3602 = vmatpush.bf16.msra.mxu0 %v5493_v28  ;;  %v5468_v4 = vld [vmem:[#allocation8 + $0x200] sm:$0xf] }
 0x232   :  { %v5469_v38 = vor.u32 %v6235_v6, %v5468_v4 }
 0x233   :  { %3624 = vmatpush.bf16.msra.mxu2 %v5653_v57  ;;  %v6237_v57 = vld [vmem:[#allocation8 + $0x214] sm:$0xf0] }
 0x234   :  { %3613 = vmatpush.bf16.msra.mxu1 %v5573_v9  ;;  %v5477_v59 = vor.u32 %v6237_v57, %v5476_v55 }
 0x235   :  { %3639 = vmatpush.bf16.msra.mxu3 %v5701_v45  ;;  %3603 = vmatpush.bf16.msra.mxu0 %v5485_v41  ;;  %v5660_v45 = vld [vmem:[#allocation8 + $0x380] sm:$0xf] }
 0x236   :  { %v5661_v14 = vor.u32 %v6283_v43, %v5660_v45 }
 0x237   :  { %3625 = vmatpush.bf16.msra.mxu2 %v5645_v3  ;;  %v6285_v3 = vld [vmem:[#allocation8 + $0x394] sm:$0xf0] }
 0x238   :  { %3614 = vmatpush.bf16.msra.mxu1 %v5565_v53  ;;  %v5669_v7 = vor.u32 %v6285_v3, %v5668_v0  ;;  %v5334_v3 = vld [vmem:[#allocation8 + $0xf8] sm:$0xf0] }
 0x239   :  { %3640 = vmatpush.bf16.msra.mxu3 %v5693_v26  ;;  %3604 = vmatpush.bf16.msra.mxu0 %v5477_v59 }
 0x23b   :  { %3626 = vmatpush.bf16.msra.mxu2 %v5637_v19  ;;  %v5597_v19 = vor.u32 %v6267_v13, %v5596_v11  ;;  %v5772_v13 = vld [vmem:[#allocation8 + $0x460] sm:$0xf] }
 0x23c   :  { %3615 = vmatpush.bf16.msra.mxu1 %v5557_v31 }
 0x23d   :  { %3641 = vmatpush.bf16.msra.mxu3 %v5685_v36  ;;  %3605 = vmatpush.bf16.msra.mxu0 %v5469_v38  ;;  %v5273_v38 = vor.u32 %v6184_v61, %v5270_v56  ;;  %v5310_v61 = vld [vmem:[#allocation8 + $0xc8] sm:$0xf0]  ;;  %v6210_v56 = vld [vmem:[#allocation8 + $0x144] sm:$0xf] }
 0x23f   :  { %3627 = vmatpush.bf16.msra.mxu2 %v5629_v50 }
 0x240   :  { %3616 = vmatpush.bf16.msra.mxu1 %v5549_v47 }
 0x241   :  { %3642 = vmatpush.bf16.msra.mxu3 %v5677_v58  ;;  %v5780_v58 = vld [vmem:[#allocation8 + $0x470] sm:$0xf] }
 0x243   :  { %3628 = vmatpush.bf16.msra.mxu2 %v5621_v34 }
 0x244   :  { %3617 = vmatpush.bf16.msra.mxu1 %v5541_v62 }
 0x245   :  { %3643 = vmatpush.bf16.msra.mxu3 %v5669_v7  ;;  %v5781_v7 = vor.u32 %v6313_v60, %v5780_v58 }
 0x247   :  { %3629 = vmatpush.bf16.msra.mxu2 %v5613_v51 }
 0x248   :  { %3618 = vmatpush.bf16.msra.mxu1 %v5533_v10 }
 0x249   :  { %3644 = vmatpush.bf16.msra.mxu3 %v5661_v14 }
 0x24b   :  { %3630 = vmatpush.bf16.msra.mxu2 %v5605_v2  ;;  %v6200_v2 = vld [vmem:[#allocation8 + $0xf4] sm:$0xf] }
 0x24f   :  { %3631 = vmatpush.bf16.msra.mxu2 %v5597_v19 }
 0x289   :  { %v2554_v27 = vpop.f32.mrf.mxu1 }
 0x28f   :  { %v6863_v54 = vpop.f32.mrf.mxu3  ;;  %v2540_v35 = vpop.f32.mrf.mxu0 }
 0x290   :  { %v2555_v17 = vadd.f32 %v2554_v27, %v2540_v35  ;;  %v6216_v27 = vld [vmem:[#allocation8 + $0x174] sm:$0xf] }
 0x291   :  { %v2556_v21 = vpop.f32.mrf.mxu1 }
 0x292   :  { %v2596_v20 = vrot.slane %v2555_v17, 7  ;;  %v2599_v33 = vrot.slane %v2555_v17, 5  ;;  %v6311_v17 = vld [vmem:[#allocation8 + $0x464] sm:$0xf0] }
 0x294   :  { %v2604_v26 = vsel %vm1298_vm0, 0.0, %v2596_v20  ;;  %v5337_v20 = vor.u32 %v6200_v2, %v5334_v3 }
 0x295   :  { %v2512_v37 = vpop.f32.mrf.mxu2 }
 0x296   :  { %v2527_v18 = vadd.f32 %v6863_v54, %v2512_v37 }
 0x297   :  { %v2528_v1 = vpop.f32.mrf.mxu3  ;;  %v2542_v25 = vpop.f32.mrf.mxu0 }
 0x298   :  { %v2593_v22 = vsel %vm1328_vm6, %v2527_v18, 0.0  ;;  %v2557_v23 = vadd.f32 %v2556_v21, %v2542_v25  ;;  %v2589_v30 = vrot.slane %v2527_v18, 6 }
 0x299   :  { %v2607_v29 = vadd.f32 %v2604_v26, %v2593_v22  ;;  %v5401_v22 = vor.u32 %v6216_v27, %v5398_v5  ;;  %v6198_v26 = vld [vmem:[#allocation8 + $0xe4] sm:$0xf]  ;;  %v5748_v5 = vld [vmem:[#allocation8 + $0x430] sm:$0xf] }
 0x29a   :  { %v2600_v31 = vrot.slane %v2557_v23, 5  ;;  %v6182_v23 = vld [vmem:[#allocation8 + $0x64] sm:$0xf] }
 0x29c   :  { %v2601_v40 = vsel %vm1282_vm2, %v2599_v33, %v2600_v31  ;;  %v2606_v35 = vsel %vm1298_vm0, %v2600_v31, 0.0 }
 0x29d   :  { %v2514_v9 = vpop.f32.mrf.mxu2  ;;  %v2605_v48 = vsel %vm1323_vm5, 0.0, %v2601_v40  ;;  %v5254_v40 = vld [vmem:[#allocation8 + $0x58] sm:$0xf0] }
 0x29e   :  { %v2529_v16 = vadd.f32 %v2528_v1, %v2514_v9 }
 0x29f   :  { %v2582_v53 = vpop.f32.mrf.mxu3 }
 0x2a0   :  { %v2590_v28 = vrot.slane %v2529_v16, 6 }
 0x2a2   :  { %v2591_v34 = vsel %vm1323_vm5, %v2589_v30, %v2590_v28  ;;  %v5773_v28 = vor.u32 %v6311_v17, %v5772_v13  ;;  %v5390_v30 = vld [vmem:[#allocation8 + $0x168] sm:$0xf0] }
 0x2a3   :  { %v2594_v42 = vsel %vm1298_vm0, 0.0, %v2591_v34  ;;  %v6180_v34 = vld [vmem:[#allocation8 + $0x54] sm:$0xf] }
 0x2a4   :  { %v2608_v49 = vadd.f32 %v2605_v48, %v2594_v42  ;;  %v5318_v42 = vld [vmem:[#allocation8 + $0xd8] sm:$0xf0] }
 0x2a5   :  { %v2568_v50 = vpop.f32.mrf.mxu2 }
 0x2a6   :  { %v2583_v24 = vadd.f32 %v2582_v53, %v2568_v50 }
 0x2a7   :  { %v2584_v36 = vpop.f32.mrf.mxu3 }
 0x2a8   :  { %v2611_v15 = vrot.slane %v2583_v24, 6  ;;  %v2614_v46 = vrot.slane %v2583_v24, 4  ;;  %v5262_v24 = vld [vmem:[#allocation8 + $0x68] sm:$0xf0] }
 0x2a9   :  { %v5265_v33 = vor.u32 %v6182_v23, %v5262_v24  ;;  %v6208_v23 = vld [vmem:[#allocation8 + $0x134] sm:$0xf]  ;;  %v5366_v24 = vld [vmem:[#allocation8 + $0x138] sm:$0xf0] }
 0x2aa   :  { %v2619_v32 = vsel %vm1323_vm5, 0.0, %v2611_v15  ;;  %v2620_v37 = vsel %vm1298_vm0, %v2611_v15, 0.0  ;;  %v5326_v15 = vld [vmem:[#allocation8 + $0xe8] sm:$0xf0] }
 0x2ab   :  { %v2622_v54 = vadd.f32 %v2619_v32, %v2607_v29  ;;  %v6214_v29 = vld [vmem:[#allocation8 + $0x164] sm:$0xf]  ;;  %v5764_v32 = vld [vmem:[#allocation8 + $0x450] sm:$0xf] }
 0x2ad   :  { %v2570_v39 = vpop.f32.mrf.mxu2  ;;  %v2628_v44 = vadd.f32 %v6872_v12, %v2622_v54  ;;  %v6309_v54 = vld [vmem:[#allocation8 + $0x454] sm:$0xf0] }
 0x2ae   :  { %v2585_v41 = vadd.f32 %v2584_v36, %v2570_v39  ;;  %v5329_v36 = vor.u32 %v6198_v26, %v5326_v15  ;;  %v5393_v39 = vor.u32 %v6214_v29, %v5390_v30  ;;  %v6303_v15 = vld [vmem:[#allocation8 + $0x424] sm:$0xf0] }
 0x2af   :  { %v6881_v52 = vmax.f32 %v2628_v44, 0.0  ;;  %v6212_v44 = vld [vmem:[#allocation8 + $0x154] sm:$0xf] }
 0x2b0   :  { %v2615_v47 = vrot.slane %v2585_v41, 4  ;;  %v6196_v41 = vld [vmem:[#allocation8 + $0xd4] sm:$0xf] }
 0x2b1   :  { %v2637_v62 = vrot.slane %v6881_v52, 1  ;;  %v2641_v63 = vrot.slane %v6881_v52, 2  ;;  %v2645_v0 = vrot.slane %v6881_v52, 3  ;;  %v2634_v6 = vsel %vm1298_vm0, %v6881_v52, 0.0 }
 0x2b2   :  { %v2616_v51 = vsel %vm1301_vm1, %v2614_v46, %v2615_v47  ;;  %v2624_v4 = vadd.f32 %v2615_v47, %v2606_v35  ;;  %v5382_v46 = vld [vmem:[#allocation8 + $0x158] sm:$0xf0]  ;;  %v5756_v47 = vld [vmem:[#allocation8 + $0x440] sm:$0xf]  ;;  %v2649_v58 = vrot.slane %v6881_v52, 4  ;;  %v2657_v3 = vrot.slane %v6881_v52, 6 }
 0x2b3   :  { %v2621_v55 = vsel %vm1282_vm2, %v2620_v37, %v2616_v51  ;;  %v2638_v45 = vsel %vm1298_vm0, %v2637_v62, 0.0  ;;  %v2642_v43 = vsel %vm1298_vm0, %v2641_v63, 0.0  ;;  %v2646_v14 = vsel %vm1298_vm0, %v2645_v0, 0.0  ;;  %v6178_v37 = vld [vmem:[#allocation8 + $0x44] sm:$0xf] }
 0x2b4   :  { %v2623_v57 = vadd.f32 %v2621_v55, %v2608_v49  ;;  %v6914_v31 = vadd.f32 %v6872_v12, %v2624_v4  ;;  %v6307_v49 = vld [vmem:[#allocation8 + $0x444] sm:$0xf0]  ;;  %v5257_v51 = vor.u32 %v6180_v34, %v5254_v40  ;;  %v5246_v55 = vld [vmem:[#allocation8 + $0x48] sm:$0xf0]  ;;  %v5385_v60 = vor.u32 %v6212_v44, %v5382_v46  ;;  %v6190_v40 = vld [vmem:[#allocation8 + $0xa4] sm:$0xf] }
 0x2b5   :  { %v2653_v63 = vrot.slane %v6881_v52, 5  ;;  %v5757_v0 = vor.u32 %v6307_v49, %v5756_v47  ;;  %v5374_v35 = vld [vmem:[#allocation8 + $0x148] sm:$0xf0]  ;;  %v2661_v4 = vrot.slane %v6881_v52, 7  ;;  %v2650_v27 = vsel %vm1298_vm0, %v2649_v58, 0.0 }
 0x2b6   :  { %v2629_v59 = vadd.f32 %v6872_v12, %v2623_v57  ;;  %v5765_v12 = vor.u32 %v6309_v54, %v5764_v32  ;;  %v2633_v48 = vmax.f32 %v6914_v31, 0.0  ;;  %v6194_v57 = vld [vmem:[#allocation8 + $0xc4] sm:$0xf]  ;;  %v6176_v52 = vld [vmem:[#allocation8 + $0x34] sm:$0xf] }
 0x2b7   :  { %v2654_v13 = vsel %vm1298_vm0, %v2653_v63, 0.0  ;;  %v2662_v17 = vsel %vm1298_vm0, %v2661_v4, 0.0  ;;  %v6174_v54 = vld [vmem:[#allocation8 + $0x24] sm:$0xf]  ;;  %v5358_v44 = vld [vmem:[#allocation8 + $0x128] sm:$0xf0] }
 0x2b8   :  { %v6889_v1 = vmax.f32 %v2629_v59, 0.0  ;;  %v5321_v59 = vor.u32 %v6196_v41, %v5318_v42  ;;  %v5294_v41 = vld [vmem:[#allocation8 + $0xa8] sm:$0xf0]  ;;  %v5732_v46 = vld [vmem:[#allocation8 + $0x410] sm:$0xf] }
 0x2b9   :  { %v6301_v47 = vld [vmem:[#allocation8 + $0x414] sm:$0xf0]  ;;  %v6188_v58 = vld [vmem:[#allocation8 + $0x94] sm:$0xf]  ;;  %v6299_v63 = vld [vmem:[#allocation8 + $0x404] sm:$0xf0] }
 0x2ba   :  { %v2636_v8 = vsel %vm2635_vm7, %v6889_v1, %v2634_v6  ;;  %v2639_v9 = vrot.slane %v6889_v1, 1  ;;  %v2643_v10 = vrot.slane %v6889_v1, 2  ;;  %v2647_v11 = vrot.slane %v6889_v1, 3 }
 0x2bb   :  { %v6898_v19 = vpack.c.bf16 %v2636_v8, %v2636_v8  ;;  %v2651_v62 = vrot.slane %v6889_v1, 4  ;;  %v2655_v2 = vrot.slane %v6889_v1, 5  ;;  %v2663_v6 = vrot.slane %v2633_v48, 7  ;;  %v6305_v8 = vld [vmem:[#allocation8 + $0x434] sm:$0xf0] }
 0x2bc   :  { %v2640_v18 = vsel %vm2635_vm7, %v2639_v9, %v2638_v45  ;;  %v2644_v25 = vsel %vm2635_vm7, %v2643_v10, %v2642_v43  ;;  %v2648_v53 = vsel %vm2635_vm7, %v2647_v11, %v2646_v14  ;;  %v5313_v9 = vor.u32 %v6194_v57, %v5310_v61  ;;  %v5238_v45 = vld [vmem:[#allocation8 + $0x38] sm:$0xf0] }
 0x2bd   :  { %3554 = vmatmul.bf16.vlgmr.msrb.gmra.mxu0 %v6898_v19  ;;  %v6907_v16 = vpack.c.bf16 %v2640_v18, %v2640_v18  ;;  %v6909_v21 = vpack.c.bf16 %v2644_v25, %v2644_v25  ;;  %v6911_v50 = vpack.c.bf16 %v2648_v53, %v2648_v53  ;;  %v5377_v10 = vor.u32 %v6210_v56, %v5374_v35  ;;  %v6192_v18 = vld [vmem:[#allocation8 + $0xb4] sm:$0xf]  ;;  %v5302_v25 = vld [vmem:[#allocation8 + $0xb8] sm:$0xf0] }
 0x2be   :  { %3650 = vmatpush.bf16.msrb.mxu0 %v5781_v7  ;;  %v2659_v7 = vrot.slane %v6889_v1, 6  ;;  %v2652_v11 = vsel %vm2635_vm7, %v2651_v62, %v2650_v27  ;;  %v2656_v43 = vsel %vm2635_vm7, %v2655_v2, %v2654_v13  ;;  %v2658_v14 = vsel %vm1298_vm0, %v2657_v3, 0.0  ;;  %v5350_v56 = vld [vmem:[#allocation8 + $0x118] sm:$0xf0]  ;;  %v5724_v62 = vld [vmem:[#allocation8 + $0x400] sm:$0xf] }
 0x2bf   :  { %3567 = vmatmul.bf16.vlgmr.msrb.gmra.mxu1 %v6907_v16  ;;  %3580 = vmatmul.bf16.vlgmr.msrb.gmra.mxu2 %v6909_v21  ;;  %v5749_v53 = vor.u32 %v6305_v8, %v5748_v5  ;;  %v6937_v26 = vpack.c.bf16 %v2652_v11, %v2652_v11  ;;  %v6939_v29 = vpack.c.bf16 %v2656_v43, %v2656_v43  ;;  %v5462_v35 = vld [vmem:[#allocation8 + $0x1f8] sm:$0xf0]  ;;  %v6170_v2 = vld [vmem:[#allocation8 + $0x4] sm:$0xf]  ;;  %v5342_v8 = vld [vmem:[#allocation8 + $0x108] sm:$0xf0] }
 0x2c0   :  { %3593 = vmatmul.bf16.vlgmr.msrb.gmra.mxu3 %v6911_v50  ;;  %3663 = vmatpush.bf16.msrb.mxu1 %v5273_v38  ;;  %v5249_v38 = vor.u32 %v6178_v37, %v5246_v55  ;;  %v5241_v30 = vor.u32 %v6176_v52, %v5238_v45  ;;  %v5305_v32 = vor.u32 %v6192_v18, %v5302_v25  ;;  %v5222_v55 = vld [vmem:[#allocation8 + $0x18] sm:$0xf0]  ;;  %v6202_v5 = vld [vmem:[#allocation8 + $0x104] sm:$0xf]  ;;  %v6264_v13 = vld [vmem:[#allocation8 + $0x2f4] sm:$0xf] }
 0x2c1   :  { %3676 = vmatpush.bf16.msrb.mxu2 %v5337_v20  ;;  %3689 = vmatpush.bf16.msrb.mxu3 %v5401_v22  ;;  %v2660_v20 = vsel %vm2635_vm7, %v2659_v7, %v2658_v14  ;;  %v2664_v22 = vsel %vm2635_vm7, %v2663_v6, %v2662_v17  ;;  %v5297_v37 = vor.u32 %v6190_v40, %v5294_v41  ;;  %v5214_v6 = vld [vmem:[#allocation8 + $0x8] sm:$0xf0]  ;;  %v6186_v7 = vld [vmem:[#allocation8 + $0x84] sm:$0xf]  ;;  %v5526_v11 = vld [vmem:[#allocation8 + $0x278] sm:$0xf0] }
 0x2c2   :  { %3651 = vmatpush.bf16.msrb.mxu0 %v5773_v28  ;;  %v5740_v28 = vld [vmem:[#allocation8 + $0x420] sm:$0xf]  ;;  %v6944_v34 = vpack.c.bf16 %v2664_v22, %v2664_v22  ;;  %v5733_v61 = vor.u32 %v6301_v47, %v5732_v46  ;;  %v5590_v52 = vld [vmem:[#allocation8 + $0x2f8] sm:$0xf0]  ;;  %v6280_v43 = vld [vmem:[#allocation8 + $0x374] sm:$0xf]  ;;  %v5217_v18 = vor.u32 %v6170_v2, %v5214_v6 }
 0x2c3   :  { %v5741_v42 = vor.u32 %v6303_v15, %v5740_v28  ;;  %v5654_v14 = vld [vmem:[#allocation8 + $0x378] sm:$0xf0]  ;;  %v2665_v17 = vsel %vm1298_vm0, %v6889_v1, 0.0  ;;  %v6230_v22 = vld [vmem:[#allocation8 + $0x1e4] sm:$0xf] }
 0x2c4   :  { %3664 = vmatpush.bf16.msrb.mxu1 %v5265_v33  ;;  %v6942_v33 = vpack.c.bf16 %v2660_v20, %v2660_v20  ;;  %v5657_v28 = vor.u32 %v6280_v43, %v5654_v14  ;;  %v2666_v15 = vsel %vm2635_vm7, %v2633_v48, %v2665_v17  ;;  %v5582_v1 = vld [vmem:[#allocation8 + $0x2e8] sm:$0xf0]  ;;  %v6244_v46 = vld [vmem:[#allocation8 + $0x254] sm:$0xf]  ;;  %v5510_v47 = vld [vmem:[#allocation8 + $0x258] sm:$0xf0] }
 0x2c5   :  { %3677 = vmatpush.bf16.msrb.mxu2 %v5329_v36  ;;  %3690 = vmatpush.bf16.msrb.mxu3 %v5393_v39  ;;  %v5369_v36 = vor.u32 %v6208_v23, %v5366_v24  ;;  %v5230_v39 = vld [vmem:[#allocation8 + $0x28] sm:$0xf0]  ;;  %v5593_v24 = vor.u32 %v6264_v13, %v5590_v52  ;;  %v6954_v41 = vpack.c.bf16 %v2666_v15, %v2666_v15  ;;  %v6222_v52 = vld [vmem:[#allocation8 + $0x1a4] sm:$0xf]  ;;  %v5414_v15 = vld [vmem:[#allocation8 + $0x198] sm:$0xf0] }
 0x2c6   :  { %3652 = vmatpush.bf16.msrb.mxu0 %v5765_v12  ;;  %v6206_v12 = vld [vmem:[#allocation8 + $0x124] sm:$0xf]  ;;  %v5233_v49 = vor.u32 %v6174_v54, %v5230_v39  ;;  %v5454_v23 = vld [vmem:[#allocation8 + $0x1e8] sm:$0xf0] }
 0x2c7   :  { %v5361_v57 = vor.u32 %v6206_v12, %v5358_v44  ;;  %v6262_v54 = vld [vmem:[#allocation8 + $0x2e4] sm:$0xf]  ;;  %v5646_v39 = vld [vmem:[#allocation8 + $0x368] sm:$0xf0]  ;;  %v5457_v40 = vor.u32 %v6230_v22, %v5454_v23  ;;  %v6228_v12 = vld [vmem:[#allocation8 + $0x1d4] sm:$0xf] }
 0x2c8   :  { %3665 = vmatpush.bf16.msrb.mxu1 %v5257_v51  ;;  %v6172_v51 = vld [vmem:[#allocation8 + $0x14] sm:$0xf]  ;;  %v5446_v44 = vld [vmem:[#allocation8 + $0x1d8] sm:$0xf0]  ;;  %v5585_v31 = vor.u32 %v6262_v54, %v5582_v1  ;;  %v5630_v2 = vld [vmem:[#allocation8 + $0x348] sm:$0xf0] }
 0x2c9   :  { %3678 = vmatpush.bf16.msrb.mxu2 %v5321_v59  ;;  %3691 = vmatpush.bf16.msrb.mxu3 %v5385_v60  ;;  %v5286_v59 = vld [vmem:[#allocation8 + $0x98] sm:$0xf0]  ;;  %v6204_v60 = vld [vmem:[#allocation8 + $0x114] sm:$0xf]  ;;  %v5225_v3 = vor.u32 %v6172_v51, %v5222_v55  ;;  %v6238_v17 = vld [vmem:[#allocation8 + $0x224] sm:$0xf] }
 0x2ca   :  { %3653 = vmatpush.bf16.msrb.mxu0 %v5757_v0  ;;  %v6232_v0 = vld [vmem:[#allocation8 + $0x1f4] sm:$0xf]  ;;  %v5289_v4 = vor.u32 %v6188_v58, %v5286_v59  ;;  %v5353_v27 = vor.u32 %v6204_v60, %v5350_v56  ;;  %v5638_v55 = vld [vmem:[#allocation8 + $0x358] sm:$0xf0]  ;;  %v5513_v58 = vor.u32 %v6244_v46, %v5510_v47  ;;  %v6226_v59 = vld [vmem:[#allocation8 + $0x1c4] sm:$0xf] }
 0x2cb   :  { %v5465_v45 = vor.u32 %v6232_v0, %v5462_v35  ;;  %v6276_v51 = vld [vmem:[#allocation8 + $0x354] sm:$0xf]  ;;  %v5438_v60 = vld [vmem:[#allocation8 + $0x1c8] sm:$0xf0]  ;;  %v6274_v35 = vld [vmem:[#allocation8 + $0x344] sm:$0xf] }
 0x2cc   :  { %3666 = vmatpush.bf16.msrb.mxu1 %v5249_v38  ;;  %v5278_v38 = vld [vmem:[#allocation8 + $0x88] sm:$0xf0]  ;;  %v5641_v56 = vor.u32 %v6276_v51, %v5638_v55  ;;  %v6236_v54 = vld [vmem:[#allocation8 + $0x214] sm:$0xf]  ;;  %v5478_v1 = vld [vmem:[#allocation8 + $0x218] sm:$0xf0] }
 0x2cd   :  { %3679 = vmatpush.bf16.msrb.mxu2 %v5313_v9  ;;  %3692 = vmatpush.bf16.msrb.mxu3 %v5377_v10  ;;  %v6248_v9 = vld [vmem:[#allocation8 + $0x274] sm:$0xf]  ;;  %v5725_v10 = vor.u32 %v6299_v63, %v5724_v62  ;;  %v5281_v25 = vor.u32 %v6186_v7, %v5278_v38  ;;  %v6242_v62 = vld [vmem:[#allocation8 + $0x244] sm:$0xf]  ;;  %v5502_v63 = vld [vmem:[#allocation8 + $0x248] sm:$0xf0]  ;;  %v5633_v7 = vor.u32 %v6274_v35, %v5630_v2 }
 0x2ce   :  { %3606 = vmatmul.bf16.vlgmr.msra.gmra.mxu0 %v6937_v26  ;;  %v5529_v20 = vor.u32 %v6248_v9, %v5526_v11  ;;  %v5566_v0 = vld [vmem:[#allocation8 + $0x2c8] sm:$0xf0]  ;;  %v6240_v38 = vld [vmem:[#allocation8 + $0x234] sm:$0xf]  ;;  %v5718_v47 = vld [vmem:[#allocation8 + $0x3f8] sm:$0xf0] }
 0x2cf   :  { %3654 = vmatpush.bf16.msrb.mxu0 %v5749_v53  ;;  %3619 = vmatmul.bf16.vlgmr.msra.gmra.mxu1 %v6939_v29  ;;  %v5345_v53 = vor.u32 %v6202_v5, %v5342_v8  ;;  %v6256_v5 = vld [vmem:[#allocation8 + $0x2b4] sm:$0xf]  ;;  %v5558_v8 = vld [vmem:[#allocation8 + $0x2b8] sm:$0xf0]  ;;  %v5614_v22 = vld [vmem:[#allocation8 + $0x328] sm:$0xf0] }
 0x2d0   :  { %3632 = vmatmul.bf16.vlgmr.msra.gmra.mxu2 %v6942_v33  ;;  %3645 = vmatmul.bf16.vlgmr.msra.gmra.mxu3 %v6944_v34  ;;  %v6272_v9 = vld [vmem:[#allocation8 + $0x334] sm:$0xf]  ;;  %v5561_v43 = vor.u32 %v6256_v5, %v5558_v8  ;;  %v6234_v51 = vld [vmem:[#allocation8 + $0x204] sm:$0xf]  ;;  %v5470_v55 = vld [vmem:[#allocation8 + $0x208] sm:$0xf0] }
 0x2d1   :  { %3667 = vmatpush.bf16.msrb.mxu1 %v5241_v30  ;;  %3680 = vmatpush.bf16.msrb.mxu2 %v5305_v32  ;;  %v6246_v30 = vld [vmem:[#allocation8 + $0x264] sm:$0xf]  ;;  %v5518_v32 = vld [vmem:[#allocation8 + $0x268] sm:$0xf0]  ;;  %v6296_v46 = vld [vmem:[#allocation8 + $0x3f4] sm:$0xf] }
 0x2d2   :  { %3693 = vmatpush.bf16.msrb.mxu3 %v5369_v36  ;;  %v6278_v36 = vld [vmem:[#allocation8 + $0x364] sm:$0xf]  ;;  %v6308_v5 = vld [vmem:[#allocation8 + $0x454] sm:$0xf]  ;;  %v5766_v8 = vld [vmem:[#allocation8 + $0x458] sm:$0xf0] }
 0x2d3   :  { %3655 = vmatpush.bf16.msrb.mxu0 %v5741_v42  ;;  %v5521_v42 = vor.u32 %v6246_v30, %v5518_v32  ;;  %v5649_v48 = vor.u32 %v6278_v36, %v5646_v39  ;;  %v6252_v36 = vld [vmem:[#allocation8 + $0x294] sm:$0xf]  ;;  %v5542_v39 = vld [vmem:[#allocation8 + $0x298] sm:$0xf0] }
 0x2d5   :  { %3668 = vmatpush.bf16.msrb.mxu1 %v5233_v49  ;;  %3681 = vmatpush.bf16.msrb.mxu2 %v5297_v37  ;;  %v6260_v49 = vld [vmem:[#allocation8 + $0x2d4] sm:$0xf]  ;;  %v5574_v37 = vld [vmem:[#allocation8 + $0x2d8] sm:$0xf0] }
 0x2d6   :  { %3694 = vmatpush.bf16.msrb.mxu3 %v5361_v57  ;;  %v5449_v57 = vor.u32 %v6228_v12, %v5446_v44  ;;  %v6218_v44 = vld [vmem:[#allocation8 + $0x184] sm:$0xf] }
 0x2d7   :  { %3656 = vmatpush.bf16.msrb.mxu0 %v5733_v61  ;;  %v5577_v61 = vor.u32 %v6260_v49, %v5574_v37  ;;  %v5545_v49 = vor.u32 %v6252_v36, %v5542_v39  ;;  %v6282_v36 = vld [vmem:[#allocation8 + $0x384] sm:$0xf]  ;;  %v5662_v39 = vld [vmem:[#allocation8 + $0x388] sm:$0xf0] }
 0x2d9   :  { %3669 = vmatpush.bf16.msrb.mxu1 %v5225_v3  ;;  %3682 = vmatpush.bf16.msrb.mxu2 %v5289_v4  ;;  %v5441_v3 = vor.u32 %v6226_v59, %v5438_v60  ;;  %v6224_v4 = vld [vmem:[#allocation8 + $0x1b4] sm:$0xf]  ;;  %v6266_v59 = vld [vmem:[#allocation8 + $0x304] sm:$0xf]  ;;  %v5598_v60 = vld [vmem:[#allocation8 + $0x308] sm:$0xf0] }
 0x2da   :  { %3695 = vmatpush.bf16.msrb.mxu3 %v5353_v27  ;;  %v5494_v27 = vld [vmem:[#allocation8 + $0x238] sm:$0xf0]  ;;  %v5601_v35 = vor.u32 %v6266_v59, %v5598_v60  ;;  %v6314_v60 = vld [vmem:[%s7032_s9] sm:$0xff] }
 0x2db   :  { %3657 = vmatpush.bf16.msrb.mxu0 %v5725_v10  ;;  %v5622_v10 = vld [vmem:[#allocation8 + $0x338] sm:$0xf0]  ;;  %v5497_v13 = vor.u32 %v6240_v38, %v5494_v27  ;;  %v6292_v38 = vld [vmem:[#allocation8 + $0x3d4] sm:$0xf] }
 0x2dc   :  { %v5625_v14 = vor.u32 %v6272_v9, %v5622_v10  ;;  %v5702_v27 = vld [vmem:[#allocation8 + $0x3d8] sm:$0xf0]  ;;  %v5769_v10 = vor.u32 %v6308_v5, %v5766_v8 }
 0x2dd   :  { %3670 = vmatpush.bf16.msrb.mxu1 %v5217_v18  ;;  %3683 = vmatpush.bf16.msrb.mxu2 %v5281_v25  ;;  %v5486_v18 = vld [vmem:[#allocation8 + $0x228] sm:$0xf0]  ;;  %v6254_v25 = vld [vmem:[#allocation8 + $0x2a4] sm:$0xf]  ;;  %v5705_v9 = vor.u32 %v6292_v38, %v5702_v27 }
 0x2de   :  { %3696 = vmatpush.bf16.msrb.mxu3 %v5345_v53  ;;  %3658 = vmatmul.bf16.vlgmr.msrb.gmra.mxu0 %v6954_v41  ;;  %v5550_v53 = vld [vmem:[#allocation8 + $0x2a8] sm:$0xf0] }
 0x2df   :  { %3702 = vmatpush.bf16.msra.mxu0 %v5465_v45  ;;  %v5422_v45 = vld [vmem:[#allocation8 + $0x1a8] sm:$0xf0]  ;;  %v5553_v30 = vor.u32 %v6254_v25, %v5550_v53  ;;  %v6286_v25 = vld [vmem:[#allocation8 + $0x3a4] sm:$0xf] }
 0x2e0   :  { %3671 = vmatmul.bf16.vlgmr.msrb.gmra.mxu1 %v6898_v19  ;;  %3684 = vmatmul.bf16.vlgmr.msrb.gmra.mxu2 %v6907_v16  ;;  %v6258_v19 = vld [vmem:[#allocation8 + $0x2c4] sm:$0xf]  ;;  %v5505_v16 = vor.u32 %v6242_v62, %v5502_v63  ;;  %v5425_v23 = vor.u32 %v6222_v52, %v5422_v45  ;;  %v5782_v62 = vld [vmem:[#allocation8 + $0x478] sm:$0xf0]  ;;  %v5721_v63 = vor.u32 %v6296_v46, %v5718_v47  ;;  %v5678_v53 = vld [vmem:[#allocation8 + $0x3a8] sm:$0xf0] }
 0x2e1   :  { %3715 = vmatpush.bf16.msra.mxu1 %v5529_v20  ;;  %3728 = vmatpush.bf16.msra.mxu2 %v5593_v24  ;;  %v5569_v6 = vor.u32 %v6258_v19, %v5566_v0  ;;  %v6270_v20 = vld [vmem:[#allocation8 + $0x324] sm:$0xf]  ;;  %v5489_v24 = vor.u32 %v6238_v17, %v5486_v18  ;;  %v5473_v19 = vor.u32 %v6234_v51, %v5470_v55  ;;  %v6304_v17 = vld [vmem:[#allocation8 + $0x434] sm:$0xf]  ;;  %v5750_v18 = vld [vmem:[#allocation8 + $0x438] sm:$0xf0] }
 0x2e2   :  { %3741 = vmatpush.bf16.msra.mxu3 %v5657_v28  ;;  %v6220_v28 = vld [vmem:[#allocation8 + $0x194] sm:$0xf]  ;;  %v5617_v32 = vor.u32 %v6270_v20, %v5614_v22  ;;  %v6306_v52 = vld [vmem:[#allocation8 + $0x444] sm:$0xf]  ;;  %v5742_v22 = vld [vmem:[#allocation8 + $0x428] sm:$0xf0] }
 0x2e3   :  { %3703 = vmatpush.bf16.msra.mxu0 %v5457_v40  ;;  %3697 = vmatmul.bf16.vlgmr.msrb.gmra.mxu3 %v6909_v21  ;;  %v5430_v21 = vld [vmem:[#allocation8 + $0x1b8] sm:$0xf0]  ;;  %v6268_v40 = vld [vmem:[#allocation8 + $0x314] sm:$0xf]  ;;  %v5417_v12 = vor.u32 %v6220_v28, %v5414_v15  ;;  %v6302_v20 = vld [vmem:[#allocation8 + $0x424] sm:$0xf] }
 0x2e4   :  { %v5433_v11 = vor.u32 %v6224_v4, %v5430_v21  ;;  %v6310_v4 = vld [vmem:[#allocation8 + $0x464] sm:$0xf]  ;;  %v5774_v21 = vld [vmem:[#allocation8 + $0x468] sm:$0xf0]  ;;  %v6284_v28 = vld [vmem:[#allocation8 + $0x394] sm:$0xf] }
 0x2e5   :  { %3716 = vmatpush.bf16.msra.mxu1 %v5521_v42  ;;  %3729 = vmatpush.bf16.msra.mxu2 %v5585_v31  ;;  %v5606_v42 = vld [vmem:[#allocation8 + $0x318] sm:$0xf0]  ;;  %v5481_v31 = vor.u32 %v6236_v54, %v5478_v1  ;;  %v6319_v46 = vld [vmem:[%s7032_s9 + $0x28] sm:$0xff]  ;;  %v6316_v47 = vld [vmem:[%s7032_s9 + $0x10] sm:$0xff] }
 0x2e6   :  { %3742 = vmatpush.bf16.msra.mxu3 %v5649_v48  ;;  %v5406_v48 = vld [vmem:[#allocation8 + $0x188] sm:$0xf0]  ;;  %v5609_v37 = vor.u32 %v6268_v40, %v5606_v42  ;;  %v5670_v15 = vld [vmem:[#allocation8 + $0x398] sm:$0xf0]  ;;  %v6298_v40 = vld [vmem:[#allocation8 + $0x404] sm:$0xf] }
 0x2e7   :  { %3704 = vmatpush.bf16.msra.mxu0 %v5449_v57  ;;  %v6250_v57 = vld [vmem:[#allocation8 + $0x284] sm:$0xf]  ;;  %v5673_v54 = vor.u32 %v6284_v28, %v5670_v15  ;;  %v5726_v42 = vld [vmem:[#allocation8 + $0x408] sm:$0xf0]  ;;  %v6984_v51 = vld [vmem:[#allocation10] sm:$0x3] }
 0x2e8   :  { %v6315_v55 = vld [vmem:[%s7032_s9 + $0x8] sm:$0xff] }
 0x2e9   :  { %3717 = vmatpush.bf16.msra.mxu1 %v5513_v58  ;;  %3730 = vmatpush.bf16.msra.mxu2 %v5577_v61  ;;  %v5534_v58 = vld [vmem:[#allocation8 + $0x288] sm:$0xf0]  ;;  %v5409_v61 = vor.u32 %v6218_v44, %v5406_v48  ;;  %v5729_v44 = vor.u32 %v6298_v40, %v5726_v42  ;;  %v6320_v48 = vld [vmem:[%s7032_s9 + $0x30] sm:$0xff] }
 0x2ea   :  { %3743 = vmatpush.bf16.msra.mxu3 %v5641_v56  ;;  %v6312_v56 = vld [vmem:[#allocation8 + $0x474] sm:$0xf]  ;;  %v5537_v0 = vor.u32 %v6250_v57, %v5534_v58  ;;  %v2822_v57 = vperm.slane %v6984_v51, 0  ;;  %v6323_v15 = vld [vmem:[%s7032_s9 + $0x48] sm:$0xff] }
 0x2eb   :  { %3705 = vmatpush.bf16.msra.mxu0 %v5441_v3  ;;  %v5785_v2 = vor.u32 %v6312_v56, %v5782_v62  ;;  %v6294_v3 = vld [vmem:[#allocation8 + $0x3e4] sm:$0xf] }
 0x2ed   :  { %3718 = vmatpush.bf16.msra.mxu1 %v5505_v16  ;;  %3731 = vmatpush.bf16.msra.mxu2 %v5569_v6  ;;  %v5710_v16 = vld [vmem:[#allocation8 + $0x3e8] sm:$0xf0] }
 0x2ee   :  { %3744 = vmatpush.bf16.msra.mxu3 %v5633_v7  ;;  %v5713_v6 = vor.u32 %v6294_v3, %v5710_v16  ;;  %v5777_v7 = vor.u32 %v6310_v4, %v5774_v21 }
 0x2ef   :  { %3706 = vmatpush.bf16.msra.mxu0 %v5433_v11  ;;  %v6290_v11 = vld [vmem:[#allocation8 + $0x3c4] sm:$0xf] }
 0x2f1   :  { %3719 = vmatpush.bf16.msra.mxu1 %v5497_v13  ;;  %3732 = vmatpush.bf16.msra.mxu2 %v5561_v43  ;;  %v5694_v13 = vld [vmem:[#allocation8 + $0x3c8] sm:$0xf0] }
 0x2f2   :  { %3745 = vmatpush.bf16.msra.mxu3 %v5625_v14  ;;  %v5697_v45 = vor.u32 %v6290_v11, %v5694_v13  ;;  %v6288_v14 = vld [vmem:[#allocation8 + $0x3b4] sm:$0xf]  ;;  %v6329_v11 = vld [vmem:[%s7032_s9 + $0x78] sm:$0xff] }
 0x2f3   :  { %3707 = vmatpush.bf16.msra.mxu0 %v5425_v23  ;;  %v5681_v23 = vor.u32 %v6286_v25, %v5678_v53  ;;  %v6326_v25 = vld [vmem:[%s7032_s9 + $0x60] sm:$0xff] }
 0x2f5   :  { %3720 = vmatpush.bf16.msra.mxu1 %v5489_v24  ;;  %3733 = vmatpush.bf16.msra.mxu2 %v5553_v30  ;;  %v5745_v24 = vor.u32 %v6302_v20, %v5742_v22  ;;  %v6300_v30 = vld [vmem:[#allocation8 + $0x414] sm:$0xf]  ;;  %v6325_v22 = vld [vmem:[%s7032_s9 + $0x58] sm:$0xff] }
 0x2f6   :  { %3746 = vmatpush.bf16.msra.mxu3 %v5617_v32  ;;  %v5734_v32 = vld [vmem:[#allocation8 + $0x418] sm:$0xf0] }
 0x2f7   :  { %3708 = vmatpush.bf16.msra.mxu0 %v5417_v12  ;;  %v5737_v1 = vor.u32 %v6300_v30, %v5734_v32  ;;  %v5665_v12 = vor.u32 %v6282_v36, %v5662_v39  ;;  %v6322_v30 = vld [vmem:[%s7032_s9 + $0x40] sm:$0xff]  ;;  %v2823_v32 = vperm.slane %v6984_v51, 1 }
 0x2f9   :  { %3721 = vmatpush.bf16.msra.mxu1 %v5481_v31  ;;  %3734 = vmatpush.bf16.msra.mxu2 %v5545_v49  ;;  %v6321_v31 = vld [vmem:[%s7032_s9 + $0x38] sm:$0xff] }
 0x2fa   :  { %3747 = vmatpush.bf16.msra.mxu3 %v5609_v37 }
 0x2fb   :  { %3709 = vmatpush.bf16.msra.mxu0 %v5409_v61 }
 0x2fd   :  { %3722 = vmatpush.bf16.msra.mxu1 %v5473_v19  ;;  %3735 = vmatpush.bf16.msra.mxu2 %v5537_v0 }
 0x2fe   :  { %3748 = vmatpush.bf16.msra.mxu3 %v5601_v35  ;;  %3710 = vmatmul.bf16.vlgmr.msra.gmra.mxu0 %v6911_v50  ;;  %v5758_v50 = vld [vmem:[#allocation8 + $0x448] sm:$0xf0] }
 0x2ff   :  { %3754 = vmatpush.bf16.msrb.mxu0 %v5721_v63  ;;  %v5761_v43 = vor.u32 %v6306_v52, %v5758_v50 }
 0x300   :  { %3723 = vmatmul.bf16.vlgmr.msra.gmra.mxu1 %v6937_v26  ;;  %3736 = vmatmul.bf16.vlgmr.msra.gmra.mxu2 %v6939_v29  ;;  %v5686_v26 = vld [vmem:[#allocation8 + $0x3b8] sm:$0xf0] }
 0x301   :  { %3767 = vmatpush.bf16.msrb.mxu1 %v5785_v2  ;;  %3749 = vmatmul.bf16.vlgmr.msra.gmra.mxu3 %v6942_v33  ;;  %v5689_v29 = vor.u32 %v6288_v14, %v5686_v26  ;;  %v5753_v33 = vor.u32 %v6304_v17, %v5750_v18  ;;  %v6328_v26 = vld [vmem:[%s7032_s9 + $0x70] sm:$0xff] }
 0x302   :  { %3916 = vmatpush.bf16.msrb.mxu2 %v6321_v31  ;;  %3929 = vmatpush.bf16.msrb.mxu3 %v6329_v11 }
 0x303   :  { %3755 = vmatpush.bf16.msrb.mxu0 %v5713_v6 }
 0x305   :  { %3768 = vmatpush.bf16.msrb.mxu1 %v5777_v7 }
 0x306   :  { %3917 = vmatpush.bf16.msrb.mxu2 %v6320_v48  ;;  %3930 = vmatpush.bf16.msrb.mxu3 %v6328_v26 }
 0x307   :  { %3756 = vmatpush.bf16.msrb.mxu0 %v5705_v9 }
 0x309   :  { %3769 = vmatpush.bf16.msrb.mxu1 %v5769_v10 }
 0x30a   :  { %3918 = vmatpush.bf16.msrb.mxu2 %v6319_v46 }
 0x30b   :  { %3757 = vmatpush.bf16.msrb.mxu0 %v5697_v45 }
 0x30d   :  { %3770 = vmatpush.bf16.msrb.mxu1 %v5761_v43 }
 0x30f   :  { %3758 = vmatpush.bf16.msrb.mxu0 %v5689_v29 }
 0x311   :  { %3771 = vmatpush.bf16.msrb.mxu1 %v5753_v33  ;;  %v6327_v33 = vld [vmem:[%s7032_s9 + $0x68] sm:$0xff] }
 0x312   :  { %3931 = vmatpush.bf16.msrb.mxu3 %v6327_v33 }
 0x313   :  { %3759 = vmatpush.bf16.msrb.mxu0 %v5681_v23  ;;  %v6324_v23 = vld [vmem:[%s7032_s9 + $0x50] sm:$0xff] }
 0x315   :  { %3772 = vmatpush.bf16.msrb.mxu1 %v5745_v24 }
 0x316   :  { %3932 = vmatpush.bf16.msrb.mxu3 %v6326_v25 }
 0x317   :  { %3760 = vmatpush.bf16.msrb.mxu0 %v5673_v54 }
 0x319   :  { %3773 = vmatpush.bf16.msrb.mxu1 %v5737_v1 }
 0x31a   :  { %3933 = vmatpush.bf16.msrb.mxu3 %v6325_v22 }
 0x31b   :  { %3761 = vmatpush.bf16.msrb.mxu0 %v5665_v12 }
 0x31d   :  { %3774 = vmatpush.bf16.msrb.mxu1 %v5729_v44 }
 0x31e   :  { %3762 = vmatmul.bf16.vlgmr.msrb.gmra.mxu0 %v6944_v34  ;;  %v6318_v34 = vld [vmem:[%s7032_s9 + $0x20] sm:$0xff]  ;;  %3934 = vmatpush.bf16.msrb.mxu3 %v6324_v23 }
 0x31f   :  { %3919 = vmatpush.bf16.msrb.mxu2 %v6318_v34 }
 0x320   :  { %3775 = vmatmul.bf16.vlgmr.msrb.gmra.mxu1 %v6954_v41  ;;  %v6317_v41 = vld [vmem:[%s7032_s9 + $0x18] sm:$0xff]  ;;  %s6606_s9 = smov [#allocation16]  }
 0x321   :  { %s4042_s22 = sshll.u32 %s6606_s9, 4  ;;  %s4043_s22 = int_to_ptr.vmem [resolvable:$true] %s4042_s22 }
 0x322   :  { %3935 = vmatpush.bf16.msrb.mxu3 %v6323_v15 }
 0x323   :  { %3920 = vmatpush.bf16.msrb.mxu2 %v6317_v41 }
 0x326   :  { %3936 = vmatpush.bf16.msrb.mxu3 %v6322_v30 }
 0x327   :  { %3921 = vmatpush.bf16.msrb.mxu2 %v6316_v47 }
 0x32b   :  { %3922 = vmatpush.bf16.msrb.mxu2 %v6315_v55 }
 0x32f   :  { %3923 = vmatpush.bf16.msrb.mxu2 %v6314_v60  ;;  %v6337_v60 = vld [vmem:[#allocation13 + $0x38] sm:$0xff] }
 0x330   :  { %4012 = vmatpush.bf16.msra.mxu0 %v6337_v60 }
 0x33a   :  { %v3555_v49 = vpop.f32.mrf.mxu0 }
 0x33b   :  { %v3556_v62 = vadd.f32 %v3555_v49, %v2822_v57 }
 0x33c   :  { %v3568_v37 = vpop.f32.mrf.mxu1 }
 0x33d   :  { %v3569_v63 = vadd.f32 %v3568_v37, %v3556_v62  ;;  %v6334_v62 = vld [vmem:[#allocation13 + $0x20] sm:$0xff] }
 0x342   :  { %v3557_v58 = vpop.f32.mrf.mxu0  ;;  %v3581_v59 = vpop.f32.mrf.mxu2 }
 0x343   :  { %v3594_v61 = vpop.f32.mrf.mxu3  ;;  %v3582_v2 = vadd.f32 %v3581_v59, %v3569_v63  ;;  %v6333_v63 = vld [vmem:[#allocation13 + $0x18] sm:$0xff] }
 0x344   :  { %v3570_v56 = vpop.f32.mrf.mxu1 }
 0x345   :  { %v3595_v16 = vadd.f32 %v3594_v61, %v3582_v2  ;;  %v6336_v61 = vld [vmem:[#allocation13 + $0x30] sm:$0xff]  ;;  %v6335_v56 = vld [vmem:[#allocation13 + $0x28] sm:$0xff] }
 0x346   :  { %4013 = vmatpush.bf16.msra.mxu0 %v6336_v61  ;;  %v6331_v2 = vld [vmem:[#allocation13 + $0x8] sm:$0xff] }
 0x34a   :  { %v3583_v19 = vpop.f32.mrf.mxu2  ;;  %4014 = vmatpush.bf16.msra.mxu0 %v6335_v56 }
 0x34b   :  { %v3596_v0 = vpop.f32.mrf.mxu3  ;;  %v3607_v35 = vpop.f32.mrf.mxu0  ;;  %v6332_v19 = vld [vmem:[#allocation13 + $0x10] sm:$0xff] }
 0x34c   :  { %v3620_v3 = vpop.f32.mrf.mxu1  ;;  %v3608_v4 = vadd.f32 %v3607_v35, %v3595_v16  ;;  %v6356_v16 = vld [vmem:[#allocation11] ss:$0 sm:$0xff] }
 0x34e   :  { %v3621_v27 = vadd.f32 %v3620_v3, %v3608_v4  ;;  %4015 = vmatpush.bf16.msra.mxu0 %v6334_v62  ;;  %v6330_v3 = vld [vmem:[#allocation13] sm:$0xff] }
 0x352   :  { %4016 = vmatpush.bf16.msra.mxu0 %v6333_v63 }
 0x353   :  { %v3609_v21 = vpop.f32.mrf.mxu0  ;;  %v3633_v6 = vpop.f32.mrf.mxu2 }
 0x354   :  { %v3646_v7 = vpop.f32.mrf.mxu3  ;;  %v3622_v38 = vpop.f32.mrf.mxu1  ;;  %v3634_v5 = vadd.f32 %v3633_v6, %v3621_v27 }
 0x356   :  { %v3647_v9 = vadd.f32 %v3646_v7, %v3634_v5  ;;  %4017 = vmatpush.bf16.msra.mxu0 %v6332_v19  ;;  %v6357_v5 = vld [vmem:[#allocation14] ss:$0 sm:$0xff] }
 0x35a   :  { %4018 = vmatpush.bf16.msra.mxu0 %v6331_v2 }
 0x35b   :  { %v3635_v8 = vpop.f32.mrf.mxu2  ;;  %v3659_v13 = vpop.f32.mrf.mxu0 }
 0x35c   :  { %v3648_v10 = vpop.f32.mrf.mxu3  ;;  %v3660_v50 = vadd.f32 %v3659_v13, %v3647_v9 }
 0x35d   :  { %v3672_v52 = vpop.f32.mrf.mxu1 }
 0x35e   :  { %v3780_v45 = vmax.f32 %v3660_v50, 0.0  ;;  %v3673_v40 = vadd.f32 %v3672_v52, %v2823_v32  ;;  %4019 = vmatpush.bf16.msra.mxu0 %v6330_v3 }
 0x360   :  { %v3782_v43 = vpack.c.bf16 %v3780_v45, %v3780_v45 }
 0x362   :  { %3924 = vmatmul.bf16.vlgmr.msrb.gmra.mxu2 %v3782_v43 }
 0x363   :  { %v3685_v14 = vpop.f32.mrf.mxu2  ;;  %v3661_v17 = vpop.f32.mrf.mxu0 }
 0x364   :  { %v3686_v42 = vadd.f32 %v3685_v14, %v3673_v40 }
 0x365   :  { %v3674_v29 = vpop.f32.mrf.mxu1 }
 0x366   :  { %v3698_v18 = vpop.f32.mrf.mxu3 }
 0x367   :  { %v3699_v44 = vadd.f32 %v3698_v18, %v3686_v42 }
 0x36b   :  { %v3687_v53 = vpop.f32.mrf.mxu2 }
 0x36e   :  { %v3700_v20 = vpop.f32.mrf.mxu3 }
 0x37b   :  { %v3711_v24 = vpop.f32.mrf.mxu0 }
 0x37c   :  { %v3712_v48 = vadd.f32 %v3711_v24, %v3699_v44 }
 0x37d   :  { %v3724_v28 = vpop.f32.mrf.mxu1 }
 0x37e   :  { %v3725_v46 = vadd.f32 %v3724_v28, %v3712_v48 }
 0x383   :  { %v3713_v54 = vpop.f32.mrf.mxu0  ;;  %v3737_v1 = vpop.f32.mrf.mxu2 }
 0x384   :  { %v3750_v36 = vpop.f32.mrf.mxu3  ;;  %v3738_v34 = vadd.f32 %v3737_v1, %v3725_v46 }
 0x385   :  { %v3726_v39 = vpop.f32.mrf.mxu1 }
 0x386   :  { %v3751_v41 = vadd.f32 %v3750_v36, %v3738_v34 }
 0x38b   :  { %v3739_v12 = vpop.f32.mrf.mxu2 }
 0x38c   :  { %v3752_v31 = vpop.f32.mrf.mxu3 }
 0x39b   :  { %v3763_v47 = vpop.f32.mrf.mxu0 }
 0x39c   :  { %v3764_v49 = vadd.f32 %v3763_v47, %v3751_v41 }
 0x39d   :  { %v3776_v37 = vpop.f32.mrf.mxu1 }
 0x39e   :  { %v3777_v55 = vadd.f32 %v3776_v37, %v3764_v49 }
 0x3a0   :  { %v3781_v57 = vmax.f32 %v3777_v55, 0.0 }
 0x3a2   :  { %v3783_v51 = vpack.c.bf16 %v3781_v57, %v3781_v57 }
 0x3a3   :  { %v3765_v58 = vpop.f32.mrf.mxu0 }
 0x3a4   :  { %3937 = vmatmul.bf16.vlgmr.msrb.gmra.mxu3 %v3783_v51 }
 0x3a5   :  { %v3778_v59 = vpop.f32.mrf.mxu1 }
 0x3e5   :  { %v3925_v0 = vpop.f32.mrf.mxu2 }
 0x3e6   :  { %v3926_v4 = vadd.f32 %v6356_v16, %v3925_v0 }
 0x3ed   :  { %v3927_v35 = vpop.f32.mrf.mxu2 }
 0x427   :  { %v3938_v21 = vpop.f32.mrf.mxu3 }
 0x428   :  { %v3939_v6 = vadd.f32 %v3938_v21, %v3926_v4 }
 0x42a   :  { %v3942_v7 = vmax.f32 %v3939_v6, 0.0 }
 0x42c   :  { %v3943_v38 = vpack.c.bf16 %v3942_v7, %v3942_v7 }
 0x42e   :  { %4020 = vmatmul.bf16.vlgmr.msra.gmra.mxu0 %v3943_v38 }
 0x42f   :  { %v3940_v27 = vpop.f32.mrf.mxu3 }
 0x4ab   :  { %v4021_v8 = vpop.f32.mrf.mxu0 }
 0x4ac   :  { %v4022_v9 = vadd.f32 %v6357_v5, %v4021_v8 }
 0x4ae   :  { %v4025_v10 = vsel %vm1323_vm5, %v4022_v9, -inf }
 0x4af   :  { %4026 = vmax.xlane.f32.xlu0 %v4025_v10 }
 0x4b3   :  { %v4023_v11 = vpop.f32.mrf.mxu0 }
 0x522   :  { %v4027_v13 = vpop.xlane.xlu0 %4026 }
 0x523   :  { %v4028_v52 = vsub.f32 %v4022_v9, %v4027_v13 }
 0x525   :  { %v4029_v50 = vmul.f32 1.442695, %v4028_v52 }
 0x527   :  { %6358 = vpow2.f32 %v4029_v50 }
 0x52d   :  { %v6359_v45 = vpop.eup %6358 }
 0x52e   :  { %v4031_v43 = vsel %vm1323_vm5, %v6359_v45, 0.0 }
 0x52f   :  { %4032 = vadd.xlane.f32.xlu0 %v4031_v43 }
 0x5a2   :  { %v4033_v14 = vpop.xlane.xlu0 %4032 }
 0x5a3   :  { %6360 = vrcp.f32 %v4033_v14 }
 0x5a9   :  { %v6361_v26 = vpop.eup %6360 }
 0x5aa   :  { %v4035_v17 = vmul.f32 %v6361_v26, %v6359_v45 }
 0x5ac   :  { %4036 = vst [vmem:[#allocation16] sm:$0x3] %v4035_v17 }
 0x5ad   :  { %4047 = dma.vmem_to_hbm [thread:$0]  %s4043_s22, 32, %s4045_s23, [#allocation4]  }
 0x5ae   :  { %6588 = dma.done.wait [#allocation4], 32  }
 0x5af   :  { %6589 = vsyncadd [#allocation4], 4294967264 }
 0x5b0   :  { %4052 = vsyncpa [#allocation3], 1 }
 0x5b1   :  { %4053 = vsyncpa [#allocation6], 1 }
 0x5b2   :  { %4054 = vsyncpa [#allocation9], 1 }
 0x5b3   :  { %4055 = vsyncpa [#allocation12], 1 }
 0x5b4   :  { %4056 = vsyncpa [#allocation15], 1 }
 0x5b5   :  { %4057 = vsyncpa [#allocation4], 1 }

</bundles_post_ra>
